<compile_context>
chip_gen: v6e
topology: v6e:2x2x1
jax: 0.10.0
libtpu: 0.0.40
codegen_flags: <defaults>
</compile_context>

<pallas_src>
import functools

import jax
import jax.numpy as jnp
from jax.experimental import pallas as pl
from jax.experimental.pallas import tpu as pltpu

LN_EPS = 1e-5


def _pick_tile(dim, target, align):
    """Largest legal tile <= target that evenly divides dim (or the full dim)."""
    if dim <= target:
        return dim
    t = (target // align) * align
    while t >= align:
        if dim % t == 0:
            return t
        t -= align
    return dim


# ----------------------------- LayerNorm kernel -----------------------------
def _layernorm_kernel(x_ref, g_ref, b_ref, o_ref):
    x = x_ref[...].astype(jnp.float32)
    mean = jnp.mean(x, axis=-1, keepdims=True)
    xc = x - mean
    var = jnp.mean(xc * xc, axis=-1, keepdims=True)
    y = xc * jax.lax.rsqrt(var + LN_EPS)
    o_ref[...] = (y * g_ref[...].astype(jnp.float32)
                  + b_ref[...].astype(jnp.float32)).astype(o_ref.dtype)


def layernorm(x2d, gamma, beta, tm=512):
    # mem-bound: 512-row tiles sit near the HBM roofline on all generations.
    M, D = x2d.shape
    tm = _pick_tile(M, tm, 8)
    return pl.pallas_call(
        _layernorm_kernel,
        out_shape=jax.ShapeDtypeStruct((M, D), x2d.dtype),
        grid=(M // tm,),
        in_specs=[
            pl.BlockSpec((tm, D), lambda i: (i, 0)),
            pl.BlockSpec((1, D), lambda i: (0, 0)),
            pl.BlockSpec((1, D), lambda i: (0, 0)),
        ],
        out_specs=pl.BlockSpec((tm, D), lambda i: (i, 0)),
        compiler_params=pltpu.CompilerParams(dimension_semantics=("parallel",)),
    )(x2d, gamma.reshape(1, D), beta.reshape(1, D))


# --------------------- Tiled matmul with fused epilogue ----------------------
def _matmul_kernel(*refs, activation, n_res):
    x_ref, w_ref, b_ref = refs[:3]
    res_refs = refs[3:3 + n_res]
    o_ref = refs[3 + n_res]
    acc_ref = refs[4 + n_res]
    k = pl.program_id(2)

    @pl.when(k == 0)
    def _():
        acc_ref[...] = jnp.zeros_like(acc_ref)

    # bf16 operands straight into the MXU, f32 accumulation.
    acc_ref[...] += jnp.dot(x_ref[...], w_ref[...],
                            preferred_element_type=jnp.float32)

    @pl.when(k == pl.num_programs(2) - 1)
    def _():
        out = acc_ref[...] + b_ref[...].astype(jnp.float32)
        if activation == "gelu":
            # TODO(synk): torch.nn.GELU default is the exact erf form; tanh
            #             approximation kept for robust Mosaic lowering.
            out = jax.nn.gelu(out, approximate=True)
        for r in res_refs:
            out = out + r[...].astype(jnp.float32)
        o_ref[...] = out.astype(o_ref.dtype)


def _weight_block_spec(tk, tn, k_steps):
    idx = lambda i, j, k: (k, j)
    # 3-deep buffering on the only operand whose block changes every k step;
    # only worth it (and only requested) for long K reductions.
    if k_steps >= 3 and hasattr(pl, "Buffered"):
        try:
            return pl.BlockSpec((tk, tn), idx, pipeline_mode=pl.Buffered(3))
        except TypeError:
            pass
    return pl.BlockSpec((tk, tn), idx)


def matmul(x, w, b, *, residuals=(), activation=None, out_dtype=None,
           tm=512, tn=512, tk=1024):
    M, K = x.shape
    N = w.shape[1]
    out_dtype = out_dtype or x.dtype
    tm = _pick_tile(M, tm, 8)
    tn = _pick_tile(N, tn, 128)
    tk = _pick_tile(K, tk, 128)
    k_steps = K // tk
    n_res = len(residuals)
    kern = functools.partial(_matmul_kernel, activation=activation, n_res=n_res)
    in_specs = [
        pl.BlockSpec((tm, tk), lambda i, j, k: (i, k)),
        _weight_block_spec(tk, tn, k_steps),
        pl.BlockSpec((1, tn), lambda i, j, k: (0, j)),
    ] + [pl.BlockSpec((tm, tn), lambda i, j, k: (i, j)) for _ in residuals]
    itemsize = x.dtype.itemsize
    cost = pl.CostEstimate(
        flops=2 * M * K * N,
        transcendentals=(M * N if activation == "gelu" else 0),
        bytes_accessed=(M * K + K * N + (1 + n_res) * M * N) * itemsize)
    return pl.pallas_call(
        kern,
        out_shape=jax.ShapeDtypeStruct((M, N), out_dtype),
        grid=(M // tm, N // tn, k_steps),
        in_specs=in_specs,
        out_specs=pl.BlockSpec((tm, tn), lambda i, j, k: (i, j)),
        scratch_shapes=[pltpu.VMEM((tm, tn), jnp.float32)],
        compiler_params=pltpu.CompilerParams(
            dimension_semantics=("parallel", "parallel", "arbitrary")),
        cost_estimate=cost,
    )(x, w, b.reshape(1, N), *residuals)


# --------------- Fused QKV projection with RoPE + scale epilogue --------------
def _qkv_rope_kernel(x_ref, w_ref, b_ref, c_ref, s_ref, o_ref, acc_ref,
                     *, n_heads, head_dim, scale):
    j = pl.program_id(1)          # head-sized column block: [Q heads|K heads|V heads]
    k = pl.program_id(2)

    @pl.when(k == 0)
    def _():
        acc_ref[...] = jnp.zeros_like(acc_ref)

    acc_ref[...] += jnp.dot(x_ref[...], w_ref[...],
                            preferred_element_type=jnp.float32)

    @pl.when(k == pl.num_programs(2) - 1)
    def _():
        out = acc_ref[...] + b_ref[...].astype(jnp.float32)
        is_q = j < n_heads
        is_k = jnp.logical_and(j >= n_heads, j < 2 * n_heads)
        is_v = j >= 2 * n_heads

        def _rope(t):
            # rotate-half: sin table has the sign already folded in.
            return t * c_ref[...] + pltpu.roll(t, head_dim // 2, axis=1) * s_ref[...]

        @pl.when(is_q)
        def _():
            # 1/sqrt(Dh) folded into Q once, so attention never rescales scores.
            o_ref[...] = (_rope(out) * scale).astype(o_ref.dtype)

        @pl.when(is_k)
        def _():
            o_ref[...] = _rope(out).astype(o_ref.dtype)

        @pl.when(is_v)
        def _():
            o_ref[...] = out.astype(o_ref.dtype)


def qkv_rope_projection(x, w, b, cos, sin_signed, *, batch, seq, n_heads,
                        head_dim, tm=512, tk=1024):
    """x @ w_qkv + b, with RoPE applied to the Q/K column ranges and the
    softmax scale folded into Q, all in the matmul epilogue."""
    M, K = x.shape
    N = w.shape[1]
    assert N == 3 * n_heads * head_dim
    assert M == batch * seq
    scale = 1.0 / (head_dim ** 0.5)
    tm = _pick_tile(seq, tm, 8)        # row blocks never cross a batch boundary
    tk = _pick_tile(K, tk, 128)
    tn = head_dim                      # per-head column blocks so roll stays in-head
    k_steps = K // tk
    blocks_per_seq = seq // tm

    cos_f = cos.astype(jnp.float32)
    sin_f = sin_signed.astype(jnp.float32)

    def rope_map(i, j, k):
        return (i % blocks_per_seq, 0)

    kern = functools.partial(_qkv_rope_kernel, n_heads=n_heads,
                             head_dim=head_dim, scale=scale)
    itemsize = x.dtype.itemsize
    cost = pl.CostEstimate(
        flops=2 * M * K * N,
        transcendentals=0,
        bytes_accessed=(M * K + K * N + M * N) * itemsize + 2 * seq * head_dim * 4)
    return pl.pallas_call(
        kern,
        out_shape=jax.ShapeDtypeStruct((M, N), x.dtype),
        grid=(M // tm, N // tn, k_steps),
        in_specs=[
            pl.BlockSpec((tm, tk), lambda i, j, k: (i, k)),
            _weight_block_spec(tk, tn, k_steps),
            pl.BlockSpec((1, tn), lambda i, j, k: (0, j)),
            pl.BlockSpec((tm, tn), rope_map),      # cos
            pl.BlockSpec((tm, tn), rope_map),      # sign-folded sin
        ],
        out_specs=pl.BlockSpec((tm, tn), lambda i, j, k: (i, j)),
        scratch_shapes=[pltpu.VMEM((tm, tn), jnp.float32)],
        compiler_params=pltpu.CompilerParams(
            dimension_semantics=("parallel", "parallel", "arbitrary")),
        cost_estimate=cost,
    )(x, w, b.reshape(1, N), cos_f, sin_f)


# ----------------- Flash causal attention (reads the QKV slab) ---------------
def _flash_attn_kernel(q_ref, k_ref, v_ref, o_ref, m_ref, l_ref, acc_ref,
                       *, tq, tk):
    qi = pl.program_id(1)
    ki = pl.program_id(2)

    @pl.when(ki == 0)
    def _():
        m_ref[...] = jnp.full_like(m_ref, -jnp.inf)
        l_ref[...] = jnp.zeros_like(l_ref)
        acc_ref[...] = jnp.zeros_like(acc_ref)

    # Skip KV tiles entirely above the causal diagonal (start_pos = 0).
    # RoPE + scale already applied at QKV-projection time -> bf16 refs feed
    # the MXU directly, no per-iteration VPU/XLU work.
    @pl.when(ki * tk <= qi * tq + (tq - 1))
    def _():
        s = jax.lax.dot_general(
            q_ref[...], k_ref[...],
            (((1,), (1,)), ((), ())),
            preferred_element_type=jnp.float32)                 # (tq, tk)
        row = qi * tq + jax.lax.broadcasted_iota(jnp.int32, (tq, tk), 0)
        col = ki * tk + jax.lax.broadcasted_iota(jnp.int32, (tq, tk), 1)
        s = jnp.where(col <= row, s, jnp.float32(-1e30))
        m_prev = m_ref[...]
        m_new = jnp.maximum(m_prev, jnp.max(s, axis=-1, keepdims=True))
        alpha = jnp.exp(m_prev - m_new)
        p = jnp.exp(s - m_new)
        l_ref[...] = alpha * l_ref[...] + jnp.sum(p, axis=-1, keepdims=True)
        acc_ref[...] = alpha * acc_ref[...] + jnp.dot(
            p.astype(v_ref.dtype), v_ref[...],
            preferred_element_type=jnp.float32)
        m_ref[...] = m_new

    @pl.when(ki == pl.num_programs(2) - 1)
    def _():
        inv_l = pl.reciprocal(l_ref[...], approx=True)
        o_ref[...] = (acc_ref[...] * inv_l).astype(o_ref.dtype)


def flash_attention_qkv(qkv, *, batch, heads, seq, head_dim, tq=256, tk=256):
    """Causal MHA reading pre-rotated Q/K and V straight out of the fused
    (M, 3D) slab.  Output is written directly in (M, D) row-major layout."""
    D = heads * head_dim
    M = batch * seq
    assert qkv.shape == (M, 3 * D)
    # TODO(synk): head_dim < 128 (real Falcon Dh=64, multi-query K/V) needs two
    #             heads packed per 128-lane block for lane-dense q/k/v/o tiles.
    assert head_dim % 128 == 0, "demo assumes lane-dense head_dim"
    # 256-wide tiles fill the v6e/v7x 256x256 MXU; on a 128-MXU v5e they are
    # merely neutral, so a single default is kept.
    tq = _pick_tile(seq, tq, 8)
    tk = _pick_tile(seq, tk, 8)
    nq, nk = seq // tq, seq // tk
    kern = functools.partial(_flash_attn_kernel, tq=tq, tk=tk)

    def q_map(bh, qi, ki):
        return (bh // heads) * nq + qi, bh % heads

    def kv_block(qi, ki):
        # Clamp past-the-diagonal kv tiles to the last needed tile: repeated
        # block indices make Pallas skip the (dead) DMA as well as the compute.
        return jnp.minimum(ki, (qi * tq + (tq - 1)) // tk)

    def k_map(bh, qi, ki):
        return (bh // heads) * nk + kv_block(qi, ki), heads + bh % heads

    def v_map(bh, qi, ki):
        return (bh // heads) * nk + kv_block(qi, ki), 2 * heads + bh % heads

    def o_map(bh, qi, ki):
        return (bh // heads) * nq + qi, bh % heads

    itemsize = qkv.dtype.itemsize
    # Causal: ~half the score/PV flops; K/V blocks are re-read once per live
    # (q tile, kv tile) pair after DMA clamping.
    kv_reread = (nq + 1) / 2.0
    cost = pl.CostEstimate(
        flops=int(2 * batch * heads * seq * seq * head_dim),
        transcendentals=int(batch * heads * seq * seq // 2),
        bytes_accessed=int((2 * M * D + 2 * kv_reread * M * D) * itemsize))

    return pl.pallas_call(
        kern,
        out_shape=jax.ShapeDtypeStruct((M, D), qkv.dtype),
        grid=(batch * heads, nq, nk),
        in_specs=[
            pl.BlockSpec((tq, head_dim), q_map),
            pl.BlockSpec((tk, head_dim), k_map),
            pl.BlockSpec((tk, head_dim), v_map),
        ],
        out_specs=pl.BlockSpec((tq, head_dim), o_map),
        scratch_shapes=[
            pltpu.VMEM((tq, 1), jnp.float32),          # m (running max)
            pltpu.VMEM((tq, 1), jnp.float32),          # l (running denom)
            pltpu.VMEM((tq, head_dim), jnp.float32),   # acc
        ],
        compiler_params=pltpu.CompilerParams(
            dimension_semantics=("parallel", "parallel", "arbitrary")),
        cost_estimate=cost,
    )(qkv, qkv, qkv)


# --------------------------------- RoPE tables --------------------------------
def rope_tables(seq, dim, base=10000.0):
    inv_freq = 1.0 / (base ** (jnp.arange(0, dim, 2, dtype=jnp.float32) / dim))
    t = jnp.arange(seq, dtype=jnp.float32)
    freqs = jnp.outer(t, inv_freq)                               # (S, dim/2)
    cos = jnp.concatenate([jnp.cos(freqs), jnp.cos(freqs)], axis=-1)
    sin = jnp.sin(freqs)
    # rotate-half sign folded into the sin table so the kernel only needs roll.
    sin_signed = jnp.concatenate([-sin, sin], axis=-1)           # (S, dim)
    return cos, sin_signed


# ----------------------------- Falcon decoder layer --------------------------
def falcon_layer(h2d, p, cos, sin_signed, B, S, n_heads):
    D = h2d.shape[-1]
    Dh = D // n_heads

    # single input_layernorm feeding both attention and MLP (Falcon parallel block)
    ln = layernorm(h2d, p["ln_g"], p["ln_b"])

    # fused QKV projection: bias + RoPE (Q,K) + 1/sqrt(Dh) (Q) in the epilogue
    qkv = qkv_rope_projection(ln, p["w_qkv"], p["b_qkv"], cos, sin_signed,
                              batch=B, seq=S, n_heads=n_heads, head_dim=Dh)

    # flash attention reads pre-rotated heads out of the QKV slab and writes
    # its output already in (M, D) layout.
    attn = flash_attention_qkv(qkv, batch=B, heads=n_heads, seq=S, head_dim=Dh)
    attn_out = matmul(attn, p["w_o"], p["b_o"])                      # (M, D)

    hid = matmul(ln, p["w_fc1"], p["b_fc1"], activation="gelu")      # (M, 4D)
    # fc2 epilogue fuses bias + Falcon parallel residual: x + attn + mlp
    out = matmul(hid, p["w_fc2"], p["b_fc2"], residuals=(h2d, attn_out))
    return out


# --------------------------------- Full model --------------------------------
def falcon_model(input_ids, params, n_heads):
    B, S = input_ids.shape
    h = jnp.take(params["emb"], input_ids, axis=0)                   # (B, S, D) glue
    D = h.shape[-1]
    Dh = D // n_heads
    cos, sin_signed = rope_tables(S, Dh)
    h2d = h.reshape(B * S, D)
    # TODO(synk): KV cache (fused_utils.prepare_cache / start_pos), multi-query
    #             K/V sharing, AWQ int4 dequant, and BaseModelOutputWithPast
    #             wrapper are not modeled (fresh forward, start_pos = 0).
    for p in params["layers"]:
        h2d = falcon_layer(h2d, p, cos, sin_signed, B, S, n_heads)
    h2d = layernorm(h2d, params["lnf_g"], params["lnf_b"])
    return h2d.reshape(B, S, D)


# -------------------------- deterministic param init -------------------------
def init_params(key, vocab_size, hidden, n_layers, dtype=jnp.bfloat16):
    keys = jax.random.split(key, 1 + n_layers)
    params = {
        "emb": (0.02 * jax.random.normal(keys[0], (vocab_size, hidden),
                                         jnp.float32)).astype(dtype),
        "lnf_g": jnp.ones((hidden,), jnp.float32),
        "lnf_b": jnp.zeros((hidden,), jnp.float32),
        "layers": [],
    }
    for li in range(n_layers):
        k = jax.random.split(keys[1 + li], 4)
        layer = {
            "ln_g": jnp.ones((hidden,), jnp.float32),
            "ln_b": jnp.zeros((hidden,), jnp.float32),
            "w_qkv": (0.02 * jax.random.normal(k[0], (hidden, 3 * hidden),
                                               jnp.float32)).astype(dtype),
            "b_qkv": jnp.zeros((3 * hidden,), dtype),
            "w_o": (0.02 * jax.random.normal(k[1], (hidden, hidden),
                                             jnp.float32)).astype(dtype),
            "b_o": jnp.zeros((hidden,), dtype),
            "w_fc1": (0.02 * jax.random.normal(k[2], (hidden, 4 * hidden),
                                               jnp.float32)).astype(dtype),
            "b_fc1": jnp.zeros((4 * hidden,), dtype),
            "w_fc2": (0.02 * jax.random.normal(k[3], (4 * hidden, hidden),
                                               jnp.float32)).astype(dtype),
            "b_fc2": jnp.zeros((hidden,), dtype),
        }
        params["layers"].append(layer)
    return params


if __name__ == "__main__":
    # small synthetic config (head_dim = 128 -> lane-dense attention blocks,
    # S = 512 with tq = tk = 256 -> 2x2 flash tiles exercising causal DMA skip
    # + online softmax across kv tiles, K = 1024 in fc2 -> full-K single-step
    # accumulation in the tiled matmul)
    B, S = 2, 512
    vocab_size = 128
    hidden = 256
    n_heads = 2
    n_layers = 2

    key = jax.random.PRNGKey(0)
    k_ids, k_params = jax.random.split(key)
    input_ids = jax.random.randint(k_ids, (B, S), 0, vocab_size, dtype=jnp.int32)
    params = init_params(k_params, vocab_size, hidden, n_layers)

    out = falcon_model(input_ids, params, n_heads)
    out = jax.block_until_ready(out)
    assert out.shape == (B, S, hidden)
    assert bool(jnp.all(jnp.isfinite(out.astype(jnp.float32))))
    print("KERNEL_OK")
</pallas_src>

<mosaic_0001>
module attributes {stable_mosaic.version = 11 : i64} {
  func.func @_layernorm_kernel(%arg0: i32, %arg1: memref<512x256xbf16, #tpu.memory_space<vmem>>, %arg2: memref<1x256xf32, #tpu.memory_space<vmem>>, %arg3: memref<1x256xf32, #tpu.memory_space<vmem>>, %arg4: memref<512x256xbf16, #tpu.memory_space<vmem>>) attributes {dimension_semantics = [#tpu.dimension_semantics<parallel>], iteration_bounds = array<i64: 2>, scalar_prefetch = 0 : i64, scratch_operands = 0 : i64, tpu.core_type = #tpu.core_type<tc>, window_params = [{transform_indices = @transform_0, window_bounds = array<i64: 512, 256>}, {pipeline_mode = #tpu.pipeline_mode<synchronous>, transform_indices = @transform_1, window_bounds = array<i64: 1, 256>}, {pipeline_mode = #tpu.pipeline_mode<synchronous>, transform_indices = @transform_2, window_bounds = array<i64: 1, 256>}, {transform_indices = @transform_3, window_bounds = array<i64: 512, 256>}]} {
    %c0 = arith.constant 0 : index
    %c0_0 = arith.constant 0 : index
    %0 = vector.load %arg1[%c0, %c0_0] : memref<512x256xbf16, #tpu.memory_space<vmem>>, vector<512x256xbf16>
    %1 = arith.extf %0 : vector<512x256xbf16> to vector<512x256xf32>
    %cst = arith.constant dense<0.000000e+00> : vector<512xf32>
    %2 = vector.multi_reduction <add>, %1, %cst [1] : vector<512x256xf32> to vector<512xf32>
    %3 = vector.shape_cast %2 : vector<512xf32> to vector<512x1xf32>
    %cst_1 = arith.constant 2.560000e+02 : f32
    %4 = vector.broadcast %cst_1 : f32 to vector<512x1xf32>
    %5 = arith.divf %3, %4 : vector<512x1xf32>
    %6 = vector.broadcast %5 : vector<512x1xf32> to vector<512x256xf32>
    %7 = arith.subf %1, %6 : vector<512x256xf32>
    %8 = arith.mulf %7, %7 : vector<512x256xf32>
    %cst_2 = arith.constant dense<0.000000e+00> : vector<512xf32>
    %9 = vector.multi_reduction <add>, %8, %cst_2 [1] : vector<512x256xf32> to vector<512xf32>
    %10 = vector.shape_cast %9 : vector<512xf32> to vector<512x1xf32>
    %cst_3 = arith.constant 2.560000e+02 : f32
    %11 = vector.broadcast %cst_3 : f32 to vector<512x1xf32>
    %12 = arith.divf %10, %11 : vector<512x1xf32>
    %cst_4 = arith.constant 9.99999974E-6 : f32
    %13 = vector.broadcast %cst_4 : f32 to vector<512x1xf32>
    %14 = arith.addf %12, %13 : vector<512x1xf32>
    %15 = math.rsqrt %14 : vector<512x1xf32>
    %16 = vector.broadcast %15 : vector<512x1xf32> to vector<512x256xf32>
    %17 = arith.mulf %7, %16 : vector<512x256xf32>
    %c0_5 = arith.constant 0 : index
    %c0_6 = arith.constant 0 : index
    %18 = vector.load %arg2[%c0_5, %c0_6] : memref<1x256xf32, #tpu.memory_space<vmem>>, vector<1x256xf32>
    %19 = vector.broadcast %18 : vector<1x256xf32> to vector<512x256xf32>
    %20 = arith.mulf %17, %19 : vector<512x256xf32>
    %c0_7 = arith.constant 0 : index
    %c0_8 = arith.constant 0 : index
    %21 = vector.load %arg3[%c0_7, %c0_8] : memref<1x256xf32, #tpu.memory_space<vmem>>, vector<1x256xf32>
    %22 = vector.broadcast %21 : vector<1x256xf32> to vector<512x256xf32>
    %23 = arith.addf %20, %22 : vector<512x256xf32>
    %24 = arith.truncf %23 : vector<512x256xf32> to vector<512x256xbf16>
    %c0_9 = arith.constant 0 : index
    %c0_10 = arith.constant 0 : index
    %25 = vector.load %arg4[%c0_9, %c0_10] : memref<512x256xbf16, #tpu.memory_space<vmem>>, vector<512x256xbf16>
    tpu.vector_store %arg4[%c0_9, %c0_10], %24 {strides = array<i32>} : memref<512x256xbf16, #tpu.memory_space<vmem>>, vector<512x256xbf16>,
    return
  }
  func.func @transform_0(%arg0: i32) -> (i32, i32) {
    %c0_i32 = arith.constant 0 : i32
    %c0_i32_0 = arith.constant 0 : i32
    return %arg0, %c0_i32 : i32, i32
  }
  func.func @transform_1(%arg0: i32) -> (i32, i32) {
    %c0_i32 = arith.constant 0 : i32
    %c0_i32_0 = arith.constant 0 : i32
    %c0_i32_1 = arith.constant 0 : i32
    return %c0_i32, %c0_i32_0 : i32, i32
  }
  func.func @transform_2(%arg0: i32) -> (i32, i32) {
    %c0_i32 = arith.constant 0 : i32
    %c0_i32_0 = arith.constant 0 : i32
    %c0_i32_1 = arith.constant 0 : i32
    return %c0_i32, %c0_i32_0 : i32, i32
  }
  func.func @transform_3(%arg0: i32) -> (i32, i32) {
    %c0_i32 = arith.constant 0 : i32
    %c0_i32_0 = arith.constant 0 : i32
    return %arg0, %c0_i32 : i32, i32
  }
}

</mosaic_0001>

<bundles_post_ra>
// kernel: tpu_custom_call.1
= control target key start
LH: loop header
LB: loop body
LE: loop exit
PB: predicated region body
PF: predicated region fallthrough
CT: control target
= control target key end

     0   :  { %8 = vsyncpa [#allocation3], 0  ;;  %s4830_s0 = inlined_call_operand.hbm [shape: bf16[1024,256], index: 0, kind: input, shape index: {}]   ;;  %s4831_s1 = inlined_call_operand.hbm [shape: f32[1,256], index: 1, kind: input, shape index: {}]   ;;  %s4832_s2 = inlined_call_operand.vmem [shape: f32[1,256], index: 2, kind: input, shape index: {}]   ;;  %s4833_s3 = inlined_call_operand.hbm [shape: bf16[1024,256], index: 3, kind: output, shape index: {}]  }
   0x1   :  { %10 = vsyncpa [#allocation3 + $0x1], 0 }
   0x2   :  { %11 = vsyncpa [#allocation6], 0 }
   0x3   :  { %12 = vsyncpa [#allocation4], 0 }
   0x4   :  { %14 = vsyncpa [#allocation4 + $0x1], 0  ;;  %s2738_s12 = smov 0   ;;  %s2740_s13 = smov 0  }
   0x5   :  { %s2742_s14 = smov 0   ;;  %s2744_s15 = smov 0  }
   0x6 LB: > { %s2759_s16 = sadd.s32 4294967295, %s2709_s15   ;;  %s2248_s17 = sadd.s32 4294967294, %s2709_s15   ;;  %s2709_s15 = sphi %s2744_s15, %s5450_s15   ;;  %s2705_s14 = sphi %s2742_s14, %s5449_s14   ;;  %s2701_s13 = sphi %s2740_s13, %s5448_s13   ;;  %s2697_s12 = sphi %s2738_s12, %s5447_s12  }
   0x7   : > { %s2763_s18 = sadd.s32 1, %s2709_s15   ;;  %s27_s19 = sadd.s32 1, %s2705_s14 }
   0x8   : > { %s24_s20 = ssub.s32 %s2709_s15, %s2763_s18  ;;  %p34_p0 = scmp.ne.s32.totalorder %s2705_s14, %s2701_s13 }
   0x9   : > { %p25_p1 = scmp.eq.s32.totalorder %s24_s20, 0  ;;  %p35_p2 = scmp.eq.s32.totalorder %s2709_s15, 0 }
   0xa   : > { %p40_p3 = scmp.ne.s32.totalorder %s2701_s13, %s2697_s12  ;;  %p4834_p4 = scmp.eq.s32.totalorder %s2759_s16, 0 }
   0xb   : > { %s2775_s21 = scalar_select %p25_p1, %s2705_s14, %s27_s19  }
   0xc   : > { %p2777_p5 = por %p35_p2, %p34_p0  ;;  %p2783_p6 = por %p4834_p4, %p40_p3 }
   0xd   : > { %p106_p7 = scmp.eq.s32.totalorder %s2759_s16, 1  ;;  %p112_p8 = scmp.eq.s32.totalorder %s2248_s17, 1 }
   0xe   : > { %s5088_s23 = scalar_select %p2783_p6, 1, 0 }
   0xf   : > { %p2249_p9 = scmp.ge.s32.totalorder %s2709_s15, 1  ;;  %p119_p10 = scmp.lt.s32.totalorder %s2709_s15, 3 }
  0x10   : > { %p2790_p11 = por %p106_p7, %p34_p0  ;;  %p2794_p12 = por %p112_p8, %p40_p3 }
  0x11   : > { %p2798_p13 = pnand %p2249_p9, %p119_p10  ;;  %s2711_s27 = smov [#allocation5]  }
  0x12   : > { %s5089_s24 = scalar_select %p2790_p11, 1, 0 }
  0x13   : > { %s5090_s25 = scalar_select %p2794_p12, 1, 0 }
  0x14   : > { %s5091_s26 = scalar_select %p2798_p13, 1, 0 }
  0x15   : > { %p2406_p2 = pneg %p2798_p13  ;;  %s132_s28 = sshll.u32 %s2711_s27, 4  ;;  %s133_s28 = int_to_ptr.vmem [resolvable:$true] %s132_s28 }
  0x16   : > { %p2419_p4 = scmp.lt.s32.totalorder %s2709_s15, 2  ;;  %p5092_p0 = scmp.eq.s32.totalorder %s2759_s16, 0 }
  0x17   : > { %s146_s30 = sand.u32 1, %s2705_s14   ;;  %s2598_s6 = scalar_lea.vmem %s133_s28, 32 }
  0x18   : > { %p2808_p7 = pnand %p2406_p2, %p5092_p0  ;;  %p2815_p3 = pnand %p2419_p4, %p2777_p5 }
  0x19   : > { %s2252_s5 = sshll.u32 %s146_s30, 9  ;;  %p2599_p9 = scmp.ne.s32.totalorder %s133_s28, %s2598_s6 }
  0x1a   : > { %p2589_p8 = pneg %p2808_p7  ;;  %p2606_p12 = scmp.lt.s32.totalorder %s133_s28, %s133_s28 }
  0x1b   : > { %p2607_p11 = scmp.lt.s32.totalorder %s2598_s6, %s2598_s6 }
  0x1c   : > { %p2601_p10 = pnand %p2599_p9, %p2589_p8 }
  0x1d   : > { %p2608_p2 = por %p2607_p11, %p2606_p12 }
  0x1e   : > { %p2602_p1 = pneg %p2601_p10 }
  0x20   : > { %p2609_p0 = pnand %p2608_p2, %p2602_p1 }
  0x22   : > { %2612 = shalt.err (!%p2609_p0)
}
  0x23   : > { %2409 = dma.hbm_to_vmem [thread:$0]  (!%p2808_p7), %s4831_s1, 32, %s133_s28, [#allocation6]  }
  0x24   : > { %s2331_s9 = sshll.u32 %s2709_s15, 13  ;;  %s150_s10 = scalar_lea.vmem [#allocation2], %s2252_s5 }
  0x25   : > { %s158_s11 = sshll.u32 %s150_s10, 4  ;;  %s2830_s20 = scalar_lea.hbm %s4830_s0, %s2331_s9  ;;  %s2832_s11 = int_to_ptr.vmem [resolvable:$true] %s158_s11 }
  0x26   : > { %s2834_s22 = scalar_lea.sflag [#allocation3], %s146_s30  ;;  %s2613_s27 = scalar_lea.hbm %s2830_s20, 8192 }
  0x27   : > { %p2614_p4 = scmp.ne.s32.totalorder %s2830_s20, %s2613_s27  ;;  %p2615_p5 = pneg %p2815_p3 }
  0x28   : > { %s2618_s5 = scalar_lea.hbm %s4830_s0, 16384  ;;  %p2619_p1 = scmp.lt.s32.totalorder %s2830_s20, %s4830_s0 }
  0x29   : > { %p2616_p11 = pnand %p2615_p5, %p2614_p4  ;;  %p2620_p7 = scmp.lt.s32.totalorder %s2618_s5, %s2613_s27 }
  0x2b   : > { %p2617_p12 = pneg %p2616_p11  ;;  %p2621_p8 = por %p2620_p7, %p2619_p1 }
  0x2d   : > { %p2622_p9 = pnand %p2621_p8, %p2617_p12 }
  0x2f   : > { %2625 = shalt.err (!%p2622_p9)
}
  0x30   : > { %s2626_s30 = scalar_lea.vmem %s2832_s11, 8192  ;;  %s2712_s8 = smov [#allocation2]  }
  0x31   : > { %p2627_p10 = scmp.ne.s32.totalorder %s2832_s11, %s2626_s30  ;;  %s2631_s9 = sshll.u32 %s2712_s8, 4  ;;  %s2632_s9 = int_to_ptr.vmem [resolvable:$false] %s2631_s9 }
  0x32   : > { %s2633_s10 = scalar_lea.vmem %s2632_s9, 16384  ;;  %p2634_p4 = scmp.lt.s32.totalorder %s2832_s11, %s2632_s9 }
  0x33   : > { %p2629_p2 = pnand %p2627_p10, %p2615_p5  ;;  %p2635_p11 = scmp.lt.s32.totalorder %s2633_s10, %s2626_s30 }
  0x35   : > { %p2630_p0 = pneg %p2629_p2  ;;  %p2636_p6 = por %p2635_p11, %p2634_p4 }
  0x37   : > { %p2637_p13 = pnand %p2636_p6, %p2630_p0 }
  0x39   : > { %2640 = shalt.err (!%p2637_p13)
}
  0x3a   : > { %s2713_s17 = smov 128   ;;  %s2714_s19 = smov 8  }
  0x3b   : > { %2413 = dma.hbm_to_vmem [thread:$0]  (!%p2815_p3), %s2830_s20, 8192, %s2832_s11, %s2834_s22, %s2713_s17, %s2713_s17, %s2714_s19  }
  0x3c   : > { %p5095_p5 = scmp.ne.s32.totalorder %s5091_s26, 0 }
  0x3e   : > { %170 = sbr.rel (%p5095_p5) target bundleno = 566 (0x236), region = 32 }
  0x43   : > { %s2858_s27 = sand.u32 1, %s2701_s13   ;;  %p5096_p6 = scmp.ne.s32.totalorder %s5088_s23, 0 }
  0x44   : > { %s2257_s28 = sshll.u32 %s2858_s27, 9  ;;  %s173_s29 = scalar_lea.sflag [#allocation3], %s2858_s27 }
  0x45   : > { %s2864_s5 = scalar_lea.vmem [#allocation2], %s2257_s28 }
  0x46   : > { %2684 = dma.done.wait (%p5096_p6), %s173_s29, 8192  }
  0x47   : > { %2686 = vsyncadd (%p5096_p6), %s173_s29, 4294959104  ;;  %p5097_p13 = scmp.eq.s32.totalorder %s2759_s16, 0 }
  0x49   : > { %2688 = dma.done.wait (%p5097_p13), [#allocation6], 32   ;;  %p5098_p3 = pmov %p5097_p13 }
  0x4a   : > { %v2875_v0 = vld [vmem:[%s2864_s5] sm:$0xff]  ;;  %v2878_v1 = vld [vmem:[%s2864_s5 + $0x10] sm:$0xff]  ;;  %v2881_v2 = vld [vmem:[%s2864_s5 + $0x8] sm:$0xff]  ;;  %s4245_s4 = scalar_lea.vmem [#allocation7], %s2257_s28  ;;  %s2397_s11 = sshll.u32 %s2759_s16, 13 }
  0x4b   : > { %2690 = vsyncadd (%p5098_p3), [#allocation6], 4294967264  ;;  %v4933_v3 = vunpack.c.l.bf16 %v2875_v0  ;;  %v4928_v4 = vunpack.c.h.bf16 %v2875_v0  ;;  %v4927_v5 = vunpack.c.l.bf16 %v2878_v1  ;;  %v4922_v6 = vunpack.c.h.bf16 %v2878_v1  ;;  %v2888_v7 = vld [vmem:[%s2864_s5 + $0x18] sm:$0xff]  ;;  %v2891_v8 = vld [vmem:[%s2864_s5 + $0x20] sm:$0xff]  ;;  %s2165_s20 = sshll.u32 %s4245_s4, 4  ;;  %s4783_s7 = scalar_lea.hbm %s4833_s3, %s2397_s11  ;;  %s4785_s20 = int_to_ptr.vmem [resolvable:$true] %s2165_s20 }
  0x4c   : > { %v4921_v9 = vunpack.c.l.bf16 %v2881_v2  ;;  %v4916_v10 = vunpack.c.h.bf16 %v2881_v2  ;;  %v4915_v11 = vunpack.c.l.bf16 %v2888_v7  ;;  %v4910_v12 = vunpack.c.h.bf16 %v2888_v7  ;;  %v2898_v13 = vld [vmem:[%s2864_s5 + $0x28] sm:$0xff]  ;;  %v2921_v22 = vld [vmem:[%s2864_s5 + $0x30] sm:$0xff]  ;;  %v2924_v23 = vld [vmem:[%s2864_s5 + $0x38] sm:$0xff]  ;;  %s2151_s16 = scalar_lea.sflag [#allocation4], %s2858_s27  ;;  %s2641_s30 = scalar_lea.vmem %s4785_s20, 8192 }
  0x4d   : > { %v397_v14 = vadd.f32 %v4928_v4, %v4933_v3  ;;  %v403_v15 = vadd.f32 %v4922_v6, %v4927_v5  ;;  %v4909_v16 = vunpack.c.l.bf16 %v2891_v8  ;;  %v4904_v17 = vunpack.c.h.bf16 %v2891_v8  ;;  %v2939_v30 = vld [vmem:[%s2864_s5 + $0x40] sm:$0xff]  ;;  %v2942_v31 = vld [vmem:[%s2864_s5 + $0x48] sm:$0xff]  ;;  %v2957_v38 = vld [vmem:[%s2864_s5 + $0x50] sm:$0xff]  ;;  %p2642_p12 = scmp.ne.s32.totalorder %s4785_s20, %s2641_s30  ;;  %p5444_p1 = scmp.ne.s32.totalorder %s5089_s24, 0 }
  0x4e   : > { %v400_v18 = vadd.f32 %v4916_v10, %v4921_v9  ;;  %v406_v19 = vadd.f32 %v4910_v12, %v4915_v11  ;;  %v4903_v20 = vunpack.c.l.bf16 %v2898_v13  ;;  %v4898_v21 = vunpack.c.h.bf16 %v2898_v13  ;;  %v2960_v39 = vld [vmem:[%s2864_s5 + $0x58] sm:$0xff]  ;;  %v2975_v46 = vld [vmem:[%s2864_s5 + $0x60] sm:$0xff]  ;;  %v2978_v47 = vld [vmem:[%s2864_s5 + $0x68] sm:$0xff]  ;;  %s2715_s8 = smov [#allocation7]  }
  0x4f   : > { %398 = vadd.xlane.f32.xlu0 %v397_v14  ;;  %404 = vadd.xlane.f32.xlu1 %v403_v15  ;;  %v409_v24 = vadd.f32 %v4904_v17, %v4909_v16  ;;  %v4897_v25 = vunpack.c.l.bf16 %v2921_v22  ;;  %v4892_v27 = vunpack.c.h.bf16 %v2921_v22  ;;  %v4891_v28 = vunpack.c.l.bf16 %v2924_v23  ;;  %v2993_v54 = vld [vmem:[%s2864_s5 + $0x70] sm:$0xff]  ;;  %v2996_v55 = vld [vmem:[%s2864_s5 + $0x78] sm:$0xff]  ;;  %v3011_v62 = vld [vmem:[%s2864_s5 + $0x80] sm:$0xff]  ;;  %p2643_p7 = pnand %p2642_p12, %p5444_p1  ;;  %s2645_s9 = sshll.u32 %s2715_s8, 4  ;;  %s2646_s9 = int_to_ptr.vmem [resolvable:$false] %s2645_s9 }
  0x50   : > { %v412_v26 = vadd.f32 %v4898_v21, %v4903_v20  ;;  %v4886_v29 = vunpack.c.h.bf16 %v2924_v23  ;;  %v4885_v32 = vunpack.c.l.bf16 %v2939_v30  ;;  %v4880_v33 = vunpack.c.h.bf16 %v2939_v30  ;;  %v3014_v63 = vld [vmem:[%s2864_s5 + $0x88] sm:$0xff]  ;;  %v3227_v21 = vld [vmem:[%s2864_s5 + $0x140] sm:$0xff]  ;;  %v3245_v17 = vld [vmem:[%s2864_s5 + $0x150] sm:$0xff]  ;;  %s2647_s10 = scalar_lea.vmem %s2646_s9, 16384  ;;  %p2648_p9 = scmp.lt.s32.totalorder %s4785_s20, %s2646_s9 }
  0x51   : > { %v415_v34 = vadd.f32 %v4892_v27, %v4897_v25  ;;  %v4879_v36 = vunpack.c.l.bf16 %v2942_v31  ;;  %v4874_v37 = vunpack.c.h.bf16 %v2942_v31  ;;  %v4873_v41 = vunpack.c.l.bf16 %v2957_v38  ;;  %v3209_v27 = vld [vmem:[%s2864_s5 + $0x130] sm:$0xff]  ;;  %v3263_v12 = vld [vmem:[%s2864_s5 + $0x160] sm:$0xff]  ;;  %p2644_p8 = pneg %p2643_p7  ;;  %p2649_p10 = scmp.lt.s32.totalorder %s2647_s10, %s2641_s30 }
  0x52   : > { %v418_v35 = vadd.f32 %v4886_v29, %v4891_v28  ;;  %v421_v40 = vadd.f32 %v4880_v33, %v4885_v32  ;;  %v4868_v43 = vunpack.c.h.bf16 %v2957_v38  ;;  %v4867_v44 = vunpack.c.l.bf16 %v2960_v39  ;;  %v3173_v33 = vld [vmem:[%s2864_s5 + $0x110] sm:$0xff]  ;;  %v3191_v29 = vld [vmem:[%s2864_s5 + $0x120] sm:$0xff] }
  0x53   : > { %401 = vadd.xlane.f32.xlu0 %v400_v18  ;;  %407 = vadd.xlane.f32.xlu1 %v406_v19  ;;  %v424_v42 = vadd.f32 %v4874_v37, %v4879_v36  ;;  %v4862_v45 = vunpack.c.h.bf16 %v2960_v39  ;;  %v4861_v48 = vunpack.c.l.bf16 %v2975_v46  ;;  %v4856_v49 = vunpack.c.h.bf16 %v2975_v46  ;;  %v3155_v37 = vld [vmem:[%s2864_s5 + $0x100] sm:$0xff]  ;;  %v3281_v10 = vld [vmem:[%s2864_s5 + $0x170] sm:$0xff]  ;;  %p2650_p2 = por %p2649_p10, %p2648_p9 }
  0x54   : > { %v427_v50 = vadd.f32 %v4868_v43, %v4873_v41  ;;  %v4855_v52 = vunpack.c.l.bf16 %v2978_v47  ;;  %v4850_v53 = vunpack.c.h.bf16 %v2978_v47  ;;  %v4849_v57 = vunpack.c.l.bf16 %v2993_v54  ;;  %v3137_v43 = vld [vmem:[%s2864_s5 + $0xf0] sm:$0xff]  ;;  %v3299_v6 = vld [vmem:[%s2864_s5 + $0x180] sm:$0xff] }
  0x55   : > { %v430_v51 = vadd.f32 %v4862_v45, %v4867_v44  ;;  %v433_v56 = vadd.f32 %v4856_v49, %v4861_v48  ;;  %v4844_v59 = vunpack.c.h.bf16 %v2993_v54  ;;  %v4843_v60 = vunpack.c.l.bf16 %v2996_v55  ;;  %v3101_v49 = vld [vmem:[%s2864_s5 + $0xd0] sm:$0xff]  ;;  %v3119_v45 = vld [vmem:[%s2864_s5 + $0xe0] sm:$0xff]  ;;  %5100 = vst [vmem:[#allocation12_spill] sm:$0xff] %v3299_v6  ;;  %p2651_p0 = pnand %p2650_p2, %p2644_p8 }
  0x56   : > { %v436_v58 = vadd.f32 %v4850_v53, %v4855_v52  ;;  %v4838_v61 = vunpack.c.h.bf16 %v2996_v55  ;;  %v4842_v14 = vunpack.c.l.bf16 %v3011_v62  ;;  %v4839_v15 = vunpack.c.h.bf16 %v3011_v62  ;;  %v3083_v53 = vld [vmem:[%s2864_s5 + $0xc0] sm:$0xff]  ;;  %v3317_v4 = vld [vmem:[%s2864_s5 + $0x190] sm:$0xff] }
  0x57   : > { %410 = vadd.xlane.f32.xlu0 %v409_v24  ;;  %413 = vadd.xlane.f32.xlu1 %v412_v26  ;;  %v439_v18 = vadd.f32 %v4844_v59, %v4849_v57  ;;  %v4841_v24 = vunpack.c.l.bf16 %v3014_v63  ;;  %v4840_v26 = vunpack.c.h.bf16 %v3014_v63  ;;  %v3065_v59 = vld [vmem:[%s2864_s5 + $0xb0] sm:$0xff]  ;;  %5102 = vst [vmem:[#allocation14_spill] sm:$0xff] %v3317_v4 }
  0x58   : > { %v442_v19 = vadd.f32 %v4838_v61, %v4843_v60  ;;  %v3047_v61 = vld [vmem:[%s2864_s5 + $0xa0] sm:$0xff] }
  0x5b   : > { %416 = vadd.xlane.f32.xlu0 %v415_v34  ;;  %419 = vadd.xlane.f32.xlu1 %v418_v35  ;;  %v3029_v34 = vld [vmem:[%s2864_s5 + $0x90] sm:$0xff]  ;;  %v3032_v35 = vld [vmem:[%s2864_s5 + $0x98] sm:$0xff] }
  0x5f   : > { %422 = vadd.xlane.f32.xlu0 %v421_v40  ;;  %425 = vadd.xlane.f32.xlu1 %v424_v42  ;;  %v445_v40 = vadd.f32 %v4839_v15, %v4842_v14  ;;  %v4848_v42 = vunpack.c.l.bf16 %v3029_v34  ;;  %v3050_v15 = vld [vmem:[%s2864_s5 + $0xa8] sm:$0xff] }
  0x60   : > { %v4853_v14 = vunpack.c.l.bf16 %v3050_v15  ;;  %v4852_v60 = vunpack.c.h.bf16 %v3050_v15 }
  0x63   : > { %428 = vadd.xlane.f32.xlu0 %v427_v50  ;;  %431 = vadd.xlane.f32.xlu1 %v430_v51  ;;  %v448_v50 = vadd.f32 %v4840_v26, %v4841_v24  ;;  %v4845_v51 = vunpack.c.h.bf16 %v3029_v34 }
  0x65   : > { %v451_v26 = vadd.f32 %v4845_v51, %v4848_v42  ;;  %v4860_v51 = vunpack.c.l.bf16 %v3065_v59 }
  0x67   : > { %434 = vadd.xlane.f32.xlu0 %v433_v56  ;;  %437 = vadd.xlane.f32.xlu1 %v436_v58  ;;  %v4847_v56 = vunpack.c.l.bf16 %v3032_v35  ;;  %v4846_v58 = vunpack.c.h.bf16 %v3032_v35 }
  0x69   : > { %v454_v24 = vadd.f32 %v4846_v58, %v4847_v56  ;;  %v460_v58 = vadd.f32 %v4852_v60, %v4853_v14  ;;  %v4857_v56 = vunpack.c.h.bf16 %v3065_v59 }
  0x6b   : > { %440 = vadd.xlane.f32.xlu0 %v439_v18  ;;  %443 = vadd.xlane.f32.xlu1 %v442_v19  ;;  %v4854_v18 = vunpack.c.l.bf16 %v3047_v61  ;;  %v4851_v19 = vunpack.c.h.bf16 %v3047_v61  ;;  %v463_v60 = vadd.f32 %v4857_v56, %v4860_v51  ;;  %v4872_v56 = vunpack.c.l.bf16 %v3101_v49 }
  0x6f   : > { %446 = vadd.xlane.f32.xlu0 %v445_v40  ;;  %449 = vadd.xlane.f32.xlu1 %v448_v50  ;;  %v3068_v40 = vld [vmem:[%s2864_s5 + $0xb8] sm:$0xff]  ;;  %v457_v50 = vadd.f32 %v4851_v19, %v4854_v18  ;;  %v3086_v19 = vld [vmem:[%s2864_s5 + $0xc8] sm:$0xff] }
  0x70   : > { %v4859_v42 = vunpack.c.l.bf16 %v3068_v40  ;;  %v4858_v57 = vunpack.c.h.bf16 %v3068_v40  ;;  %v4865_v18 = vunpack.c.l.bf16 %v3086_v19  ;;  %v4864_v52 = vunpack.c.h.bf16 %v3086_v19 }
  0x72   : > { %v466_v14 = vadd.f32 %v4858_v57, %v4859_v42  ;;  %v472_v57 = vadd.f32 %v4864_v52, %v4865_v18  ;;  %v4869_v42 = vunpack.c.h.bf16 %v3101_v49 }
  0x73   : > { %452 = vadd.xlane.f32.xlu0 %v451_v26  ;;  %455 = vadd.xlane.f32.xlu1 %v454_v24  ;;  %v4866_v26 = vunpack.c.l.bf16 %v3083_v53  ;;  %v4863_v24 = vunpack.c.h.bf16 %v3083_v53 }
  0x74   : > { %v475_v52 = vadd.f32 %v4869_v42, %v4872_v56  ;;  %v4884_v42 = vunpack.c.l.bf16 %v3137_v43 }
  0x77   : > { %458 = vadd.xlane.f32.xlu0 %v457_v50  ;;  %461 = vadd.xlane.f32.xlu1 %v460_v58  ;;  %v3104_v50 = vld [vmem:[%s2864_s5 + $0xd8] sm:$0xff]  ;;  %v469_v58 = vadd.f32 %v4863_v24, %v4866_v26  ;;  %v3122_v24 = vld [vmem:[%s2864_s5 + $0xe8] sm:$0xff] }
  0x78   : > { %v4871_v51 = vunpack.c.l.bf16 %v3104_v50  ;;  %v4870_v48 = vunpack.c.h.bf16 %v3104_v50  ;;  %v4877_v26 = vunpack.c.l.bf16 %v3122_v24  ;;  %v4876_v44 = vunpack.c.h.bf16 %v3122_v24 }
  0x7a   : > { %v478_v18 = vadd.f32 %v4870_v48, %v4871_v51  ;;  %v484_v48 = vadd.f32 %v4876_v44, %v4877_v26  ;;  %v4881_v51 = vunpack.c.h.bf16 %v3137_v43 }
  0x7b   : > { %464 = vadd.xlane.f32.xlu0 %v463_v60  ;;  %467 = vadd.xlane.f32.xlu1 %v466_v14  ;;  %v4878_v60 = vunpack.c.l.bf16 %v3119_v45  ;;  %v4875_v14 = vunpack.c.h.bf16 %v3119_v45 }
  0x7c   : > { %v487_v44 = vadd.f32 %v4881_v51, %v4884_v42  ;;  %v4896_v51 = vunpack.c.l.bf16 %v3173_v33 }
  0x7f   : > { %470 = vadd.xlane.f32.xlu0 %v469_v58  ;;  %473 = vadd.xlane.f32.xlu1 %v472_v57  ;;  %v3140_v58 = vld [vmem:[%s2864_s5 + $0xf8] sm:$0xff]  ;;  %v481_v57 = vadd.f32 %v4875_v14, %v4878_v60  ;;  %v3158_v14 = vld [vmem:[%s2864_s5 + $0x108] sm:$0xff] }
  0x80   : > { %v4883_v56 = vunpack.c.l.bf16 %v3140_v58  ;;  %v4882_v41 = vunpack.c.h.bf16 %v3140_v58  ;;  %v4889_v60 = vunpack.c.l.bf16 %v3158_v14  ;;  %v4888_v36 = vunpack.c.h.bf16 %v3158_v14 }
  0x82   : > { %v490_v26 = vadd.f32 %v4882_v41, %v4883_v56  ;;  %v496_v41 = vadd.f32 %v4888_v36, %v4889_v60  ;;  %v4893_v56 = vunpack.c.h.bf16 %v3173_v33 }
  0x83   : > { %476 = vadd.xlane.f32.xlu0 %v475_v52  ;;  %479 = vadd.xlane.f32.xlu1 %v478_v18  ;;  %v4890_v52 = vunpack.c.l.bf16 %v3155_v37  ;;  %v4887_v18 = vunpack.c.h.bf16 %v3155_v37 }
  0x84   : > { %v499_v36 = vadd.f32 %v4893_v56, %v4896_v51  ;;  %v4908_v56 = vunpack.c.l.bf16 %v3209_v27 }
  0x87   : > { %482 = vadd.xlane.f32.xlu0 %v481_v57  ;;  %485 = vadd.xlane.f32.xlu1 %v484_v48  ;;  %v3176_v57 = vld [vmem:[%s2864_s5 + $0x118] sm:$0xff]  ;;  %v493_v48 = vadd.f32 %v4887_v18, %v4890_v52  ;;  %v3194_v18 = vld [vmem:[%s2864_s5 + $0x128] sm:$0xff] }
  0x88   : > { %v4895_v42 = vunpack.c.l.bf16 %v3176_v57  ;;  %v4894_v32 = vunpack.c.h.bf16 %v3176_v57  ;;  %v4901_v52 = vunpack.c.l.bf16 %v3194_v18  ;;  %v4900_v28 = vunpack.c.h.bf16 %v3194_v18 }
  0x8a   : > { %v502_v60 = vadd.f32 %v4894_v32, %v4895_v42  ;;  %v508_v32 = vadd.f32 %v4900_v28, %v4901_v52  ;;  %v4905_v42 = vunpack.c.h.bf16 %v3209_v27 }
  0x8b   : > { %488 = vadd.xlane.f32.xlu0 %v487_v44  ;;  %491 = vadd.xlane.f32.xlu1 %v490_v26  ;;  %v4902_v44 = vunpack.c.l.bf16 %v3191_v29  ;;  %v4899_v26 = vunpack.c.h.bf16 %v3191_v29 }
  0x8c   : > { %v511_v28 = vadd.f32 %v4905_v42, %v4908_v56  ;;  %v4920_v42 = vunpack.c.l.bf16 %v3245_v17 }
  0x8f   : > { %494 = vadd.xlane.f32.xlu0 %v493_v48  ;;  %497 = vadd.xlane.f32.xlu1 %v496_v41  ;;  %v3212_v48 = vld [vmem:[%s2864_s5 + $0x138] sm:$0xff]  ;;  %v505_v41 = vadd.f32 %v4899_v26, %v4902_v44  ;;  %v3230_v26 = vld [vmem:[%s2864_s5 + $0x148] sm:$0xff] }
  0x90   : > { %v4907_v51 = vunpack.c.l.bf16 %v3212_v48  ;;  %v4906_v25 = vunpack.c.h.bf16 %v3212_v48  ;;  %v4913_v44 = vunpack.c.l.bf16 %v3230_v26  ;;  %v4912_v20 = vunpack.c.h.bf16 %v3230_v26 }
  0x92   : > { %v514_v52 = vadd.f32 %v4906_v25, %v4907_v51  ;;  %v520_v25 = vadd.f32 %v4912_v20, %v4913_v44  ;;  %v4917_v51 = vunpack.c.h.bf16 %v3245_v17 }
  0x93   : > { %500 = vadd.xlane.f32.xlu0 %v499_v36  ;;  %503 = vadd.xlane.f32.xlu1 %v502_v60  ;;  %v4914_v36 = vunpack.c.l.bf16 %v3227_v21  ;;  %v4911_v60 = vunpack.c.h.bf16 %v3227_v21 }
  0x94   : > { %v523_v20 = vadd.f32 %v4917_v51, %v4920_v42  ;;  %v4932_v51 = vunpack.c.l.bf16 %v3281_v10 }
  0x97   : > { %506 = vadd.xlane.f32.xlu0 %v505_v41  ;;  %509 = vadd.xlane.f32.xlu1 %v508_v32  ;;  %v3248_v41 = vld [vmem:[%s2864_s5 + $0x158] sm:$0xff]  ;;  %v517_v32 = vadd.f32 %v4911_v60, %v4914_v36  ;;  %v3266_v60 = vld [vmem:[%s2864_s5 + $0x168] sm:$0xff] }
  0x98   : > { %v4919_v56 = vunpack.c.l.bf16 %v3248_v41  ;;  %v4918_v16 = vunpack.c.h.bf16 %v3248_v41  ;;  %v4925_v36 = vunpack.c.l.bf16 %v3266_v60  ;;  %v4924_v11 = vunpack.c.h.bf16 %v3266_v60 }
  0x9a   : > { %v526_v44 = vadd.f32 %v4918_v16, %v4919_v56  ;;  %v532_v16 = vadd.f32 %v4924_v11, %v4925_v36  ;;  %v4929_v56 = vunpack.c.h.bf16 %v3281_v10 }
  0x9b   : > { %512 = vadd.xlane.f32.xlu0 %v511_v28  ;;  %515 = vadd.xlane.f32.xlu1 %v514_v52  ;;  %v4926_v28 = vunpack.c.l.bf16 %v3263_v12  ;;  %v4923_v52 = vunpack.c.h.bf16 %v3263_v12 }
  0x9c   : > { %v535_v11 = vadd.f32 %v4929_v56, %v4932_v51  ;;  %v4947_v56 = vunpack.c.l.bf16 %v3317_v4 }
  0x9f   : > { %518 = vadd.xlane.f32.xlu0 %v517_v32  ;;  %521 = vadd.xlane.f32.xlu1 %v520_v25  ;;  %v3284_v32 = vld [vmem:[%s2864_s5 + $0x178] sm:$0xff]  ;;  %v529_v25 = vadd.f32 %v4923_v52, %v4926_v28  ;;  %v3302_v52 = vld [vmem:[%s2864_s5 + $0x188] sm:$0xff] }
  0xa0   : > { %5099 = vst [vmem:[#allocation11_spill] sm:$0xff] %v3284_v32  ;;  %v4931_v42 = vunpack.c.l.bf16 %v3284_v32  ;;  %v4930_v9 = vunpack.c.h.bf16 %v3284_v32  ;;  %5101 = vst [vmem:[#allocation13_spill] sm:$0xff] %v3302_v52  ;;  %v4938_v28 = vunpack.c.l.bf16 %v3302_v52  ;;  %v4937_v5 = vunpack.c.h.bf16 %v3302_v52  ;;  %v3335_v32 = vld [vmem:[%s2864_s5 + $0x1a0] sm:$0xff]  ;;  %v3353_v52 = vld [vmem:[%s2864_s5 + $0x1b0] sm:$0xff] }
  0xa1   : > { %5104 = vst [vmem:[#allocation16_spill] sm:$0xff] %v3335_v32  ;;  %5106 = vst [vmem:[#allocation18_spill] sm:$0xff] %v3353_v52 }
  0xa2   : > { %v538_v36 = vadd.f32 %v4930_v9, %v4931_v42  ;;  %v544_v9 = vadd.f32 %v4937_v5, %v4938_v28  ;;  %v4944_v42 = vunpack.c.h.bf16 %v3317_v4 }
  0xa3   : > { %524 = vadd.xlane.f32.xlu0 %v523_v20  ;;  %527 = vadd.xlane.f32.xlu1 %v526_v44  ;;  %v4939_v20 = vunpack.c.l.bf16 %v3299_v6  ;;  %v4936_v44 = vunpack.c.h.bf16 %v3299_v6  ;;  %v3371_v6 = vld [vmem:[%s2864_s5 + $0x1c0] sm:$0xff] }
  0xa4   : > { %v547_v5 = vadd.f32 %v4944_v42, %v4947_v56  ;;  %v4962_v42 = vunpack.c.l.bf16 %v3353_v52  ;;  %5109 = vst [vmem:[#allocation20_spill] sm:$0xff] %v3371_v6 }
  0xa7   : > { %530 = vadd.xlane.f32.xlu0 %v529_v25  ;;  %533 = vadd.xlane.f32.xlu1 %v532_v16  ;;  %v3320_v25 = vld [vmem:[%s2864_s5 + $0x198] sm:$0xff]  ;;  %v541_v16 = vadd.f32 %v4936_v44, %v4939_v20  ;;  %v3338_v44 = vld [vmem:[%s2864_s5 + $0x1a8] sm:$0xff] }
  0xa8   : > { %5103 = vst [vmem:[#allocation15_spill] sm:$0xff] %v3320_v25  ;;  %v4946_v51 = vunpack.c.l.bf16 %v3320_v25  ;;  %v4945_v3 = vunpack.c.h.bf16 %v3320_v25  ;;  %5105 = vst [vmem:[#allocation17_spill] sm:$0xff] %v3338_v44  ;;  %v4953_v20 = vunpack.c.l.bf16 %v3338_v44 }
  0xaa   : > { %v550_v28 = vadd.f32 %v4945_v3, %v4946_v51  ;;  %v4959_v51 = vunpack.c.h.bf16 %v3353_v52 }
  0xab   : > { %536 = vadd.xlane.f32.xlu0 %v535_v11  ;;  %539 = vadd.xlane.f32.xlu1 %v538_v36  ;;  %v4954_v36 = vunpack.c.h.bf16 %v3335_v32  ;;  %v4952_v11 = vunpack.c.h.bf16 %v3338_v44  ;;  %v3389_v44 = vld [vmem:[%s2864_s5 + $0x1d0] sm:$0xff] }
  0xac   : > { %5111 = vst [vmem:[#allocation22_spill] sm:$0xff] %v3389_v44 }
  0xad   : > { %v556_v3 = vadd.f32 %v4952_v11, %v4953_v20  ;;  %v559_v11 = vadd.f32 %v4959_v51, %v4962_v42  ;;  %v4977_v51 = vunpack.c.l.bf16 %v3389_v44 }
  0xaf   : > { %542 = vadd.xlane.f32.xlu0 %v541_v16  ;;  %545 = vadd.xlane.f32.xlu1 %v544_v9  ;;  %v3356_v16 = vld [vmem:[%s2864_s5 + $0x1b8] sm:$0xff]  ;;  %v5108_v9 = vunpack.c.l.bf16 %v3335_v32  ;;  %v3407_v32 = vld [vmem:[%s2864_s5 + $0x1e0] sm:$0xff] }
  0xb0   : > { %5107 = vst [vmem:[#allocation19_spill] sm:$0xff] %v3356_v16  ;;  %v4961_v56 = vunpack.c.l.bf16 %v3356_v16  ;;  %v4960_v25 = vunpack.c.h.bf16 %v3356_v16  ;;  %5114 = vst [vmem:[#allocation24_spill] sm:$0xff] %v3407_v32 }
  0xb1   : > { %v553_v4 = vadd.f32 %v4954_v36, %v5108_v9  ;;  %v3374_v9 = vld [vmem:[%s2864_s5 + $0x1c8] sm:$0xff] }
  0xb2   : > { %5110 = vst [vmem:[#allocation21_spill] sm:$0xff] %v3374_v9  ;;  %v562_v20 = vadd.f32 %v4960_v25, %v4961_v56  ;;  %v4968_v36 = vunpack.c.l.bf16 %v3374_v9  ;;  %v4974_v56 = vunpack.c.h.bf16 %v3389_v44 }
  0xb3   : > { %548 = vadd.xlane.f32.xlu0 %v547_v5  ;;  %551 = vadd.xlane.f32.xlu1 %v550_v28  ;;  %v4969_v28 = vunpack.c.h.bf16 %v3371_v6  ;;  %v4967_v5 = vunpack.c.h.bf16 %v3374_v9 }
  0xb5   : > { %v568_v25 = vadd.f32 %v4967_v5, %v4968_v36  ;;  %v571_v5 = vadd.f32 %v4974_v56, %v4977_v51 }
  0xb7   : > { %554 = vadd.xlane.f32.xlu0 %v553_v4  ;;  %557 = vadd.xlane.f32.xlu1 %v556_v3  ;;  %v3392_v4 = vld [vmem:[%s2864_s5 + $0x1d8] sm:$0xff]  ;;  %v5113_v3 = vunpack.c.l.bf16 %v3371_v6  ;;  %v3425_v6 = vld [vmem:[%s2864_s5 + $0x1f0] sm:$0xff] }
  0xb8   : > { %5112 = vst [vmem:[#allocation23_spill] sm:$0xff] %v3392_v4  ;;  %v4976_v42 = vunpack.c.l.bf16 %v3392_v4  ;;  %v4975_v16 = vunpack.c.h.bf16 %v3392_v4  ;;  %5116 = vst [vmem:[#allocation26_spill] sm:$0xff] %v3425_v6  ;;  %v4988_v56 = vunpack.c.l.bf16 %v3425_v6 }
  0xb9   : > { %v565_v52 = vadd.f32 %v4969_v28, %v5113_v3  ;;  %v3410_v3 = vld [vmem:[%s2864_s5 + $0x1e8] sm:$0xff] }
  0xba   : > { %5115 = vst [vmem:[#allocation25_spill] sm:$0xff] %v3410_v3  ;;  %v574_v36 = vadd.f32 %v4975_v16, %v4976_v42  ;;  %v4981_v28 = vunpack.c.l.bf16 %v3410_v3  ;;  %v4980_v9 = vunpack.c.h.bf16 %v3410_v3  ;;  %v4987_v42 = vunpack.c.h.bf16 %v3425_v6 }
  0xbb   : > { %560 = vadd.xlane.f32.xlu0 %v559_v11  ;;  %563 = vadd.xlane.f32.xlu1 %v562_v20  ;;  %v4982_v20 = vunpack.c.h.bf16 %v3407_v32  ;;  %v3428_v11 = vld [vmem:[%s2864_s5 + $0x1f8] sm:$0xff]  ;;  %v5119_v3 = vunpack.c.l.bf16 %v2875_v0 }
  0xbc   : > { %5117 = vst [vmem:[#allocation27_spill] sm:$0xff] %v3428_v11  ;;  %v580_v16 = vadd.f32 %v4980_v9, %v4981_v28  ;;  %v4990_v51 = vunpack.c.l.bf16 %v3428_v11  ;;  %v4989_v4 = vunpack.c.h.bf16 %v3428_v11 }
  0xbf   : > { %566 = vadd.xlane.f32.xlu0 %v565_v52  ;;  %569 = vadd.xlane.f32.xlu1 %v568_v25  ;;  %v5118_v52 = vunpack.c.l.bf16 %v3407_v32 }
  0xc1   : > { %v577_v25 = vadd.f32 %v4982_v20, %v5118_v52  ;;  %v583_v52 = vadd.f32 %v4987_v42, %v4988_v56  ;;  %v5123_v42 = vunpack.c.l.bf16 %v2878_v1 }
  0xc3   : > { %572 = vadd.xlane.f32.xlu0 %v571_v5  ;;  %575 = vadd.xlane.f32.xlu1 %v574_v36  ;;  %v586_v36 = vadd.f32 %v4989_v4, %v4990_v51  ;;  %v5125_v4 = vunpack.c.h.bf16 %v2878_v1  ;;  %v5127_v1 = vunpack.c.l.bf16 %v2881_v2 }
  0xc7   : > { %578 = vadd.xlane.f32.xlu0 %v577_v25  ;;  %581 = vadd.xlane.f32.xlu1 %v580_v16  ;;  %v5121_v16 = vunpack.c.h.bf16 %v2875_v0 }
  0xcb   : > { %584 = vadd.xlane.f32.xlu0 %v583_v52  ;;  %587 = vadd.xlane.f32.xlu1 %v586_v36 }
  0xd8   : > { %v399_v5 = vpop.xlane.xlu0 %398  ;;  %v405_v9 = vpop.xlane.xlu1 %404 }
  0xd9   : > { %v590_v28 = vmul.f32 0.00390625, %v399_v5  ;;  %v592_v20 = vmul.f32 0.00390625, %v405_v9 }
  0xdb   : > { %v3452_v25 = vsub.f32 %v5119_v3, %v590_v28  ;;  %v3456_v32 = vsub.f32 %v5121_v16, %v590_v28  ;;  %v3460_v56 = vsub.f32 %v5123_v42, %v592_v20  ;;  %v3464_v52 = vsub.f32 %v5125_v4, %v592_v20 }
  0xdc   : > { %v402_v36 = vpop.xlane.xlu0 %401  ;;  %v408_v51 = vpop.xlane.xlu1 %407  ;;  %v5128_v20 = vunpack.c.h.bf16 %v2881_v2 }
  0xdd   : > { %5120 = vst [vmem:[#allocation28_spill] sm:$0xff] %v3452_v25  ;;  %5122 = vst [vmem:[#allocation29_spill] sm:$0xff] %v3456_v32  ;;  %v591_v5 = vmul.f32 0.00390625, %v402_v36  ;;  %v593_v9 = vmul.f32 0.00390625, %v408_v51  ;;  %v782_v3 = vmul.f32 %v3452_v25, %v3452_v25  ;;  %v783_v0 = vmul.f32 %v3456_v32, %v3456_v32 }
  0xde   : > { %5124 = vst [vmem:[#allocation30_spill] sm:$0xff] %v3460_v56  ;;  %5126 = vst [vmem:[#allocation31_spill] sm:$0xff] %v3464_v52  ;;  %v786_v28 = vmul.f32 %v3460_v56, %v3460_v56  ;;  %v787_v42 = vmul.f32 %v3464_v52, %v3464_v52  ;;  %v5130_v51 = vunpack.c.l.bf16 %v2888_v7  ;;  %v5132_v32 = vunpack.c.h.bf16 %v2888_v7 }
  0xdf   : > { %v3476_v4 = vsub.f32 %v5127_v1, %v591_v5  ;;  %v3480_v16 = vsub.f32 %v5128_v20, %v591_v5  ;;  %v910_v11 = vadd.f32 %v783_v0, %v782_v3  ;;  %v5136_v3 = vunpack.c.l.bf16 %v2898_v13 }
  0xe0   : > { %v3484_v36 = vsub.f32 %v5130_v51, %v593_v9  ;;  %v3488_v25 = vsub.f32 %v5132_v32, %v593_v9  ;;  %v411_v56 = vpop.xlane.xlu0 %410  ;;  %v414_v6 = vpop.xlane.xlu1 %413  ;;  %v916_v5 = vadd.f32 %v787_v42, %v786_v28  ;;  %v5134_v32 = vunpack.c.l.bf16 %v2891_v8 }
  0xe1   : > { %5129 = vst [vmem:[#allocation32_spill] sm:$0xff] %v3480_v16  ;;  %v594_v52 = vmul.f32 0.00390625, %v411_v56  ;;  %v595_v44 = vmul.f32 0.00390625, %v414_v6  ;;  %v784_v1 = vmul.f32 %v3476_v4, %v3476_v4  ;;  %v785_v2 = vmul.f32 %v3480_v16, %v3480_v16  ;;  %911 = vadd.xlane.f32.xlu0 %v910_v11 }
  0xe2   : > { %5131 = vst [vmem:[#allocation33_spill] sm:$0xff] %v3484_v36  ;;  %5133 = vst [vmem:[#allocation34_spill] sm:$0xff] %v3488_v25  ;;  %v788_v20 = vmul.f32 %v3484_v36, %v3484_v36  ;;  %v789_v7 = vmul.f32 %v3488_v25, %v3488_v25  ;;  %v5135_v6 = vunpack.c.h.bf16 %v2891_v8  ;;  %v5138_v11 = vunpack.c.h.bf16 %v2898_v13 }
  0xe3   : > { %v3500_v9 = vsub.f32 %v5134_v32, %v594_v52  ;;  %v3508_v0 = vsub.f32 %v5136_v3, %v595_v44  ;;  %v913_v51 = vadd.f32 %v785_v2, %v784_v1  ;;  %v5142_v3 = vunpack.c.l.bf16 %v2924_v23 }
  0xe4   : > { %v3504_v56 = vsub.f32 %v5135_v6, %v594_v52  ;;  %v3512_v28 = vsub.f32 %v5138_v11, %v595_v44  ;;  %v417_v42 = vpop.xlane.xlu0 %416  ;;  %v420_v36 = vpop.xlane.xlu1 %419  ;;  %v919_v52 = vadd.f32 %v789_v7, %v788_v20  ;;  %v5140_v44 = vunpack.c.l.bf16 %v2921_v22 }
  0xe5   : > { %5137 = vst [vmem:[#allocation35_spill] sm:$0xff] %v3508_v0  ;;  %v596_v25 = vmul.f32 0.00390625, %v417_v42  ;;  %v597_v16 = vmul.f32 0.00390625, %v420_v36  ;;  %v790_v32 = vmul.f32 %v3500_v9, %v3500_v9  ;;  %917 = vadd.xlane.f32.xlu0 %v916_v5  ;;  %914 = vadd.xlane.f32.xlu1 %v913_v51  ;;  %v792_v6 = vmul.f32 %v3508_v0, %v3508_v0 }
  0xe6   : > { %5139 = vst [vmem:[#allocation36_spill] sm:$0xff] %v3512_v28  ;;  %v791_v8 = vmul.f32 %v3504_v56, %v3504_v56  ;;  %v793_v13 = vmul.f32 %v3512_v28, %v3512_v28  ;;  %v5141_v36 = vunpack.c.h.bf16 %v2921_v22  ;;  %v5144_v5 = vunpack.c.h.bf16 %v2924_v23 }
  0xe7   : > { %v3524_v1 = vsub.f32 %v5140_v44, %v596_v25  ;;  %v3532_v11 = vsub.f32 %v5142_v3, %v597_v16 }
  0xe8   : > { %v3528_v2 = vsub.f32 %v5141_v36, %v596_v25  ;;  %v3536_v20 = vsub.f32 %v5144_v5, %v597_v16  ;;  %v423_v7 = vpop.xlane.xlu0 %422  ;;  %v922_v42 = vadd.f32 %v791_v8, %v790_v32  ;;  %v426_v51 = vpop.xlane.xlu1 %425  ;;  %v925_v25 = vadd.f32 %v793_v13, %v792_v6 }
  0xe9   : > { %5143 = vst [vmem:[#allocation37_spill] sm:$0xff] %v3532_v11  ;;  %v598_v28 = vmul.f32 0.00390625, %v423_v7  ;;  %v599_v0 = vmul.f32 0.00390625, %v426_v51  ;;  %v794_v44 = vmul.f32 %v3524_v1, %v3524_v1  ;;  %920 = vadd.xlane.f32.xlu1 %v919_v52  ;;  %v796_v36 = vmul.f32 %v3532_v11, %v3532_v11 }
  0xea   : > { %5145 = vst [vmem:[#allocation38_spill] sm:$0xff] %v3536_v20  ;;  %v795_v22 = vmul.f32 %v3528_v2, %v3528_v2  ;;  %923 = vadd.xlane.f32.xlu0 %v922_v42  ;;  %v797_v23 = vmul.f32 %v3536_v20, %v3536_v20  ;;  %v5146_v16 = vunpack.c.l.bf16 %v2939_v30  ;;  %v5147_v8 = vunpack.c.h.bf16 %v2939_v30 }
  0xeb   : > { %v5148_v5 = vunpack.c.l.bf16 %v2942_v31  ;;  %v5150_v52 = vunpack.c.h.bf16 %v2942_v31 }
  0xec   : > { %v3548_v32 = vsub.f32 %v5146_v16, %v598_v28  ;;  %v3552_v3 = vsub.f32 %v5147_v8, %v598_v28  ;;  %v429_v13 = vpop.xlane.xlu0 %428  ;;  %v928_v42 = vadd.f32 %v795_v22, %v794_v44  ;;  %v432_v51 = vpop.xlane.xlu1 %431  ;;  %v931_v28 = vadd.f32 %v797_v23, %v796_v36 }
  0xed   : > { %v3556_v7 = vsub.f32 %v5148_v5, %v599_v0  ;;  %v3560_v6 = vsub.f32 %v5150_v52, %v599_v0  ;;  %v600_v20 = vmul.f32 0.00390625, %v429_v13  ;;  %v601_v11 = vmul.f32 0.00390625, %v432_v51  ;;  %926 = vadd.xlane.f32.xlu1 %v925_v25 }
  0xee   : > { %v798_v16 = vmul.f32 %v3548_v32, %v3548_v32  ;;  %v799_v30 = vmul.f32 %v3552_v3, %v3552_v3  ;;  %929 = vadd.xlane.f32.xlu0 %v928_v42  ;;  %v5152_v0 = vunpack.c.l.bf16 %v2957_v38  ;;  %v5153_v22 = vunpack.c.h.bf16 %v2957_v38 }
  0xef   : > { %5149 = vst [vmem:[#allocation39_spill] sm:$0xff] %v3556_v7  ;;  %5151 = vst [vmem:[#allocation40_spill] sm:$0xff] %v3560_v6  ;;  %v800_v8 = vmul.f32 %v3556_v7, %v3556_v7  ;;  %v801_v31 = vmul.f32 %v3560_v6, %v3560_v6  ;;  %v5154_v52 = vunpack.c.l.bf16 %v2960_v39  ;;  %v5156_v25 = vunpack.c.h.bf16 %v2960_v39 }
  0xf0   : > { %v3572_v44 = vsub.f32 %v5152_v0, %v600_v20  ;;  %v3576_v5 = vsub.f32 %v5153_v22, %v600_v20  ;;  %v435_v23 = vpop.xlane.xlu0 %434  ;;  %v934_v42 = vadd.f32 %v799_v30, %v798_v16  ;;  %v438_v51 = vpop.xlane.xlu1 %437  ;;  %v5159_v30 = vunpack.c.h.bf16 %v2975_v46 }
  0xf1   : > { %v3580_v13 = vsub.f32 %v5154_v52, %v601_v11  ;;  %v3584_v36 = vsub.f32 %v5156_v25, %v601_v11  ;;  %v602_v6 = vmul.f32 0.00390625, %v435_v23  ;;  %v603_v7 = vmul.f32 0.00390625, %v438_v51  ;;  %932 = vadd.xlane.f32.xlu1 %v931_v28 }
  0xf2   : > { %v802_v0 = vmul.f32 %v3572_v44, %v3572_v44  ;;  %v803_v38 = vmul.f32 %v3576_v5, %v3576_v5  ;;  %935 = vadd.xlane.f32.xlu0 %v934_v42  ;;  %v937_v20 = vadd.f32 %v801_v31, %v800_v8  ;;  %v5158_v11 = vunpack.c.l.bf16 %v2975_v46 }
  0xf3   : > { %5155 = vst [vmem:[#allocation41_spill] sm:$0xff] %v3580_v13  ;;  %5157 = vst [vmem:[#allocation42_spill] sm:$0xff] %v3584_v36  ;;  %v804_v22 = vmul.f32 %v3580_v13, %v3580_v13  ;;  %v805_v39 = vmul.f32 %v3584_v36, %v3584_v36  ;;  %v3600_v52 = vsub.f32 %v5159_v30, %v602_v6  ;;  %v5160_v25 = vunpack.c.l.bf16 %v2978_v47 }
  0xf4   : > { %v3596_v16 = vsub.f32 %v5158_v11, %v602_v6  ;;  %v5162_v28 = vunpack.c.h.bf16 %v2978_v47  ;;  %v441_v31 = vpop.xlane.xlu0 %440  ;;  %v940_v42 = vadd.f32 %v803_v38, %v802_v0  ;;  %v444_v51 = vpop.xlane.xlu1 %443  ;;  %v5165_v38 = vunpack.c.h.bf16 %v2993_v54 }
  0xf5   : > { %v3604_v23 = vsub.f32 %v5160_v25, %v603_v7  ;;  %v604_v36 = vmul.f32 0.00390625, %v441_v31  ;;  %v605_v13 = vmul.f32 0.00390625, %v444_v51  ;;  %v807_v46 = vmul.f32 %v3600_v52, %v3600_v52  ;;  %938 = vadd.xlane.f32.xlu1 %v937_v20 }
  0xf6   : > { %v3608_v8 = vsub.f32 %v5162_v28, %v603_v7  ;;  %v806_v11 = vmul.f32 %v3596_v16, %v3596_v16  ;;  %941 = vadd.xlane.f32.xlu0 %v940_v42  ;;  %v943_v6 = vadd.f32 %v805_v39, %v804_v22  ;;  %v5164_v7 = vunpack.c.l.bf16 %v2993_v54 }
  0xf7   : > { %5161 = vst [vmem:[#allocation43_spill] sm:$0xff] %v3604_v23  ;;  %v808_v30 = vmul.f32 %v3604_v23, %v3604_v23  ;;  %v3624_v25 = vsub.f32 %v5165_v38, %v604_v36  ;;  %v5166_v28 = vunpack.c.l.bf16 %v2996_v55  ;;  %v5168_v20 = vunpack.c.h.bf16 %v2996_v55 }
  0xf8   : > { %5163 = vst [vmem:[#allocation44_spill] sm:$0xff] %v3608_v8  ;;  %v809_v47 = vmul.f32 %v3608_v8, %v3608_v8  ;;  %v3620_v0 = vsub.f32 %v5164_v7, %v604_v36  ;;  %v447_v39 = vpop.xlane.xlu0 %446  ;;  %v946_v42 = vadd.f32 %v807_v46, %v806_v11  ;;  %v450_v51 = vpop.xlane.xlu1 %449  ;;  %v5171_v46 = vunpack.c.h.bf16 %v3011_v62 }
  0xf9   : > { %v3628_v31 = vsub.f32 %v5166_v28, %v605_v13  ;;  %v3632_v22 = vsub.f32 %v5168_v20, %v605_v13  ;;  %v606_v8 = vmul.f32 0.00390625, %v447_v39  ;;  %v607_v23 = vmul.f32 0.00390625, %v450_v51  ;;  %944 = vadd.xlane.f32.xlu1 %v943_v6 }
  0xfa   : > { %v810_v7 = vmul.f32 %v3620_v0, %v3620_v0  ;;  %v811_v54 = vmul.f32 %v3624_v25, %v3624_v25  ;;  %947 = vadd.xlane.f32.xlu0 %v946_v42  ;;  %v949_v36 = vadd.f32 %v809_v47, %v808_v30  ;;  %v5170_v13 = vunpack.c.l.bf16 %v3011_v62 }
  0xfb   : > { %5167 = vst [vmem:[#allocation45_spill] sm:$0xff] %v3628_v31  ;;  %5169 = vst [vmem:[#allocation46_spill] sm:$0xff] %v3632_v22  ;;  %v812_v38 = vmul.f32 %v3628_v31, %v3628_v31  ;;  %v813_v55 = vmul.f32 %v3632_v22, %v3632_v22  ;;  %v3648_v28 = vsub.f32 %v5171_v46, %v606_v8  ;;  %v5172_v20 = vunpack.c.l.bf16 %v3014_v63 }
  0xfc   : > { %v3644_v11 = vsub.f32 %v5170_v13, %v606_v8  ;;  %v5174_v6 = vunpack.c.h.bf16 %v3014_v63  ;;  %v453_v47 = vpop.xlane.xlu0 %452  ;;  %v952_v42 = vadd.f32 %v811_v54, %v810_v7  ;;  %v456_v51 = vpop.xlane.xlu1 %455  ;;  %v5177_v54 = vunpack.c.h.bf16 %v3029_v34 }
  0xfd   : > { %v3652_v39 = vsub.f32 %v5172_v20, %v607_v23  ;;  %v608_v22 = vmul.f32 0.00390625, %v453_v47  ;;  %v609_v31 = vmul.f32 0.00390625, %v456_v51  ;;  %v815_v62 = vmul.f32 %v3648_v28, %v3648_v28  ;;  %950 = vadd.xlane.f32.xlu1 %v949_v36 }
  0xfe   : > { %v3656_v30 = vsub.f32 %v5174_v6, %v607_v23  ;;  %v814_v13 = vmul.f32 %v3644_v11, %v3644_v11  ;;  %953 = vadd.xlane.f32.xlu0 %v952_v42  ;;  %v955_v8 = vadd.f32 %v813_v55, %v812_v38  ;;  %v5176_v23 = vunpack.c.l.bf16 %v3029_v34 }
  0xff   : > { %5173 = vst [vmem:[#allocation47_spill] sm:$0xff] %v3652_v39  ;;  %v816_v46 = vmul.f32 %v3652_v39, %v3652_v39  ;;  %v3672_v20 = vsub.f32 %v5177_v54, %v608_v22  ;;  %v5178_v6 = vunpack.c.l.bf16 %v3032_v35  ;;  %v5180_v36 = vunpack.c.h.bf16 %v3032_v35 }
 0x100   : > { %5175 = vst [vmem:[#allocation48_spill] sm:$0xff] %v3656_v30  ;;  %v817_v63 = vmul.f32 %v3656_v30, %v3656_v30  ;;  %v3668_v7 = vsub.f32 %v5176_v23, %v608_v22  ;;  %v459_v55 = vpop.xlane.xlu0 %458  ;;  %v958_v42 = vadd.f32 %v815_v62, %v814_v13  ;;  %v462_v51 = vpop.xlane.xlu1 %461  ;;  %v5183_v62 = vunpack.c.h.bf16 %v3047_v61 }
 0x101   : > { %v3676_v47 = vsub.f32 %v5178_v6, %v609_v31  ;;  %v3680_v38 = vsub.f32 %v5180_v36, %v609_v31  ;;  %v610_v30 = vmul.f32 0.00390625, %v459_v55  ;;  %v611_v39 = vmul.f32 0.00390625, %v462_v51  ;;  %956 = vadd.xlane.f32.xlu1 %v955_v8 }
 0x102   : > { %v818_v23 = vmul.f32 %v3668_v7, %v3668_v7  ;;  %v819_v34 = vmul.f32 %v3672_v20, %v3672_v20  ;;  %959 = vadd.xlane.f32.xlu0 %v958_v42  ;;  %v961_v22 = vadd.f32 %v817_v63, %v816_v46  ;;  %v5182_v31 = vunpack.c.l.bf16 %v3047_v61 }
 0x103   : > { %5179 = vst [vmem:[#allocation49_spill] sm:$0xff] %v3676_v47  ;;  %5181 = vst [vmem:[#allocation50_spill] sm:$0xff] %v3680_v38  ;;  %v820_v54 = vmul.f32 %v3676_v47, %v3676_v47  ;;  %v821_v35 = vmul.f32 %v3680_v38, %v3680_v38  ;;  %v3696_v6 = vsub.f32 %v5183_v62, %v610_v30  ;;  %v5184_v36 = vunpack.c.l.bf16 %v3050_v15 }
 0x104   : > { %v3692_v13 = vsub.f32 %v5182_v31, %v610_v30  ;;  %v5186_v8 = vunpack.c.h.bf16 %v3050_v15  ;;  %v465_v63 = vpop.xlane.xlu0 %464  ;;  %v964_v42 = vadd.f32 %v819_v34, %v818_v23  ;;  %v468_v51 = vpop.xlane.xlu1 %467  ;;  %v5189_v34 = vunpack.c.h.bf16 %v3065_v59 }
 0x105   : > { %v3700_v55 = vsub.f32 %v5184_v36, %v611_v39  ;;  %v612_v38 = vmul.f32 0.00390625, %v465_v63  ;;  %v613_v47 = vmul.f32 0.00390625, %v468_v51  ;;  %v823_v61 = vmul.f32 %v3696_v6, %v3696_v6  ;;  %962 = vadd.xlane.f32.xlu1 %v961_v22 }
 0x106   : > { %v3704_v46 = vsub.f32 %v5186_v8, %v611_v39  ;;  %v822_v31 = vmul.f32 %v3692_v13, %v3692_v13  ;;  %965 = vadd.xlane.f32.xlu0 %v964_v42  ;;  %v967_v30 = vadd.f32 %v821_v35, %v820_v54  ;;  %v5188_v39 = vunpack.c.l.bf16 %v3065_v59 }
 0x107   : > { %5185 = vst [vmem:[#allocation51_spill] sm:$0xff] %v3700_v55  ;;  %v824_v62 = vmul.f32 %v3700_v55, %v3700_v55  ;;  %v3720_v36 = vsub.f32 %v5189_v34, %v612_v38  ;;  %v5190_v8 = vunpack.c.l.bf16 %v3068_v40  ;;  %v5192_v22 = vunpack.c.h.bf16 %v3068_v40 }
 0x108   : > { %5187 = vst [vmem:[#allocation52_spill] sm:$0xff] %v3704_v46  ;;  %v825_v15 = vmul.f32 %v3704_v46, %v3704_v46  ;;  %v3716_v23 = vsub.f32 %v5188_v39, %v612_v38  ;;  %v471_v35 = vpop.xlane.xlu0 %470  ;;  %v970_v42 = vadd.f32 %v823_v61, %v822_v31  ;;  %v474_v51 = vpop.xlane.xlu1 %473  ;;  %v5195_v61 = vunpack.c.h.bf16 %v3083_v53 }
 0x109   : > { %v3724_v63 = vsub.f32 %v5190_v8, %v613_v47  ;;  %v3728_v54 = vsub.f32 %v5192_v22, %v613_v47  ;;  %v614_v46 = vmul.f32 0.00390625, %v471_v35  ;;  %v615_v55 = vmul.f32 0.00390625, %v474_v51  ;;  %968 = vadd.xlane.f32.xlu1 %v967_v30 }
 0x10a   : > { %v826_v39 = vmul.f32 %v3716_v23, %v3716_v23  ;;  %v827_v59 = vmul.f32 %v3720_v36, %v3720_v36  ;;  %971 = vadd.xlane.f32.xlu0 %v970_v42  ;;  %v973_v38 = vadd.f32 %v825_v15, %v824_v62  ;;  %v5194_v47 = vunpack.c.l.bf16 %v3083_v53 }
 0x10b   : > { %5191 = vst [vmem:[#allocation53_spill] sm:$0xff] %v3724_v63  ;;  %5193 = vst [vmem:[#allocation54_spill] sm:$0xff] %v3728_v54  ;;  %v828_v34 = vmul.f32 %v3724_v63, %v3724_v63  ;;  %v829_v40 = vmul.f32 %v3728_v54, %v3728_v54  ;;  %v3744_v8 = vsub.f32 %v5195_v61, %v614_v46  ;;  %v5196_v22 = vunpack.c.l.bf16 %v3086_v19 }
 0x10c   : > { %v3740_v31 = vsub.f32 %v5194_v47, %v614_v46  ;;  %v5198_v30 = vunpack.c.h.bf16 %v3086_v19  ;;  %v477_v15 = vpop.xlane.xlu0 %476  ;;  %v976_v42 = vadd.f32 %v827_v59, %v826_v39  ;;  %v480_v51 = vpop.xlane.xlu1 %479  ;;  %v5201_v59 = vunpack.c.h.bf16 %v3101_v49 }
 0x10d   : > { %v3748_v35 = vsub.f32 %v5196_v22, %v615_v55  ;;  %v616_v54 = vmul.f32 0.00390625, %v477_v15  ;;  %v617_v63 = vmul.f32 0.00390625, %v480_v51  ;;  %v831_v53 = vmul.f32 %v3744_v8, %v3744_v8  ;;  %974 = vadd.xlane.f32.xlu1 %v973_v38 }
 0x10e   : > { %v3752_v62 = vsub.f32 %v5198_v30, %v615_v55  ;;  %v830_v47 = vmul.f32 %v3740_v31, %v3740_v31  ;;  %977 = vadd.xlane.f32.xlu0 %v976_v42  ;;  %v979_v46 = vadd.f32 %v829_v40, %v828_v34  ;;  %v5200_v55 = vunpack.c.l.bf16 %v3101_v49 }
 0x10f   : > { %5197 = vst [vmem:[#allocation55_spill] sm:$0xff] %v3748_v35  ;;  %v832_v61 = vmul.f32 %v3748_v35, %v3748_v35  ;;  %v3768_v22 = vsub.f32 %v5201_v59, %v616_v54  ;;  %v5202_v30 = vunpack.c.l.bf16 %v3104_v50  ;;  %v5204_v38 = vunpack.c.h.bf16 %v3104_v50 }
 0x110   : > { %5199 = vst [vmem:[#allocation56_spill] sm:$0xff] %v3752_v62  ;;  %v833_v19 = vmul.f32 %v3752_v62, %v3752_v62  ;;  %v3764_v39 = vsub.f32 %v5200_v55, %v616_v54  ;;  %v483_v40 = vpop.xlane.xlu0 %482  ;;  %v982_v42 = vadd.f32 %v831_v53, %v830_v47  ;;  %v486_v51 = vpop.xlane.xlu1 %485  ;;  %v5207_v53 = vunpack.c.h.bf16 %v3119_v45 }
 0x111   : > { %v3772_v15 = vsub.f32 %v5202_v30, %v617_v63  ;;  %v3776_v34 = vsub.f32 %v5204_v38, %v617_v63  ;;  %v618_v62 = vmul.f32 0.00390625, %v483_v40  ;;  %v619_v35 = vmul.f32 0.00390625, %v486_v51  ;;  %980 = vadd.xlane.f32.xlu1 %v979_v46 }
 0x112   : > { %v834_v55 = vmul.f32 %v3764_v39, %v3764_v39  ;;  %v835_v49 = vmul.f32 %v3768_v22, %v3768_v22  ;;  %983 = vadd.xlane.f32.xlu0 %v982_v42  ;;  %v985_v54 = vadd.f32 %v833_v19, %v832_v61  ;;  %v5206_v63 = vunpack.c.l.bf16 %v3119_v45 }
 0x113   : > { %5203 = vst [vmem:[#allocation57_spill] sm:$0xff] %v3772_v15  ;;  %5205 = vst [vmem:[#allocation58_spill] sm:$0xff] %v3776_v34  ;;  %v836_v59 = vmul.f32 %v3772_v15, %v3772_v15  ;;  %v837_v50 = vmul.f32 %v3776_v34, %v3776_v34  ;;  %v3792_v30 = vsub.f32 %v5207_v53, %v618_v62  ;;  %v5208_v38 = vunpack.c.l.bf16 %v3122_v24 }
 0x114   : > { %v3788_v47 = vsub.f32 %v5206_v63, %v618_v62  ;;  %v5210_v46 = vunpack.c.h.bf16 %v3122_v24  ;;  %v489_v19 = vpop.xlane.xlu0 %488  ;;  %v988_v42 = vadd.f32 %v835_v49, %v834_v55  ;;  %v492_v51 = vpop.xlane.xlu1 %491  ;;  %v5213_v49 = vunpack.c.h.bf16 %v3137_v43 }
 0x115   : > { %v3796_v40 = vsub.f32 %v5208_v38, %v619_v35  ;;  %v620_v34 = vmul.f32 0.00390625, %v489_v19  ;;  %v621_v15 = vmul.f32 0.00390625, %v492_v51  ;;  %v839_v45 = vmul.f32 %v3792_v30, %v3792_v30  ;;  %986 = vadd.xlane.f32.xlu1 %v985_v54 }
 0x116   : > { %v3800_v61 = vsub.f32 %v5210_v46, %v619_v35  ;;  %v838_v63 = vmul.f32 %v3788_v47, %v3788_v47  ;;  %989 = vadd.xlane.f32.xlu0 %v988_v42  ;;  %v991_v62 = vadd.f32 %v837_v50, %v836_v59  ;;  %v5212_v35 = vunpack.c.l.bf16 %v3137_v43 }
 0x117   : > { %5209 = vst [vmem:[#allocation59_spill] sm:$0xff] %v3796_v40  ;;  %v840_v53 = vmul.f32 %v3796_v40, %v3796_v40  ;;  %v3816_v38 = vsub.f32 %v5213_v49, %v620_v34  ;;  %v5214_v46 = vunpack.c.l.bf16 %v3140_v58  ;;  %v5216_v54 = vunpack.c.h.bf16 %v3140_v58 }
 0x118   : > { %5211 = vst [vmem:[#allocation60_spill] sm:$0xff] %v3800_v61  ;;  %v841_v24 = vmul.f32 %v3800_v61, %v3800_v61  ;;  %v3812_v55 = vsub.f32 %v5212_v35, %v620_v34  ;;  %v495_v50 = vpop.xlane.xlu0 %494  ;;  %v994_v42 = vadd.f32 %v839_v45, %v838_v63  ;;  %v498_v51 = vpop.xlane.xlu1 %497  ;;  %v5219_v45 = vunpack.c.h.bf16 %v3155_v37 }
 0x119   : > { %v3820_v19 = vsub.f32 %v5214_v46, %v621_v15  ;;  %v3824_v59 = vsub.f32 %v5216_v54, %v621_v15  ;;  %v622_v61 = vmul.f32 0.00390625, %v495_v50  ;;  %v623_v40 = vmul.f32 0.00390625, %v498_v51  ;;  %992 = vadd.xlane.f32.xlu1 %v991_v62 }
 0x11a   : > { %v842_v35 = vmul.f32 %v3812_v55, %v3812_v55  ;;  %v843_v43 = vmul.f32 %v3816_v38, %v3816_v38  ;;  %995 = vadd.xlane.f32.xlu0 %v994_v42  ;;  %v997_v34 = vadd.f32 %v841_v24, %v840_v53  ;;  %v5218_v15 = vunpack.c.l.bf16 %v3155_v37 }
 0x11b   : > { %5215 = vst [vmem:[#allocation61_spill] sm:$0xff] %v3820_v19  ;;  %5217 = vst [vmem:[#allocation62_spill] sm:$0xff] %v3824_v59  ;;  %v844_v49 = vmul.f32 %v3820_v19, %v3820_v19  ;;  %v845_v58 = vmul.f32 %v3824_v59, %v3824_v59  ;;  %v3840_v46 = vsub.f32 %v5219_v45, %v622_v61  ;;  %v5220_v54 = vunpack.c.l.bf16 %v3158_v14 }
 0x11c   : > { %v3836_v63 = vsub.f32 %v5218_v15, %v622_v61  ;;  %v5221_v62 = vunpack.c.h.bf16 %v3158_v14  ;;  %v501_v24 = vpop.xlane.xlu0 %500  ;;  %v1000_v42 = vadd.f32 %v843_v43, %v842_v35  ;;  %v504_v51 = vpop.xlane.xlu1 %503  ;;  %v5225_v43 = vunpack.c.h.bf16 %v3173_v33 }
 0x11d   : > { %v3844_v50 = vsub.f32 %v5220_v54, %v623_v40  ;;  %v624_v59 = vmul.f32 0.00390625, %v501_v24  ;;  %v625_v19 = vmul.f32 0.00390625, %v504_v51  ;;  %v847_v37 = vmul.f32 %v3840_v46, %v3840_v46  ;;  %998 = vadd.xlane.f32.xlu1 %v997_v34 }
 0x11e   : > { %v3848_v53 = vsub.f32 %v5221_v62, %v623_v40  ;;  %v846_v15 = vmul.f32 %v3836_v63, %v3836_v63  ;;  %1001 = vadd.xlane.f32.xlu0 %v1000_v42  ;;  %v1003_v61 = vadd.f32 %v845_v58, %v844_v49  ;;  %v5223_v40 = vunpack.c.l.bf16 %v3173_v33 }
 0x11f   : > { %v848_v45 = vmul.f32 %v3844_v50, %v3844_v50  ;;  %v3864_v54 = vsub.f32 %v5225_v43, %v624_v59  ;;  %v5227_v62 = vunpack.c.l.bf16 %v3176_v57  ;;  %v5229_v34 = vunpack.c.h.bf16 %v3176_v57 }
 0x120   : > { %5222 = vst [vmem:[#allocation63_spill] sm:$0xff] %v3848_v53  ;;  %v849_v14 = vmul.f32 %v3848_v53, %v3848_v53  ;;  %v3860_v35 = vsub.f32 %v5223_v40, %v624_v59  ;;  %v507_v58 = vpop.xlane.xlu0 %506  ;;  %v1006_v42 = vadd.f32 %v847_v37, %v846_v15  ;;  %v510_v51 = vpop.xlane.xlu1 %509  ;;  %v5231_v15 = vunpack.c.l.bf16 %v3191_v29 }
 0x121   : > { %5226 = vst [vmem:[#allocation65_spill] sm:$0xff] %v3864_v54  ;;  %v3868_v24 = vsub.f32 %v5227_v62, %v625_v19  ;;  %v3872_v49 = vsub.f32 %v5229_v34, %v625_v19  ;;  %v851_v40 = vmul.f32 %v3864_v54, %v3864_v54  ;;  %v626_v43 = vmul.f32 0.00390625, %v507_v58  ;;  %1004 = vadd.xlane.f32.xlu1 %v1003_v61 }
 0x122   : > { %5224 = vst [vmem:[#allocation64_spill] sm:$0xff] %v3860_v35  ;;  %v850_v53 = vmul.f32 %v3860_v35, %v3860_v35  ;;  %1007 = vadd.xlane.f32.xlu0 %v1006_v42  ;;  %v627_v57 = vmul.f32 0.00390625, %v510_v51  ;;  %v1009_v19 = vadd.f32 %v849_v14, %v848_v45  ;;  %v5232_v34 = vunpack.c.h.bf16 %v3191_v29 }
 0x123   : > { %5228 = vst [vmem:[#allocation66_spill] sm:$0xff] %v3868_v24  ;;  %5230 = vst [vmem:[#allocation67_spill] sm:$0xff] %v3872_v49  ;;  %v852_v33 = vmul.f32 %v3868_v24, %v3868_v24  ;;  %v853_v59 = vmul.f32 %v3872_v49, %v3872_v49  ;;  %v3884_v37 = vsub.f32 %v5231_v15, %v626_v43  ;;  %v5233_v54 = vunpack.c.l.bf16 %v3194_v18 }
 0x124   : > { %v1012_v62 = vadd.f32 %v851_v40, %v850_v53  ;;  %v3888_v35 = vsub.f32 %v5232_v34, %v626_v43  ;;  %v5234_v49 = vunpack.c.h.bf16 %v3194_v18  ;;  %v513_v61 = vpop.xlane.xlu0 %512  ;;  %v516_v42 = vpop.xlane.xlu1 %515  ;;  %v5235_v18 = vunpack.c.l.bf16 %v3209_v27 }
 0x125   : > { %v3892_v24 = vsub.f32 %v5233_v54, %v627_v57  ;;  %v628_v45 = vmul.f32 0.00390625, %v513_v61  ;;  %v629_v53 = vmul.f32 0.00390625, %v516_v42  ;;  %v1015_v14 = vadd.f32 %v853_v59, %v852_v33  ;;  %1010 = vadd.xlane.f32.xlu1 %v1009_v19 }
 0x126   : > { %v3896_v58 = vsub.f32 %v5234_v49, %v627_v57  ;;  %v854_v51 = vmul.f32 %v3884_v37, %v3884_v37  ;;  %v855_v29 = vmul.f32 %v3888_v35, %v3888_v35  ;;  %v5237_v43 = vunpack.c.h.bf16 %v3209_v27  ;;  %1013 = vadd.xlane.f32.xlu0 %v1012_v62 }
 0x127   : > { %v856_v40 = vmul.f32 %v3892_v24, %v3892_v24  ;;  %v3908_v49 = vsub.f32 %v5235_v18, %v628_v45  ;;  %v5239_v59 = vunpack.c.l.bf16 %v3212_v48  ;;  %v5241_v15 = vunpack.c.h.bf16 %v3212_v48 }
 0x128   : > { %v857_v54 = vmul.f32 %v3896_v58, %v3896_v58  ;;  %v3912_v33 = vsub.f32 %v5237_v43, %v628_v45  ;;  %v519_v61 = vpop.xlane.xlu0 %518  ;;  %v1018_v42 = vadd.f32 %v855_v29, %v854_v51  ;;  %v522_v19 = vpop.xlane.xlu1 %521  ;;  %v5243_v51 = vunpack.c.l.bf16 %v3227_v21 }
 0x129   : > { %5236 = vst [vmem:[#allocation68_spill] sm:$0xff] %v3908_v49  ;;  %v3916_v57 = vsub.f32 %v5239_v59, %v629_v53  ;;  %v3920_v34 = vsub.f32 %v5241_v15, %v629_v53  ;;  %v858_v18 = vmul.f32 %v3908_v49, %v3908_v49  ;;  %v630_v43 = vmul.f32 0.00390625, %v519_v61  ;;  %1016 = vadd.xlane.f32.xlu1 %v1015_v14 }
 0x12a   : > { %5238 = vst [vmem:[#allocation69_spill] sm:$0xff] %v3912_v33  ;;  %v859_v27 = vmul.f32 %v3912_v33, %v3912_v33  ;;  %v631_v48 = vmul.f32 0.00390625, %v522_v19  ;;  %v1021_v53 = vadd.f32 %v857_v54, %v856_v40  ;;  %1019 = vadd.xlane.f32.xlu0 %v1018_v42  ;;  %v5244_v15 = vunpack.c.h.bf16 %v3227_v21 }
 0x12b   : > { %5240 = vst [vmem:[#allocation70_spill] sm:$0xff] %v3916_v57  ;;  %5242 = vst [vmem:[#allocation71_spill] sm:$0xff] %v3920_v34  ;;  %v860_v62 = vmul.f32 %v3916_v57, %v3916_v57  ;;  %v861_v45 = vmul.f32 %v3920_v34, %v3920_v34  ;;  %v3932_v29 = vsub.f32 %v5243_v51, %v630_v43  ;;  %v5245_v33 = vunpack.c.l.bf16 %v3230_v26 }
 0x12c   : > { %v1024_v59 = vadd.f32 %v859_v27, %v858_v18  ;;  %v3936_v49 = vsub.f32 %v5244_v15, %v630_v43  ;;  %v5247_v34 = vunpack.c.h.bf16 %v3230_v26  ;;  %v525_v14 = vpop.xlane.xlu0 %524  ;;  %v528_v40 = vpop.xlane.xlu1 %527  ;;  %v5249_v26 = vunpack.c.l.bf16 %v3245_v17 }
 0x12d   : > { %v3940_v57 = vsub.f32 %v5245_v33, %v631_v48  ;;  %v632_v54 = vmul.f32 0.00390625, %v525_v14  ;;  %v633_v42 = vmul.f32 0.00390625, %v528_v40  ;;  %v1027_v19 = vadd.f32 %v861_v45, %v860_v62  ;;  %1022 = vadd.xlane.f32.xlu1 %v1021_v53 }
 0x12e   : > { %v3944_v61 = vsub.f32 %v5247_v34, %v631_v48  ;;  %v862_v18 = vmul.f32 %v3932_v29, %v3932_v29  ;;  %v863_v21 = vmul.f32 %v3936_v49, %v3936_v49  ;;  %v5251_v43 = vunpack.c.h.bf16 %v3245_v17  ;;  %1025 = vadd.xlane.f32.xlu0 %v1024_v59 }
 0x12f   : > { %5246 = vst [vmem:[#allocation72_spill] sm:$0xff] %v3940_v57  ;;  %v864_v27 = vmul.f32 %v3940_v57, %v3940_v57  ;;  %v3956_v34 = vsub.f32 %v5249_v26, %v632_v54  ;;  %v5253_v45 = vunpack.c.l.bf16 %v3248_v41  ;;  %v5255_v51 = vunpack.c.h.bf16 %v3248_v41 }
 0x130   : > { %5248 = vst [vmem:[#allocation73_spill] sm:$0xff] %v3944_v61  ;;  %v865_v33 = vmul.f32 %v3944_v61, %v3944_v61  ;;  %v3960_v62 = vsub.f32 %v5251_v43, %v632_v54  ;;  %v531_v14 = vpop.xlane.xlu0 %530  ;;  %v1030_v40 = vadd.f32 %v863_v21, %v862_v18  ;;  %v534_v53 = vpop.xlane.xlu1 %533  ;;  %v5257_v18 = vunpack.c.l.bf16 %v3263_v12 }
 0x131   : > { %5250 = vst [vmem:[#allocation74_spill] sm:$0xff] %v3956_v34  ;;  %v3964_v48 = vsub.f32 %v5253_v45, %v633_v42  ;;  %v3968_v15 = vsub.f32 %v5255_v51, %v633_v42  ;;  %v866_v26 = vmul.f32 %v3956_v34, %v3956_v34  ;;  %v634_v43 = vmul.f32 0.00390625, %v531_v14  ;;  %1028 = vadd.xlane.f32.xlu1 %v1027_v19 }
 0x132   : > { %5252 = vst [vmem:[#allocation75_spill] sm:$0xff] %v3960_v62  ;;  %v867_v17 = vmul.f32 %v3960_v62, %v3960_v62  ;;  %v635_v41 = vmul.f32 0.00390625, %v534_v53  ;;  %v1033_v42 = vadd.f32 %v865_v33, %v864_v27  ;;  %1031 = vadd.xlane.f32.xlu0 %v1030_v40  ;;  %v5259_v51 = vunpack.c.h.bf16 %v3263_v12 }
 0x133   : > { %5254 = vst [vmem:[#allocation76_spill] sm:$0xff] %v3964_v48  ;;  %5256 = vst [vmem:[#allocation77_spill] sm:$0xff] %v3968_v15  ;;  %v868_v59 = vmul.f32 %v3964_v48, %v3964_v48  ;;  %v869_v54 = vmul.f32 %v3968_v15, %v3968_v15  ;;  %v3980_v21 = vsub.f32 %v5257_v18, %v634_v43  ;;  %v5261_v62 = vunpack.c.l.bf16 %v3266_v60 }
 0x134   : > { %v1036_v45 = vadd.f32 %v867_v17, %v866_v26  ;;  %v3984_v34 = vsub.f32 %v5259_v51, %v634_v43  ;;  %v5263_v15 = vunpack.c.h.bf16 %v3266_v60  ;;  %v537_v19 = vpop.xlane.xlu0 %536  ;;  %v540_v27 = vpop.xlane.xlu1 %539  ;;  %v5265_v60 = vunpack.c.l.bf16 %v3281_v10 }
 0x135   : > { %5258 = vst [vmem:[#allocation78_spill] sm:$0xff] %v3980_v21  ;;  %v3988_v48 = vsub.f32 %v5261_v62, %v635_v41  ;;  %v636_v33 = vmul.f32 0.00390625, %v537_v19  ;;  %v637_v40 = vmul.f32 0.00390625, %v540_v27  ;;  %v1039_v53 = vadd.f32 %v869_v54, %v868_v59  ;;  %1034 = vadd.xlane.f32.xlu1 %v1033_v42  ;;  %v5269_v54 = vld [vmem:[#allocation11_spill] sm:$0xff] }
 0x136   : > { %5260 = vst [vmem:[#allocation79_spill] sm:$0xff] %v3984_v34  ;;  %v3992_v14 = vsub.f32 %v5263_v15, %v635_v41  ;;  %v870_v26 = vmul.f32 %v3980_v21, %v3980_v21  ;;  %v871_v12 = vmul.f32 %v3984_v34, %v3984_v34  ;;  %v5267_v43 = vunpack.c.h.bf16 %v3281_v10  ;;  %1037 = vadd.xlane.f32.xlu0 %v1036_v45  ;;  %v5358_v21 = vld [vmem:[#allocation31_spill] sm:$0xff] }
 0x137   : > { %5262 = vst [vmem:[#allocation80_spill] sm:$0xff] %v3988_v48  ;;  %v872_v17 = vmul.f32 %v3988_v48, %v3988_v48  ;;  %v4004_v15 = vsub.f32 %v5265_v60, %v636_v33  ;;  %v5270_v41 = vunpack.c.l.bf16 %v5269_v54  ;;  %v5272_v51 = vunpack.c.h.bf16 %v5269_v54 }
 0x138   : > { %5264 = vst [vmem:[#allocation81_spill] sm:$0xff] %v3992_v14  ;;  %v873_v62 = vmul.f32 %v3992_v14, %v3992_v14  ;;  %v4008_v59 = vsub.f32 %v5267_v43, %v636_v33  ;;  %v543_v27 = vpop.xlane.xlu0 %542  ;;  %v1042_v14 = vadd.f32 %v871_v12, %v870_v26  ;;  %v546_v42 = vpop.xlane.xlu1 %545  ;;  %v5274_v26 = vld [vmem:[#allocation12_spill] sm:$0xff] }
 0x139   : > { %5266 = vst [vmem:[#allocation82_spill] sm:$0xff] %v4004_v15  ;;  %v4012_v18 = vsub.f32 %v5270_v41, %v637_v40  ;;  %v4016_v19 = vsub.f32 %v5272_v51, %v637_v40  ;;  %v874_v60 = vmul.f32 %v4004_v15, %v4004_v15  ;;  %v638_v43 = vmul.f32 0.00390625, %v543_v27  ;;  %1040 = vadd.xlane.f32.xlu1 %v1039_v53 }
 0x13a   : > { %5268 = vst [vmem:[#allocation83_spill] sm:$0xff] %v4008_v59  ;;  %v875_v10 = vmul.f32 %v4008_v59, %v4008_v59  ;;  %v639_v54 = vmul.f32 0.00390625, %v546_v42  ;;  %v1045_v40 = vadd.f32 %v873_v62, %v872_v17  ;;  %1043 = vadd.xlane.f32.xlu0 %v1042_v14  ;;  %v5275_v12 = vunpack.c.l.bf16 %v5274_v26  ;;  %v5279_v59 = vld [vmem:[#allocation13_spill] sm:$0xff] }
 0x13b   : > { %5271 = vst [vmem:[#allocation11_spill] sm:$0xff] %v4012_v18  ;;  %5273 = vst [vmem:[#allocation84_spill] sm:$0xff] %v4016_v19  ;;  %v876_v45 = vmul.f32 %v4012_v18, %v4012_v18  ;;  %v877_v33 = vmul.f32 %v4016_v19, %v4016_v19  ;;  %v5277_v15 = vunpack.c.h.bf16 %v5274_v26  ;;  %v5280_v34 = vunpack.c.l.bf16 %v5279_v59 }
 0x13c   : > { %v1048_v41 = vadd.f32 %v875_v10, %v874_v60  ;;  %v4028_v51 = vsub.f32 %v5275_v12, %v638_v43  ;;  %v5282_v19 = vunpack.c.h.bf16 %v5279_v59  ;;  %v549_v53 = vpop.xlane.xlu0 %548  ;;  %v552_v17 = vpop.xlane.xlu1 %551  ;;  %v5284_v59 = vld [vmem:[#allocation14_spill] sm:$0xff] }
 0x13d   : > { %v4032_v48 = vsub.f32 %v5277_v15, %v638_v43  ;;  %v4036_v18 = vsub.f32 %v5280_v34, %v639_v54  ;;  %v640_v14 = vmul.f32 0.00390625, %v549_v53  ;;  %v641_v62 = vmul.f32 0.00390625, %v552_v17  ;;  %1046 = vadd.xlane.f32.xlu1 %v1045_v40 }
 0x13e   : > { %5276 = vst [vmem:[#allocation12_spill] sm:$0xff] %v4028_v51  ;;  %v4040_v27 = vsub.f32 %v5282_v19, %v639_v54  ;;  %v1051_v42 = vadd.f32 %v877_v33, %v876_v45  ;;  %v878_v60 = vmul.f32 %v4028_v51, %v4028_v51  ;;  %v5285_v19 = vunpack.c.l.bf16 %v5284_v59  ;;  %1049 = vadd.xlane.f32.xlu0 %v1048_v41  ;;  %v5289_v33 = vld [vmem:[#allocation15_spill] sm:$0xff] }
 0x13f   : > { %5278 = vst [vmem:[#allocation85_spill] sm:$0xff] %v4032_v48  ;;  %5281 = vst [vmem:[#allocation13_spill] sm:$0xff] %v4036_v18  ;;  %v879_v15 = vmul.f32 %v4032_v48, %v4032_v48  ;;  %v880_v10 = vmul.f32 %v4036_v18, %v4036_v18  ;;  %v5287_v54 = vunpack.c.h.bf16 %v5284_v59  ;;  %v5290_v26 = vunpack.c.l.bf16 %v5289_v33 }
 0x140   : > { %5283 = vst [vmem:[#allocation86_spill] sm:$0xff] %v4040_v27  ;;  %v881_v34 = vmul.f32 %v4040_v27, %v4040_v27  ;;  %v4052_v43 = vsub.f32 %v5285_v19, %v640_v14  ;;  %v5292_v53 = vunpack.c.h.bf16 %v5289_v33  ;;  %v555_v18 = vpop.xlane.xlu0 %554  ;;  %v558_v40 = vpop.xlane.xlu1 %557 }
 0x141   : > { %v4056_v45 = vsub.f32 %v5287_v54, %v640_v14  ;;  %v4060_v12 = vsub.f32 %v5290_v26, %v641_v62  ;;  %v1054_v27 = vadd.f32 %v879_v15, %v878_v60  ;;  %v642_v54 = vmul.f32 0.00390625, %v555_v18  ;;  %1052 = vadd.xlane.f32.xlu1 %v1051_v42  ;;  %v5294_v60 = vld [vmem:[#allocation16_spill] sm:$0xff] }
 0x142   : > { %5286 = vst [vmem:[#allocation14_spill] sm:$0xff] %v4052_v43  ;;  %v4064_v17 = vsub.f32 %v5292_v53, %v641_v62  ;;  %v882_v19 = vmul.f32 %v4052_v43, %v4052_v43  ;;  %v643_v33 = vmul.f32 0.00390625, %v558_v40  ;;  %v1057_v62 = vadd.f32 %v881_v34, %v880_v10 }
 0x143   : > { %5288 = vst [vmem:[#allocation87_spill] sm:$0xff] %v4056_v45  ;;  %5291 = vst [vmem:[#allocation15_spill] sm:$0xff] %v4060_v12  ;;  %v883_v59 = vmul.f32 %v4056_v45, %v4056_v45  ;;  %v884_v41 = vmul.f32 %v4060_v12, %v4060_v12  ;;  %1055 = vadd.xlane.f32.xlu0 %v1054_v27  ;;  %v5295_v15 = vunpack.c.l.bf16 %v5294_v60  ;;  %v5297_v43 = vunpack.c.h.bf16 %v5294_v60  ;;  %v5299_v45 = vld [vmem:[#allocation17_spill] sm:$0xff] }
 0x144   : > { %5293 = vst [vmem:[#allocation88_spill] sm:$0xff] %v4064_v17  ;;  %v885_v14 = vmul.f32 %v4064_v17, %v4064_v17  ;;  %v5300_v51 = vunpack.c.l.bf16 %v5299_v45  ;;  %v5302_v17 = vunpack.c.h.bf16 %v5299_v45  ;;  %v561_v42 = vpop.xlane.xlu0 %560  ;;  %v564_v10 = vpop.xlane.xlu1 %563  ;;  %v5304_v45 = vld [vmem:[#allocation18_spill] sm:$0xff] }
 0x145   : > { %v1060_v26 = vadd.f32 %v883_v59, %v882_v19  ;;  %v4076_v53 = vsub.f32 %v5295_v15, %v642_v54  ;;  %v4080_v48 = vsub.f32 %v5297_v43, %v642_v54  ;;  %v644_v27 = vmul.f32 0.00390625, %v561_v42  ;;  %1058 = vadd.xlane.f32.xlu1 %v1057_v62 }
 0x146   : > { %v4084_v12 = vsub.f32 %v5300_v51, %v643_v33  ;;  %v4088_v18 = vsub.f32 %v5302_v17, %v643_v33  ;;  %v645_v34 = vmul.f32 0.00390625, %v564_v10  ;;  %v1063_v40 = vadd.f32 %v885_v14, %v884_v41  ;;  %v5309_v14 = vld [vmem:[#allocation19_spill] sm:$0xff] }
 0x147   : > { %5296 = vst [vmem:[#allocation16_spill] sm:$0xff] %v4076_v53  ;;  %5298 = vst [vmem:[#allocation89_spill] sm:$0xff] %v4080_v48  ;;  %v886_v19 = vmul.f32 %v4076_v53, %v4076_v53  ;;  %v887_v43 = vmul.f32 %v4080_v48, %v4080_v48  ;;  %v5305_v17 = vunpack.c.l.bf16 %v5304_v45  ;;  %v5307_v33 = vunpack.c.h.bf16 %v5304_v45  ;;  %1061 = vadd.xlane.f32.xlu0 %v1060_v26 }
 0x148   : > { %5301 = vst [vmem:[#allocation17_spill] sm:$0xff] %v4084_v12  ;;  %5303 = vst [vmem:[#allocation90_spill] sm:$0xff] %v4088_v18  ;;  %v888_v59 = vmul.f32 %v4084_v12, %v4084_v12  ;;  %v889_v51 = vmul.f32 %v4088_v18, %v4088_v18  ;;  %v5310_v60 = vunpack.c.l.bf16 %v5309_v14  ;;  %v5312_v42 = vunpack.c.h.bf16 %v5309_v14  ;;  %v567_v12 = vpop.xlane.xlu0 %566  ;;  %v570_v62 = vpop.xlane.xlu1 %569 }
 0x149   : > { %v4100_v54 = vsub.f32 %v5305_v17, %v644_v27  ;;  %v4104_v41 = vsub.f32 %v5307_v33, %v644_v27  ;;  %v1066_v18 = vadd.f32 %v887_v43, %v886_v19  ;;  %v646_v33 = vmul.f32 0.00390625, %v567_v12  ;;  %1064 = vadd.xlane.f32.xlu1 %v1063_v40  ;;  %v5314_v19 = vld [vmem:[#allocation20_spill] sm:$0xff] }
 0x14a   : > { %v4108_v15 = vsub.f32 %v5310_v60, %v645_v34  ;;  %v4112_v10 = vsub.f32 %v5312_v42, %v645_v34  ;;  %v647_v14 = vmul.f32 0.00390625, %v570_v62  ;;  %v1069_v34 = vadd.f32 %v889_v51, %v888_v59 }
 0x14b   : > { %5306 = vst [vmem:[#allocation18_spill] sm:$0xff] %v4100_v54  ;;  %5308 = vst [vmem:[#allocation91_spill] sm:$0xff] %v4104_v41  ;;  %v890_v17 = vmul.f32 %v4100_v54, %v4100_v54  ;;  %v891_v45 = vmul.f32 %v4104_v41, %v4104_v41  ;;  %1067 = vadd.xlane.f32.xlu0 %v1066_v18  ;;  %v5315_v43 = vunpack.c.l.bf16 %v5314_v19  ;;  %v5317_v54 = vunpack.c.h.bf16 %v5314_v19  ;;  %v5319_v41 = vld [vmem:[#allocation21_spill] sm:$0xff] }
 0x14c   : > { %5311 = vst [vmem:[#allocation19_spill] sm:$0xff] %v4108_v15  ;;  %5313 = vst [vmem:[#allocation92_spill] sm:$0xff] %v4112_v10  ;;  %v892_v26 = vmul.f32 %v4108_v15, %v4108_v15  ;;  %v893_v27 = vmul.f32 %v4112_v10, %v4112_v10  ;;  %v5320_v53 = vunpack.c.l.bf16 %v5319_v41  ;;  %v5322_v10 = vunpack.c.h.bf16 %v5319_v41  ;;  %v573_v40 = vpop.xlane.xlu0 %572  ;;  %v576_v59 = vpop.xlane.xlu1 %575  ;;  %v5324_v41 = vld [vmem:[#allocation22_spill] sm:$0xff] }
 0x14d   : > { %v1072_v60 = vadd.f32 %v891_v45, %v890_v17  ;;  %v4124_v42 = vsub.f32 %v5315_v43, %v646_v33  ;;  %v4128_v48 = vsub.f32 %v5317_v54, %v646_v33  ;;  %v648_v18 = vmul.f32 0.00390625, %v573_v40  ;;  %1070 = vadd.xlane.f32.xlu1 %v1069_v34 }
 0x14e   : > { %v4132_v15 = vsub.f32 %v5320_v53, %v647_v14  ;;  %v4136_v12 = vsub.f32 %v5322_v10, %v647_v14  ;;  %v649_v51 = vmul.f32 0.00390625, %v576_v59  ;;  %v1075_v62 = vadd.f32 %v893_v27, %v892_v26  ;;  %v5329_v27 = vld [vmem:[#allocation23_spill] sm:$0xff] }
 0x14f   : > { %5316 = vst [vmem:[#allocation20_spill] sm:$0xff] %v4124_v42  ;;  %5318 = vst [vmem:[#allocation93_spill] sm:$0xff] %v4128_v48  ;;  %v894_v17 = vmul.f32 %v4124_v42, %v4124_v42  ;;  %v895_v54 = vmul.f32 %v4128_v48, %v4128_v48  ;;  %v5325_v10 = vunpack.c.l.bf16 %v5324_v41  ;;  %v5327_v14 = vunpack.c.h.bf16 %v5324_v41  ;;  %1073 = vadd.xlane.f32.xlu0 %v1072_v60 }
 0x150   : > { %5321 = vst [vmem:[#allocation21_spill] sm:$0xff] %v4132_v15  ;;  %5323 = vst [vmem:[#allocation94_spill] sm:$0xff] %v4136_v12  ;;  %v896_v45 = vmul.f32 %v4132_v15, %v4132_v15  ;;  %v897_v53 = vmul.f32 %v4136_v12, %v4136_v12  ;;  %v5330_v19 = vunpack.c.l.bf16 %v5329_v27  ;;  %v5332_v40 = vunpack.c.h.bf16 %v5329_v27  ;;  %v579_v15 = vpop.xlane.xlu0 %578  ;;  %v582_v34 = vpop.xlane.xlu1 %581 }
 0x151   : > { %v4148_v33 = vsub.f32 %v5325_v10, %v648_v18  ;;  %v4152_v26 = vsub.f32 %v5327_v14, %v648_v18  ;;  %v1078_v12 = vadd.f32 %v895_v54, %v894_v17  ;;  %v650_v14 = vmul.f32 0.00390625, %v579_v15  ;;  %1076 = vadd.xlane.f32.xlu1 %v1075_v62  ;;  %v5334_v17 = vld [vmem:[#allocation24_spill] sm:$0xff] }
 0x152   : > { %v4156_v43 = vsub.f32 %v5330_v19, %v649_v51  ;;  %v4160_v59 = vsub.f32 %v5332_v40, %v649_v51  ;;  %v651_v27 = vmul.f32 0.00390625, %v582_v34  ;;  %v1081_v51 = vadd.f32 %v897_v53, %v896_v45 }
 0x153   : > { %5326 = vst [vmem:[#allocation22_spill] sm:$0xff] %v4148_v33  ;;  %5328 = vst [vmem:[#allocation95_spill] sm:$0xff] %v4152_v26  ;;  %v898_v10 = vmul.f32 %v4148_v33, %v4148_v33  ;;  %v899_v41 = vmul.f32 %v4152_v26, %v4152_v26  ;;  %1079 = vadd.xlane.f32.xlu0 %v1078_v12  ;;  %v5335_v54 = vunpack.c.l.bf16 %v5334_v17  ;;  %v5337_v33 = vunpack.c.h.bf16 %v5334_v17  ;;  %v5339_v26 = vld [vmem:[#allocation25_spill] sm:$0xff] }
 0x154   : > { %5331 = vst [vmem:[#allocation23_spill] sm:$0xff] %v4156_v43  ;;  %5333 = vst [vmem:[#allocation96_spill] sm:$0xff] %v4160_v59  ;;  %v900_v60 = vmul.f32 %v4156_v43, %v4156_v43  ;;  %v901_v18 = vmul.f32 %v4160_v59, %v4160_v59  ;;  %v5340_v42 = vunpack.c.l.bf16 %v5339_v26  ;;  %v5342_v59 = vunpack.c.h.bf16 %v5339_v26  ;;  %v585_v62 = vpop.xlane.xlu0 %584  ;;  %v588_v45 = vpop.xlane.xlu1 %587  ;;  %v5344_v26 = vld [vmem:[#allocation26_spill] sm:$0xff] }
 0x155   : > { %v1084_v19 = vadd.f32 %v899_v41, %v898_v10  ;;  %v4172_v40 = vsub.f32 %v5335_v54, %v650_v14  ;;  %v4176_v48 = vsub.f32 %v5337_v33, %v650_v14  ;;  %v652_v12 = vmul.f32 0.00390625, %v585_v62  ;;  %1082 = vadd.xlane.f32.xlu1 %v1081_v51 }
 0x156   : > { %v4180_v43 = vsub.f32 %v5340_v42, %v651_v27  ;;  %v4184_v15 = vsub.f32 %v5342_v59, %v651_v27  ;;  %v653_v53 = vmul.f32 0.00390625, %v588_v45  ;;  %v1087_v34 = vadd.f32 %v901_v18, %v900_v60  ;;  %v5349_v18 = vld [vmem:[#allocation27_spill] sm:$0xff] }
 0x157   : > { %5336 = vst [vmem:[#allocation24_spill] sm:$0xff] %v4172_v40  ;;  %5338 = vst [vmem:[#allocation97_spill] sm:$0xff] %v4176_v48  ;;  %v902_v10 = vmul.f32 %v4172_v40, %v4172_v40  ;;  %v903_v33 = vmul.f32 %v4176_v48, %v4176_v48  ;;  %v5345_v59 = vunpack.c.l.bf16 %v5344_v26  ;;  %v5347_v27 = vunpack.c.h.bf16 %v5344_v26  ;;  %1085 = vadd.xlane.f32.xlu0 %v1084_v19 }
 0x158   : > { %5341 = vst [vmem:[#allocation25_spill] sm:$0xff] %v4180_v43  ;;  %5343 = vst [vmem:[#allocation98_spill] sm:$0xff] %v4184_v15  ;;  %v904_v41 = vmul.f32 %v4180_v43, %v4180_v43  ;;  %v905_v42 = vmul.f32 %v4184_v15, %v4184_v15  ;;  %v5350_v17 = vunpack.c.l.bf16 %v5349_v18  ;;  %v5352_v62 = vunpack.c.h.bf16 %v5349_v18 }
 0x159   : > { %v4196_v14 = vsub.f32 %v5345_v59, %v652_v12  ;;  %v4200_v60 = vsub.f32 %v5347_v27, %v652_v12  ;;  %v1090_v43 = vadd.f32 %v903_v33, %v902_v10  ;;  %1088 = vadd.xlane.f32.xlu1 %v1087_v34 }
 0x15a   : > { %v4204_v54 = vsub.f32 %v5350_v17, %v653_v53  ;;  %v4208_v45 = vsub.f32 %v5352_v62, %v653_v53  ;;  %v1093_v26 = vadd.f32 %v905_v42, %v904_v41  ;;  %v1424_v17 = vlaneseq }
 0x15b   : > { %5346 = vst [vmem:[#allocation26_spill] sm:$0xff] %v4196_v14  ;;  %5348 = vst [vmem:[#allocation99_spill] sm:$0xff] %v4200_v60  ;;  %v906_v51 = vmul.f32 %v4196_v14, %v4196_v14  ;;  %v907_v59 = vmul.f32 %v4200_v60, %v4200_v60  ;;  %1091 = vadd.xlane.f32.xlu0 %v1090_v43 }
 0x15c   : > { %5351 = vst [vmem:[#allocation27_spill] sm:$0xff] %v4204_v54  ;;  %5353 = vst [vmem:[#allocation100_spill] sm:$0xff] %v4208_v45  ;;  %v908_v12 = vmul.f32 %v4204_v54, %v4204_v54  ;;  %v909_v19 = vmul.f32 %v4208_v45, %v4208_v45  ;;  %v1425_v45 = vshrl.u32 %v1424_v17, 7 }
 0x15d   : > { %v1096_v27 = vadd.f32 %v907_v59, %v906_v51  ;;  %1094 = vadd.xlane.f32.xlu1 %v1093_v26 }
 0x15e   : > { %v1099_v53 = vadd.f32 %v909_v19, %v908_v12  ;;  %v1426_v12 = vsub.s32 0, %v1425_v45 }
 0x15f   : > { %1097 = vadd.xlane.f32.xlu0 %v1096_v27  ;;  %v1422_v27 = vld [vmem:[#allocation5] sm:$0x3] }
 0x161   : > { %1100 = vadd.xlane.f32.xlu1 %v1099_v53  ;;  %v1430_v53 = vsub.s32 1, %v1425_v45 }
 0x163   : > { %v4223_v17 = vrot.slane %v1422_v27, %v1430_v53 }
 0x16a   : > { %v912_v10 = vpop.xlane.xlu0 %911 }
 0x16b   : > { %v1102_v33 = vmul.f32 0.00390625, %v912_v10 }
 0x16d   : > { %v1166_v18 = vadd.f32 1e-05, %v1102_v33 }
 0x16e   : > { %v915_v62 = vpop.xlane.xlu1 %914  ;;  %v918_v60 = vpop.xlane.xlu0 %917 }
 0x16f   : > { %2459 = vrsqrt.f32 %v1166_v18  ;;  %v1103_v14 = vmul.f32 0.00390625, %v915_v62  ;;  %v1104_v54 = vmul.f32 0.00390625, %v918_v60 }
 0x171   : > { %v1167_v15 = vadd.f32 1e-05, %v1103_v14  ;;  %v1168_v48 = vadd.f32 1e-05, %v1104_v54  ;;  %v1562_v14 = vld [vmem:[%s4832_s2] sm:$0x3]  ;;  %v4221_v54 = vrot.slane %v1422_v27, %v1426_v12 }
 0x172   : > { %v921_v34 = vpop.xlane.xlu1 %920 }
 0x173   : > { %v924_v41 = vpop.xlane.xlu0 %923  ;;  %2461 = vrsqrt.f32 %v1167_v15  ;;  %v1105_v43 = vmul.f32 0.00390625, %v921_v34 }
 0x174   : > { %v1106_v42 = vmul.f32 0.00390625, %v924_v41  ;;  %2463 = vrsqrt.f32 %v1168_v48  ;;  %v4225_v41 = vrot.slane %v1562_v14, %v1426_v12 }
 0x175   : > { %v1169_v51 = vadd.f32 1e-05, %v1105_v43  ;;  %v4227_v43 = vrot.slane %v1562_v14, %v1430_v53 }
 0x176   : > { %v1170_v59 = vadd.f32 1e-05, %v1106_v42  ;;  %v927_v19 = vpop.xlane.xlu1 %926  ;;  %v5354_v42 = vld [vmem:[#allocation28_spill] sm:$0xff] }
 0x177   : > { %v930_v26 = vpop.xlane.xlu0 %929  ;;  %2465 = vrsqrt.f32 %v1169_v51  ;;  %v1107_v10 = vmul.f32 0.00390625, %v927_v19 }
 0x178   : > { %v1108_v33 = vmul.f32 0.00390625, %v930_v26  ;;  %2467 = vrsqrt.f32 %v1170_v59  ;;  %v5355_v59 = vld [vmem:[#allocation29_spill] sm:$0xff] }
 0x179   : > { %v1171_v60 = vadd.f32 1e-05, %v1107_v10 }
 0x17a   : > { %v1172_v15 = vadd.f32 1e-05, %v1108_v33  ;;  %v933_v48 = vpop.xlane.xlu1 %932 }
 0x17b   : > { %v936_v18 = vpop.xlane.xlu0 %935  ;;  %2469 = vrsqrt.f32 %v1171_v60  ;;  %v1109_v62 = vmul.f32 0.00390625, %v933_v48 }
 0x17c   : > { %v1110_v34 = vmul.f32 0.00390625, %v936_v18  ;;  %v2460_v45 = vpop.eup %2459  ;;  %2471 = vrsqrt.f32 %v1172_v15 }
 0x17d   : > { %v1294_v51 = vmul.f32 %v2460_v45, %v5354_v42  ;;  %v1295_v19 = vmul.f32 %v2460_v45, %v5355_v59  ;;  %v1173_v26 = vadd.f32 1e-05, %v1109_v62  ;;  %v5356_v62 = vld [vmem:[#allocation32_spill] sm:$0xff]  ;;  %v5357_v42 = vld [vmem:[#allocation30_spill] sm:$0xff] }
 0x17e   : > { %v1174_v10 = vadd.f32 1e-05, %v1110_v34  ;;  %v939_v33 = vpop.xlane.xlu1 %938 }
 0x17f   : > { %v942_v40 = vpop.xlane.xlu0 %941  ;;  %v1434_v27 = vmul.f32 %v4221_v54, %v1294_v51  ;;  %v1435_v60 = vmul.f32 %v4223_v17, %v1295_v19  ;;  %2473 = vrsqrt.f32 %v1173_v26  ;;  %v1111_v48 = vmul.f32 0.00390625, %v939_v33 }
 0x180   : > { %v2462_v18 = vpop.eup %2461  ;;  %2475 = vrsqrt.f32 %v1174_v10  ;;  %v1112_v12 = vmul.f32 0.00390625, %v942_v40 }
 0x181   : > { %v2464_v53 = vpop.eup %2463  ;;  %v1574_v14 = vadd.f32 %v4225_v41, %v1434_v27  ;;  %v1575_v15 = vadd.f32 %v4227_v43, %v1435_v60  ;;  %v1296_v45 = vmul.f32 %v2462_v18, %v3476_v4  ;;  %v1297_v34 = vmul.f32 %v2462_v18, %v5356_v62 }
 0x182   : > { %v1298_v59 = vmul.f32 %v2464_v53, %v5357_v42  ;;  %v1299_v51 = vmul.f32 %v2464_v53, %v5358_v21  ;;  %v1175_v19 = vadd.f32 1e-05, %v1111_v48  ;;  %v1176_v26 = vadd.f32 1e-05, %v1112_v12  ;;  %v945_v33 = vpop.xlane.xlu1 %944  ;;  %v5359_v12 = vld [vmem:[#allocation33_spill] sm:$0xff] }
 0x183   : > { %v948_v61 = vpop.xlane.xlu0 %947  ;;  %v2332_v10 = vpack.c.bf16 %v1575_v15, %v1574_v14  ;;  %v1436_v40 = vmul.f32 %v4221_v54, %v1296_v45  ;;  %v1437_v27 = vmul.f32 %v4223_v17, %v1297_v34  ;;  %v1113_v57 = vmul.f32 0.00390625, %v945_v33  ;;  %v5360_v14 = vld [vmem:[#allocation34_spill] sm:$0xff] }
 0x184   : > { %v2466_v60 = vpop.eup %2465  ;;  %v1438_v4 = vmul.f32 %v4221_v54, %v1298_v59  ;;  %v1439_v18 = vmul.f32 %v4223_v17, %v1299_v51  ;;  %2477 = vrsqrt.f32 %v1175_v19  ;;  %v1114_v62 = vmul.f32 0.00390625, %v948_v61 }
 0x185   : > { %v2468_v42 = vpop.eup %2467  ;;  %2086 = vst [vmem:[%s4245_s4] sm:$0xff] %v2332_v10  ;;  %v1576_v21 = vadd.f32 %v4225_v41, %v1436_v40  ;;  %v1577_v48 = vadd.f32 %v4227_v43, %v1437_v27  ;;  %v1300_v53 = vmul.f32 %v2466_v60, %v5359_v12  ;;  %v1301_v15 = vmul.f32 %v2466_v60, %v5360_v14 }
 0x186   : > { %v1578_v45 = vadd.f32 %v4225_v41, %v1438_v4  ;;  %v1579_v34 = vadd.f32 %v4227_v43, %v1439_v18  ;;  %v1302_v61 = vmul.f32 %v2468_v42, %v3500_v9  ;;  %v1303_v59 = vmul.f32 %v2468_v42, %v3504_v56  ;;  %v951_v51 = vpop.xlane.xlu1 %950  ;;  %v5361_v42 = vld [vmem:[#allocation35_spill] sm:$0xff] }
 0x187   : > { %v954_v19 = vpop.xlane.xlu0 %953  ;;  %v2333_v33 = vpack.c.bf16 %v1577_v48, %v1576_v21  ;;  %v1440_v10 = vmul.f32 %v4221_v54, %v1300_v53  ;;  %v1441_v40 = vmul.f32 %v4223_v17, %v1301_v15  ;;  %2479 = vrsqrt.f32 %v1176_v26  ;;  %v5362_v48 = vld [vmem:[#allocation36_spill] sm:$0xff] }
 0x188   : > { %v2470_v27 = vpop.eup %2469  ;;  %v2334_v60 = vpack.c.bf16 %v1579_v34, %v1578_v45  ;;  %v1442_v4 = vmul.f32 %v4221_v54, %v1302_v61  ;;  %v1443_v12 = vmul.f32 %v4223_v17, %v1303_v59  ;;  %v1177_v18 = vadd.f32 1e-05, %v1113_v57 }
 0x189   : > { %v2472_v14 = vpop.eup %2471  ;;  %2087 = vst [vmem:[%s4245_s4 + $0x8] sm:$0xff] %v2333_v33  ;;  %v1580_v9 = vadd.f32 %v4225_v41, %v1440_v10  ;;  %v1581_v56 = vadd.f32 %v4227_v43, %v1441_v40  ;;  %v1304_v21 = vmul.f32 %v2470_v27, %v5361_v42  ;;  %v1305_v53 = vmul.f32 %v2470_v27, %v5362_v48 }
 0x18a   : > { %2088 = vst [vmem:[%s4245_s4 + $0x10] sm:$0xff] %v2334_v60  ;;  %v1582_v26 = vadd.f32 %v4225_v41, %v1442_v4  ;;  %v1583_v15 = vadd.f32 %v4227_v43, %v1443_v12  ;;  %v1306_v45 = vmul.f32 %v2472_v14, %v3524_v1  ;;  %v1307_v57 = vmul.f32 %v2472_v14, %v3528_v2  ;;  %v957_v34 = vpop.xlane.xlu1 %956  ;;  %v5363_v14 = vld [vmem:[#allocation37_spill] sm:$0xff] }
 0x18b   : > { %v960_v61 = vpop.xlane.xlu0 %959  ;;  %v2335_v59 = vpack.c.bf16 %v1581_v56, %v1580_v9  ;;  %v1444_v33 = vmul.f32 %v4221_v54, %v1304_v21  ;;  %v1445_v10 = vmul.f32 %v4223_v17, %v1305_v53  ;;  %2481 = vrsqrt.f32 %v1177_v18  ;;  %v5364_v56 = vld [vmem:[#allocation38_spill] sm:$0xff] }
 0x18c   : > { %v2474_v40 = vpop.eup %2473  ;;  %v2336_v27 = vpack.c.bf16 %v1583_v15, %v1582_v26  ;;  %v1446_v60 = vmul.f32 %v4221_v54, %v1306_v45  ;;  %v1447_v4 = vmul.f32 %v4223_v17, %v1307_v57  ;;  %v1178_v12 = vadd.f32 1e-05, %v1114_v62 }
 0x18d   : > { %v2476_v42 = vpop.eup %2475  ;;  %2089 = vst [vmem:[%s4245_s4 + $0x18] sm:$0xff] %v2335_v59  ;;  %v1584_v1 = vadd.f32 %v4225_v41, %v1444_v33  ;;  %v1585_v2 = vadd.f32 %v4227_v43, %v1445_v10  ;;  %v1308_v9 = vmul.f32 %v2474_v40, %v5363_v14  ;;  %v1309_v21 = vmul.f32 %v2474_v40, %v5364_v56 }
 0x18e   : > { %2090 = vst [vmem:[%s4245_s4 + $0x20] sm:$0xff] %v2336_v27  ;;  %v1586_v18 = vadd.f32 %v4225_v41, %v1446_v60  ;;  %v1587_v48 = vadd.f32 %v4227_v43, %v1447_v4  ;;  %v1310_v53 = vmul.f32 %v2476_v42, %v3548_v32  ;;  %v1311_v62 = vmul.f32 %v2476_v42, %v3552_v3  ;;  %v963_v26 = vpop.xlane.xlu1 %962 }
 0x18f   : > { %v966_v15 = vpop.xlane.xlu0 %965  ;;  %v2337_v45 = vpack.c.bf16 %v1585_v2, %v1584_v1  ;;  %v1448_v57 = vmul.f32 %v4221_v54, %v1308_v9  ;;  %v1449_v59 = vmul.f32 %v4223_v17, %v1309_v21  ;;  %2483 = vrsqrt.f32 %v1178_v12  ;;  %v5365_v2 = vld [vmem:[#allocation39_spill] sm:$0xff]  ;;  %v5366_v9 = vld [vmem:[#allocation40_spill] sm:$0xff] }
 0x190   : > { %v2338_v33 = vpack.c.bf16 %v1587_v48, %v1586_v18  ;;  %v1450_v10 = vmul.f32 %v4221_v54, %v1310_v53  ;;  %v1451_v40 = vmul.f32 %v4223_v17, %v1311_v62  ;;  %v1115_v27 = vmul.f32 0.00390625, %v951_v51 }
 0x191   : > { %v2478_v60 = vpop.eup %2477  ;;  %2091 = vst [vmem:[%s4245_s4 + $0x28] sm:$0xff] %v2337_v45  ;;  %v1588_v32 = vadd.f32 %v4225_v41, %v1448_v57  ;;  %v1589_v3 = vadd.f32 %v4227_v43, %v1449_v59  ;;  %v1116_v4 = vmul.f32 0.00390625, %v954_v19  ;;  %v1117_v42 = vmul.f32 0.00390625, %v957_v34 }
 0x192   : > { %2092 = vst [vmem:[%s4245_s4 + $0x30] sm:$0xff] %v2338_v33  ;;  %v1590_v1 = vadd.f32 %v4225_v41, %v1450_v10  ;;  %v1591_v12 = vadd.f32 %v4227_v43, %v1451_v40  ;;  %v1312_v14 = vmul.f32 %v2478_v60, %v5365_v2  ;;  %v1313_v56 = vmul.f32 %v2478_v60, %v5366_v9  ;;  %v969_v21 = vpop.xlane.xlu1 %968  ;;  %v5367_v9 = vld [vmem:[#allocation41_spill] sm:$0xff] }
 0x193   : > { %v972_v51 = vpop.xlane.xlu0 %971  ;;  %v2339_v18 = vpack.c.bf16 %v1589_v3, %v1588_v32  ;;  %v1179_v48 = vadd.f32 1e-05, %v1115_v27  ;;  %v1180_v53 = vadd.f32 1e-05, %v1116_v4  ;;  %v1181_v62 = vadd.f32 1e-05, %v1117_v42 }
 0x194   : > { %v2480_v45 = vpop.eup %2479  ;;  %v2340_v19 = vpack.c.bf16 %v1591_v12, %v1590_v1  ;;  %v1452_v34 = vmul.f32 %v4221_v54, %v1312_v14  ;;  %v1453_v57 = vmul.f32 %v4223_v17, %v1313_v56  ;;  %v1118_v59 = vmul.f32 0.00390625, %v960_v61 }
 0x195   : > { %2093 = vst [vmem:[%s4245_s4 + $0x38] sm:$0xff] %v2339_v18  ;;  %v1314_v33 = vmul.f32 %v2480_v45, %v3572_v44  ;;  %v1315_v10 = vmul.f32 %v2480_v45, %v3576_v5  ;;  %2485 = vrsqrt.f32 %v1179_v48  ;;  %v1119_v40 = vmul.f32 0.00390625, %v963_v26  ;;  %v5368_v18 = vld [vmem:[#allocation42_spill] sm:$0xff] }
 0x196   : > { %2094 = vst [vmem:[%s4245_s4 + $0x40] sm:$0xff] %v2340_v19  ;;  %v1592_v60 = vadd.f32 %v4225_v41, %v1452_v34  ;;  %v1593_v27 = vadd.f32 %v4227_v43, %v1453_v57  ;;  %2487 = vrsqrt.f32 %v1180_v53  ;;  %v1182_v32 = vadd.f32 1e-05, %v1118_v59  ;;  %v975_v3 = vpop.xlane.xlu1 %974 }
 0x197   : > { %v978_v4 = vpop.xlane.xlu0 %977  ;;  %v1454_v42 = vmul.f32 %v4221_v54, %v1314_v33  ;;  %v1455_v61 = vmul.f32 %v4223_v17, %v1315_v10  ;;  %2489 = vrsqrt.f32 %v1181_v62  ;;  %v1183_v44 = vadd.f32 1e-05, %v1119_v40 }
 0x198   : > { %v2482_v1 = vpop.eup %2481  ;;  %v2341_v5 = vpack.c.bf16 %v1593_v27, %v1592_v60  ;;  %2491 = vrsqrt.f32 %v1182_v32  ;;  %v1120_v26 = vmul.f32 0.00390625, %v966_v15  ;;  %v1121_v12 = vmul.f32 0.00390625, %v969_v21 }
 0x199   : > { %v1594_v2 = vadd.f32 %v4225_v41, %v1454_v42  ;;  %v1595_v14 = vadd.f32 %v4227_v43, %v1455_v61  ;;  %v1316_v56 = vmul.f32 %v2482_v1, %v5367_v9  ;;  %v1317_v48 = vmul.f32 %v2482_v1, %v5368_v18 }
 0x19a   : > { %2095 = vst [vmem:[%s4245_s4 + $0x48] sm:$0xff] %v2341_v5  ;;  %2493 = vrsqrt.f32 %v1183_v44  ;;  %v1184_v53 = vadd.f32 1e-05, %v1120_v26  ;;  %v1185_v45 = vadd.f32 1e-05, %v1121_v12  ;;  %v1122_v62 = vmul.f32 0.00390625, %v972_v51  ;;  %v981_v19 = vpop.xlane.xlu1 %980 }
 0x19b   : > { %v984_v34 = vpop.xlane.xlu0 %983  ;;  %v2342_v57 = vpack.c.bf16 %v1595_v14, %v1594_v2  ;;  %v1456_v15 = vmul.f32 %v4221_v54, %v1316_v56  ;;  %v1457_v21 = vmul.f32 %v4223_v17, %v1317_v48  ;;  %v1123_v59 = vmul.f32 0.00390625, %v975_v3 }
 0x19c   : > { %v2484_v33 = vpop.eup %2483  ;;  %2495 = vrsqrt.f32 %v1184_v53  ;;  %v1186_v10 = vadd.f32 1e-05, %v1122_v62  ;;  %v1124_v40 = vmul.f32 0.00390625, %v978_v4  ;;  %v1125_v60 = vmul.f32 0.00390625, %v981_v19 }
 0x19d   : > { %2096 = vst [vmem:[%s4245_s4 + $0x50] sm:$0xff] %v2342_v57  ;;  %v1596_v27 = vadd.f32 %v4225_v41, %v1456_v15  ;;  %v1597_v32 = vadd.f32 %v4227_v43, %v1457_v21  ;;  %v1318_v51 = vmul.f32 %v2484_v33, %v3596_v16  ;;  %v1319_v42 = vmul.f32 %v2484_v33, %v3600_v52  ;;  %v5369_v57 = vld [vmem:[#allocation43_spill] sm:$0xff]  ;;  %v5370_v21 = vld [vmem:[#allocation44_spill] sm:$0xff] }
 0x19e   : > { %2497 = vrsqrt.f32 %v1185_v45  ;;  %v1187_v61 = vadd.f32 1e-05, %v1123_v59  ;;  %v1188_v44 = vadd.f32 1e-05, %v1124_v40  ;;  %v1189_v1 = vadd.f32 1e-05, %v1125_v60  ;;  %v987_v3 = vpop.xlane.xlu1 %986 }
 0x19f   : > { %v990_v5 = vpop.xlane.xlu0 %989  ;;  %v2343_v26 = vpack.c.bf16 %v1597_v32, %v1596_v27  ;;  %v1458_v4 = vmul.f32 %v4221_v54, %v1318_v51  ;;  %v1459_v12 = vmul.f32 %v4223_v17, %v1319_v42  ;;  %2499 = vrsqrt.f32 %v1186_v10 }
 0x1a0   : > { %2501 = vrsqrt.f32 %v1187_v61  ;;  %v1126_v2 = vmul.f32 0.00390625, %v984_v34  ;;  %v1127_v14 = vmul.f32 0.00390625, %v987_v3  ;;  %v1128_v9 = vmul.f32 0.00390625, %v990_v5  ;;  %v5371_v61 = vld [vmem:[#allocation45_spill] sm:$0xff] }
 0x1a1   : > { %2097 = vst [vmem:[%s4245_s4 + $0x58] sm:$0xff] %v2343_v26  ;;  %v1598_v16 = vadd.f32 %v4225_v41, %v1458_v4  ;;  %v1599_v52 = vadd.f32 %v4227_v43, %v1459_v12  ;;  %2503 = vrsqrt.f32 %v1188_v44 }
 0x1a2   : > { %v2486_v56 = vpop.eup %2485  ;;  %2505 = vrsqrt.f32 %v1189_v1  ;;  %v1190_v18 = vadd.f32 1e-05, %v1126_v2  ;;  %v4323_v48 = vadd.f32 1e-05, %v1127_v14  ;;  %v4325_v53 = vadd.f32 1e-05, %v1128_v9  ;;  %v993_v45 = vpop.xlane.xlu1 %992 }
 0x1a3   : > { %v996_v62 = vpop.xlane.xlu0 %995  ;;  %v2488_v19 = vpop.eup %2487  ;;  %v2344_v34 = vpack.c.bf16 %v1599_v52, %v1598_v16  ;;  %v1320_v15 = vmul.f32 %v2486_v56, %v5369_v57  ;;  %v1321_v59 = vmul.f32 %v2486_v56, %v5370_v21  ;;  %v4329_v33 = vmul.f32 0.00390625, %v993_v45  ;;  %v5372_v1 = vld [vmem:[#allocation46_spill] sm:$0xff]  ;;  %v5373_v57 = vld [vmem:[#allocation47_spill] sm:$0xff] }
 0x1a4   : > { %v2490_v10 = vpop.eup %2489  ;;  %v1322_v40 = vmul.f32 %v2488_v19, %v3620_v0  ;;  %v1323_v60 = vmul.f32 %v2488_v19, %v3624_v25  ;;  %2507 = vrsqrt.f32 %v1190_v18  ;;  %v4333_v27 = vmul.f32 0.00390625, %v996_v62 }
 0x1a5   : > { %v2492_v32 = vpop.eup %2491  ;;  %2098 = vst [vmem:[%s4245_s4 + $0x60] sm:$0xff] %v2344_v34  ;;  %v1460_v51 = vmul.f32 %v4221_v54, %v1320_v15  ;;  %v1461_v42 = vmul.f32 %v4223_v17, %v1321_v59  ;;  %v1324_v44 = vmul.f32 %v2490_v10, %v5371_v61  ;;  %v1325_v3 = vmul.f32 %v2490_v10, %v5372_v1 }
 0x1a6   : > { %v1462_v5 = vmul.f32 %v4221_v54, %v1322_v40  ;;  %v1463_v26 = vmul.f32 %v4223_v17, %v1323_v60  ;;  %v1326_v0 = vmul.f32 %v2492_v32, %v3644_v11  ;;  %v1327_v25 = vmul.f32 %v2492_v32, %v3648_v28  ;;  %v4344_v4 = vpop.xlane.xlu1 %998  ;;  %v5374_v40 = vld [vmem:[#allocation48_spill] sm:$0xff] }
 0x1a7   : > { %v4346_v12 = vpop.xlane.xlu0 %1001  ;;  %v2494_v2 = vpop.eup %2493  ;;  %v1600_v14 = vadd.f32 %v4225_v41, %v1460_v51  ;;  %v1601_v9 = vadd.f32 %v4227_v43, %v1461_v42  ;;  %v1464_v16 = vmul.f32 %v4221_v54, %v1324_v44  ;;  %v1465_v52 = vmul.f32 %v4223_v17, %v1325_v3 }
 0x1a8   : > { %v1602_v56 = vadd.f32 %v4225_v41, %v1462_v5  ;;  %v1603_v11 = vadd.f32 %v4227_v43, %v1463_v26  ;;  %v1466_v28 = vmul.f32 %v4221_v54, %v1326_v0  ;;  %v1467_v18 = vmul.f32 %v4223_v17, %v1327_v25  ;;  %v5375_v25 = vld [vmem:[#allocation49_spill] sm:$0xff] }
 0x1a9   : > { %v2496_v45 = vpop.eup %2495  ;;  %v2345_v62 = vpack.c.bf16 %v1601_v9, %v1600_v14  ;;  %v1604_v19 = vadd.f32 %v4225_v41, %v1464_v16  ;;  %v1605_v34 = vadd.f32 %v4227_v43, %v1465_v52  ;;  %v1328_v15 = vmul.f32 %v2494_v2, %v5373_v57  ;;  %v5376_v14 = vld [vmem:[#allocation50_spill] sm:$0xff] }
 0x1aa   : > { %v2346_v21 = vpack.c.bf16 %v1603_v11, %v1602_v56  ;;  %v1606_v59 = vadd.f32 %v4225_v41, %v1466_v28  ;;  %v1607_v10 = vadd.f32 %v4227_v43, %v1467_v18  ;;  %v1329_v60 = vmul.f32 %v2494_v2, %v5374_v40  ;;  %v4362_v32 = vpop.xlane.xlu1 %1004 }
 0x1ab   : > { %v4364_v51 = vpop.xlane.xlu0 %1007  ;;  %v2498_v42 = vpop.eup %2497  ;;  %2099 = vst [vmem:[%s4245_s4 + $0x68] sm:$0xff] %v2345_v62  ;;  %v2347_v61 = vpack.c.bf16 %v1605_v34, %v1604_v19  ;;  %v1468_v44 = vmul.f32 %v4221_v54, %v1328_v15  ;;  %v1330_v1 = vmul.f32 %v2496_v45, %v3668_v7  ;;  %v1331_v3 = vmul.f32 %v2496_v45, %v3672_v20 }
 0x1ac   : > { %v2500_v5 = vpop.eup %2499  ;;  %2100 = vst [vmem:[%s4245_s4 + $0x70] sm:$0xff] %v2346_v21  ;;  %v2348_v26 = vpack.c.bf16 %v1607_v10, %v1606_v59  ;;  %v1469_v0 = vmul.f32 %v4223_v17, %v1329_v60  ;;  %v1332_v2 = vmul.f32 %v2498_v42, %v5375_v25  ;;  %v1333_v9 = vmul.f32 %v2498_v42, %v5376_v14  ;;  %v5377_v21 = vld [vmem:[#allocation51_spill] sm:$0xff] }
 0x1ad   : > { %v2502_v16 = vpop.eup %2501  ;;  %2101 = vst [vmem:[%s4245_s4 + $0x78] sm:$0xff] %v2347_v61  ;;  %v1608_v52 = vadd.f32 %v4225_v41, %v1468_v44  ;;  %v1470_v56 = vmul.f32 %v4221_v54, %v1330_v1  ;;  %v1471_v11 = vmul.f32 %v4223_v17, %v1331_v3  ;;  %v1334_v7 = vmul.f32 %v2500_v5, %v3692_v13  ;;  %v5378_v3 = vld [vmem:[#allocation52_spill] sm:$0xff] }
 0x1ae   : > { %v2504_v20 = vpop.eup %2503  ;;  %2102 = vst [vmem:[%s4245_s4 + $0x80] sm:$0xff] %v2348_v26  ;;  %v1609_v28 = vadd.f32 %v4227_v43, %v1469_v0  ;;  %v1472_v18 = vmul.f32 %v4221_v54, %v1332_v2  ;;  %v1473_v45 = vmul.f32 %v4223_v17, %v1333_v9  ;;  %v1335_v62 = vmul.f32 %v2500_v5, %v3696_v6  ;;  %v4384_v19 = vpop.xlane.xlu1 %1010 }
 0x1af   : > { %v2506_v34 = vpop.eup %2505  ;;  %v1610_v57 = vadd.f32 %v4225_v41, %v1470_v56  ;;  %v1611_v15 = vadd.f32 %v4227_v43, %v1471_v11  ;;  %v1474_v13 = vmul.f32 %v4221_v54, %v1334_v7  ;;  %v1336_v59 = vmul.f32 %v2502_v16, %v5377_v21  ;;  %v4390_v10 = vpop.xlane.xlu0 %1013  ;;  %v5379_v11 = vld [vmem:[#allocation53_spill] sm:$0xff] }
 0x1b0   : > { %v2349_v40 = vpack.c.bf16 %v1609_v28, %v1608_v52  ;;  %v1612_v60 = vadd.f32 %v4225_v41, %v1472_v18  ;;  %v1613_v6 = vadd.f32 %v4227_v43, %v1473_v45  ;;  %v1475_v42 = vmul.f32 %v4223_v17, %v1335_v62 }
 0x1b1   : > { %v2508_v61 = vpop.eup %2507  ;;  %v2350_v44 = vpack.c.bf16 %v1611_v15, %v1610_v57  ;;  %v1614_v1 = vadd.f32 %v4225_v41, %v1474_v13  ;;  %v1337_v5 = vmul.f32 %v2502_v16, %v5378_v3  ;;  %v1476_v26 = vmul.f32 %v4221_v54, %v1336_v59  ;;  %v5380_v16 = vld [vmem:[#allocation54_spill] sm:$0xff] }
 0x1b2   : > { %2103 = vst [vmem:[%s4245_s4 + $0x88] sm:$0xff] %v2349_v40  ;;  %v2351_v0 = vpack.c.bf16 %v1613_v6, %v1612_v60  ;;  %v1615_v25 = vadd.f32 %v4227_v43, %v1475_v42  ;;  %v1338_v2 = vmul.f32 %v2504_v20, %v3716_v23  ;;  %v1339_v14 = vmul.f32 %v2504_v20, %v3720_v36  ;;  %v1017_v9 = vpop.xlane.xlu1 %1016 }
 0x1b3   : > { %2104 = vst [vmem:[%s4245_s4 + $0x90] sm:$0xff] %v2350_v44  ;;  %v1477_v52 = vmul.f32 %v4223_v17, %v1337_v5  ;;  %v1616_v56 = vadd.f32 %v4225_v41, %v1476_v26  ;;  %v1340_v7 = vmul.f32 %v2506_v34, %v5379_v11  ;;  %v1341_v28 = vmul.f32 %v2506_v34, %v5380_v16  ;;  %v1020_v18 = vpop.xlane.xlu0 %1019 }
 0x1b4   : > { %2105 = vst [vmem:[%s4245_s4 + $0x98] sm:$0xff] %v2351_v0  ;;  %v2352_v45 = vpack.c.bf16 %v1615_v25, %v1614_v1  ;;  %v1478_v62 = vmul.f32 %v4221_v54, %v1338_v2  ;;  %v1479_v23 = vmul.f32 %v4223_v17, %v1339_v14  ;;  %v1342_v36 = vmul.f32 %v2508_v61, %v3740_v31 }
 0x1b5   : > { %v1617_v20 = vadd.f32 %v4227_v43, %v1477_v52  ;;  %v1480_v57 = vmul.f32 %v4221_v54, %v1340_v7  ;;  %v1481_v15 = vmul.f32 %v4223_v17, %v1341_v28  ;;  %v1343_v13 = vmul.f32 %v2508_v61, %v3744_v8 }
 0x1b6   : > { %2106 = vst [vmem:[%s4245_s4 + $0xa0] sm:$0xff] %v2352_v45  ;;  %v1618_v34 = vadd.f32 %v4225_v41, %v1478_v62  ;;  %v1619_v21 = vadd.f32 %v4227_v43, %v1479_v23  ;;  %v1482_v59 = vmul.f32 %v4221_v54, %v1342_v36  ;;  %2509 = vrsqrt.f32 %v4323_v48  ;;  %v1023_v31 = vpop.xlane.xlu1 %1022 }
 0x1b7   : > { %v2353_v40 = vpack.c.bf16 %v1617_v20, %v1616_v56  ;;  %v1620_v60 = vadd.f32 %v4225_v41, %v1480_v57  ;;  %v1621_v6 = vadd.f32 %v4227_v43, %v1481_v15  ;;  %v1483_v42 = vmul.f32 %v4223_v17, %v1343_v13  ;;  %v1026_v8 = vpop.xlane.xlu0 %1025 }
 0x1b8   : > { %v2354_v61 = vpack.c.bf16 %v1619_v21, %v1618_v34  ;;  %v1622_v44 = vadd.f32 %v4225_v41, %v1482_v59  ;;  %2511 = vrsqrt.f32 %v4325_v53  ;;  %v1193_v1 = vadd.f32 1e-05, %v4329_v33 }
 0x1b9   : > { %2107 = vst [vmem:[%s4245_s4 + $0xa8] sm:$0xff] %v2353_v40  ;;  %v2355_v48 = vpack.c.bf16 %v1621_v6, %v1620_v60  ;;  %v1623_v3 = vadd.f32 %v4227_v43, %v1483_v42  ;;  %v1194_v5 = vadd.f32 1e-05, %v4333_v27  ;;  %v1131_v26 = vmul.f32 0.00390625, %v4344_v4  ;;  %v5381_v40 = vld [vmem:[#allocation55_spill] sm:$0xff]  ;;  %v5382_v6 = vld [vmem:[#allocation56_spill] sm:$0xff] }
 0x1ba   : > { %2108 = vst [vmem:[%s4245_s4 + $0xb0] sm:$0xff] %v2354_v61  ;;  %2513 = vrsqrt.f32 %v1193_v1  ;;  %v1132_v0 = vmul.f32 0.00390625, %v4346_v12  ;;  %v1133_v25 = vmul.f32 0.00390625, %v4362_v32  ;;  %v1134_v2 = vmul.f32 0.00390625, %v4364_v51  ;;  %v1029_v53 = vpop.xlane.xlu1 %1028 }
 0x1bb   : > { %2109 = vst [vmem:[%s4245_s4 + $0xb8] sm:$0xff] %v2355_v48  ;;  %v2356_v33 = vpack.c.bf16 %v1623_v3, %v1622_v44  ;;  %2515 = vrsqrt.f32 %v1194_v5  ;;  %v1195_v14 = vadd.f32 1e-05, %v1131_v26  ;;  %v1135_v52 = vmul.f32 0.00390625, %v4384_v19  ;;  %v1032_v56 = vpop.xlane.xlu0 %1031 }
 0x1bc   : > { %v1196_v27 = vadd.f32 1e-05, %v1132_v0  ;;  %v1197_v11 = vadd.f32 1e-05, %v1133_v25  ;;  %v1198_v4 = vadd.f32 1e-05, %v1134_v2 }
 0x1bd   : > { %2110 = vst [vmem:[%s4245_s4 + $0xc0] sm:$0xff] %v2356_v33  ;;  %2517 = vrsqrt.f32 %v1195_v14  ;;  %v1199_v7 = vadd.f32 1e-05, %v1135_v52  ;;  %v1136_v12 = vmul.f32 0.00390625, %v4390_v10  ;;  %v1137_v16 = vmul.f32 0.00390625, %v1017_v9 }
 0x1be   : > { %2519 = vrsqrt.f32 %v1196_v27  ;;  %v1138_v32 = vmul.f32 0.00390625, %v1020_v18  ;;  %v1139_v51 = vmul.f32 0.00390625, %v1023_v31  ;;  %v1140_v28 = vmul.f32 0.00390625, %v1026_v8  ;;  %v1035_v45 = vpop.xlane.xlu1 %1034 }
 0x1bf   : > { %2521 = vrsqrt.f32 %v1197_v11  ;;  %v1200_v62 = vadd.f32 1e-05, %v1136_v12  ;;  %v1201_v23 = vadd.f32 1e-05, %v1137_v16  ;;  %v1141_v36 = vmul.f32 0.00390625, %v1029_v53  ;;  %v1038_v19 = vpop.xlane.xlu0 %1037  ;;  %v5384_v12 = vld [vmem:[#allocation58_spill] sm:$0xff] }
 0x1c0   : > { %2523 = vrsqrt.f32 %v1198_v4  ;;  %v1202_v20 = vadd.f32 1e-05, %v1138_v32  ;;  %v1203_v57 = vadd.f32 1e-05, %v1139_v51  ;;  %v1142_v15 = vmul.f32 0.00390625, %v1032_v56  ;;  %v5383_v4 = vld [vmem:[#allocation57_spill] sm:$0xff] }
 0x1c1   : > { %2525 = vrsqrt.f32 %v1199_v7  ;;  %v1143_v13 = vmul.f32 0.00390625, %v1035_v45  ;;  %v1144_v34 = vmul.f32 0.00390625, %v1038_v19  ;;  %v1204_v18 = vadd.f32 1e-05, %v1140_v28 }
 0x1c2   : > { %2527 = vrsqrt.f32 %v1200_v62  ;;  %v1041_v10 = vpop.xlane.xlu1 %1040  ;;  %v1205_v21 = vadd.f32 1e-05, %v1141_v36  ;;  %v4440_v8 = vadd.f32 1e-05, %v1142_v15 }
 0x1c3   : > { %v2510_v9 = vpop.eup %2509  ;;  %2529 = vrsqrt.f32 %v1201_v23  ;;  %v1145_v59 = vmul.f32 0.00390625, %v1041_v10  ;;  %v1044_v31 = vpop.xlane.xlu0 %1043  ;;  %v4442_v44 = vadd.f32 1e-05, %v1143_v13  ;;  %v4444_v1 = vadd.f32 1e-05, %v1144_v34  ;;  %v5385_v10 = vld [vmem:[#allocation59_spill] sm:$0xff] }
 0x1c4   : > { %v1344_v60 = vmul.f32 %v2510_v9, %v5381_v40  ;;  %v1345_v42 = vmul.f32 %v2510_v9, %v5382_v6  ;;  %2531 = vrsqrt.f32 %v1202_v20  ;;  %v1146_v48 = vmul.f32 0.00390625, %v1044_v31 }
 0x1c5   : > { %v2512_v61 = vpop.eup %2511  ;;  %2533 = vrsqrt.f32 %v1203_v57  ;;  %v4450_v53 = vadd.f32 1e-05, %v1145_v59 }
 0x1c6   : > { %v1484_v3 = vmul.f32 %v4221_v54, %v1344_v60  ;;  %v1485_v5 = vmul.f32 %v4223_v17, %v1345_v42  ;;  %v1346_v26 = vmul.f32 %v2512_v61, %v3764_v39  ;;  %v1347_v0 = vmul.f32 %v2512_v61, %v3768_v22  ;;  %v1047_v25 = vpop.xlane.xlu1 %1046 }
 0x1c7   : > { %v2514_v2 = vpop.eup %2513  ;;  %2535 = vrsqrt.f32 %v1204_v18  ;;  %v4452_v33 = vadd.f32 1e-05, %v1146_v48  ;;  %v4454_v14 = vmul.f32 0.00390625, %v1047_v25  ;;  %v4456_v52 = vpop.xlane.xlu0 %1049  ;;  %v5386_v18 = vld [vmem:[#allocation60_spill] sm:$0xff] }
 0x1c8   : > { %v2516_v56 = vpop.eup %2515  ;;  %v1624_v27 = vadd.f32 %v4225_v41, %v1484_v3  ;;  %v1625_v11 = vadd.f32 %v4227_v43, %v1485_v5  ;;  %v1486_v39 = vmul.f32 %v4221_v54, %v1346_v26  ;;  %v1487_v22 = vmul.f32 %v4223_v17, %v1347_v0 }
 0x1c9   : > { %v1348_v7 = vmul.f32 %v2514_v2, %v5383_v4  ;;  %v1349_v16 = vmul.f32 %v2514_v2, %v5384_v12  ;;  %v1350_v32 = vmul.f32 %v2516_v56, %v3788_v47  ;;  %v1351_v51 = vmul.f32 %v2516_v56, %v3792_v30  ;;  %v5387_v56 = vld [vmem:[#allocation61_spill] sm:$0xff] }
 0x1ca   : > { %v2518_v28 = vpop.eup %2517  ;;  %v2357_v45 = vpack.c.bf16 %v1625_v11, %v1624_v27  ;;  %v1626_v62 = vadd.f32 %v4225_v41, %v1486_v39  ;;  %v1627_v23 = vadd.f32 %v4227_v43, %v1487_v22  ;;  %2537 = vrsqrt.f32 %v1205_v21  ;;  %v4468_v36 = vpop.xlane.xlu1 %1052  ;;  %v5388_v11 = vld [vmem:[#allocation62_spill] sm:$0xff] }
 0x1cb   : > { %v2520_v19 = vpop.eup %2519  ;;  %v1488_v20 = vmul.f32 %v4221_v54, %v1348_v7  ;;  %v1489_v57 = vmul.f32 %v4223_v17, %v1349_v16  ;;  %v1490_v15 = vmul.f32 %v4221_v54, %v1350_v32  ;;  %v1491_v47 = vmul.f32 %v4223_v17, %v1351_v51 }
 0x1cc   : > { %v4474_v30 = vpop.xlane.xlu0 %1055  ;;  %v2522_v13 = vpop.eup %2521  ;;  %2111 = vst [vmem:[%s4245_s4 + $0xc8] sm:$0xff] %v2357_v45  ;;  %v2358_v34 = vpack.c.bf16 %v1627_v23, %v1626_v62  ;;  %v1352_v9 = vmul.f32 %v2518_v28, %v5385_v10  ;;  %v1353_v21 = vmul.f32 %v2518_v28, %v5386_v18  ;;  %v1354_v59 = vmul.f32 %v2520_v19, %v3812_v55 }
 0x1cd   : > { %v2524_v31 = vpop.eup %2523  ;;  %v1628_v40 = vadd.f32 %v4225_v41, %v1488_v20  ;;  %v1629_v60 = vadd.f32 %v4227_v43, %v1489_v57  ;;  %v1630_v6 = vadd.f32 %v4225_v41, %v1490_v15  ;;  %v1631_v42 = vadd.f32 %v4227_v43, %v1491_v47  ;;  %v5389_v15 = vld [vmem:[#allocation63_spill] sm:$0xff] }
 0x1ce   : > { %v2526_v61 = vpop.eup %2525  ;;  %2112 = vst [vmem:[%s4245_s4 + $0xd0] sm:$0xff] %v2358_v34  ;;  %v1492_v48 = vmul.f32 %v4221_v54, %v1352_v9  ;;  %v1493_v3 = vmul.f32 %v4223_v17, %v1353_v21  ;;  %v1355_v5 = vmul.f32 %v2520_v19, %v3816_v38  ;;  %v1494_v55 = vmul.f32 %v4221_v54, %v1354_v59  ;;  %v4489_v26 = vpop.xlane.xlu1 %1058 }
 0x1cf   : > { %v2528_v0 = vpop.eup %2527  ;;  %v2359_v25 = vpack.c.bf16 %v1629_v60, %v1628_v40  ;;  %v2360_v2 = vpack.c.bf16 %v1631_v42, %v1630_v6  ;;  %v1356_v27 = vmul.f32 %v2522_v13, %v5387_v56  ;;  %v1357_v39 = vmul.f32 %v2522_v13, %v5388_v11 }
 0x1d0   : > { %v4493_v22 = vpop.xlane.xlu0 %1061  ;;  %v2530_v4 = vpop.eup %2529  ;;  %v1632_v7 = vadd.f32 %v4225_v41, %v1492_v48  ;;  %v1633_v12 = vadd.f32 %v4227_v43, %v1493_v3  ;;  %v1495_v38 = vmul.f32 %v4223_v17, %v1355_v5  ;;  %v1634_v16 = vadd.f32 %v4225_v41, %v1494_v55 }
 0x1d1   : > { %v2532_v32 = vpop.eup %2531  ;;  %2113 = vst [vmem:[%s4245_s4 + $0xd8] sm:$0xff] %v2359_v25  ;;  %2114 = vst [vmem:[%s4245_s4 + $0xe0] sm:$0xff] %v2360_v2  ;;  %v1496_v51 = vmul.f32 %v4221_v54, %v1356_v27  ;;  %v1497_v28 = vmul.f32 %v4223_v17, %v1357_v39  ;;  %v1358_v45 = vmul.f32 %v2524_v31, %v3836_v63  ;;  %v5392_v25 = vld [vmem:[#allocation66_spill] sm:$0xff]  ;;  %2539 = vrsqrt.f32 %v4440_v8 }
 0x1d2   : > { %v1359_v62 = vmul.f32 %v2524_v31, %v3840_v46  ;;  %v2534_v23 = vpop.eup %2533  ;;  %v2361_v19 = vpack.c.bf16 %v1633_v12, %v1632_v7  ;;  %v1635_v20 = vadd.f32 %v4227_v43, %v1495_v38  ;;  %v1360_v57 = vmul.f32 %v2526_v61, %v3844_v50  ;;  %v4508_v13 = vpop.xlane.xlu1 %1064  ;;  %v5390_v31 = vld [vmem:[#allocation64_spill] sm:$0xff]  ;;  %v5393_v7 = vld [vmem:[#allocation67_spill] sm:$0xff] }
 0x1d3   : > { %v1361_v47 = vmul.f32 %v2526_v61, %v5389_v15  ;;  %v1636_v34 = vadd.f32 %v4225_v41, %v1496_v51  ;;  %v1637_v10 = vadd.f32 %v4227_v43, %v1497_v28  ;;  %v1498_v9 = vmul.f32 %v4221_v54, %v1358_v45  ;;  %v5391_v61 = vld [vmem:[#allocation65_spill] sm:$0xff] }
 0x1d4   : > { %v1499_v63 = vmul.f32 %v4223_v17, %v1359_v62  ;;  %v4514_v46 = vpop.xlane.xlu0 %1067  ;;  %v2536_v18 = vpop.eup %2535  ;;  %2115 = vst [vmem:[%s4245_s4 + $0xe8] sm:$0xff] %v2361_v19  ;;  %v2362_v21 = vpack.c.bf16 %v1635_v20, %v1634_v16  ;;  %v1500_v50 = vmul.f32 %v4221_v54, %v1360_v57  ;;  %v1362_v40 = vmul.f32 %v2528_v0, %v5390_v31 }
 0x1d5   : > { %v1501_v59 = vmul.f32 %v4223_v17, %v1361_v47  ;;  %v2363_v60 = vpack.c.bf16 %v1637_v10, %v1636_v34  ;;  %v1638_v6 = vadd.f32 %v4225_v41, %v1498_v9  ;;  %v1363_v48 = vmul.f32 %v2528_v0, %v5391_v61  ;;  %v5394_v47 = vld [vmem:[#allocation68_spill] sm:$0xff] }
 0x1d6   : > { %v1639_v42 = vadd.f32 %v4227_v43, %v1499_v63  ;;  %2116 = vst [vmem:[%s4245_s4 + $0xf0] sm:$0xff] %v2362_v21  ;;  %v1640_v3 = vadd.f32 %v4225_v41, %v1500_v50  ;;  %v1502_v55 = vmul.f32 %v4221_v54, %v1362_v40  ;;  %v1364_v2 = vmul.f32 %v2530_v4, %v5392_v25  ;;  %v4528_v56 = vpop.xlane.xlu1 %1070 }
 0x1d7   : > { %v1641_v5 = vadd.f32 %v4227_v43, %v1501_v59  ;;  %v2538_v27 = vpop.eup %2537  ;;  %2117 = vst [vmem:[%s4245_s4 + $0xf8] sm:$0xff] %v2363_v60  ;;  %v1503_v39 = vmul.f32 %v4223_v17, %v1363_v48  ;;  %v1365_v0 = vmul.f32 %v2530_v4, %v5393_v7  ;;  %v1366_v12 = vmul.f32 %v2532_v32, %v3884_v37  ;;  %v5395_v59 = vld [vmem:[#allocation69_spill] sm:$0xff]  ;;  %v5396_v60 = vld [vmem:[#allocation70_spill] sm:$0xff] }
 0x1d8   : > { %v2364_v11 = vpack.c.bf16 %v1639_v42, %v1638_v6  ;;  %v4534_v38 = vpop.xlane.xlu0 %1073  ;;  %v1642_v51 = vadd.f32 %v4225_v41, %v1502_v55  ;;  %v1504_v28 = vmul.f32 %v4221_v54, %v1364_v2  ;;  %v1367_v45 = vmul.f32 %v2532_v32, %v3888_v35  ;;  %v5397_v42 = vld [vmem:[#allocation71_spill] sm:$0xff] }
 0x1d9   : > { %v2365_v16 = vpack.c.bf16 %v1641_v5, %v1640_v3  ;;  %v1643_v62 = vadd.f32 %v4227_v43, %v1503_v39  ;;  %v1505_v19 = vmul.f32 %v4223_v17, %v1365_v0  ;;  %v1506_v20 = vmul.f32 %v4221_v54, %v1366_v12 }
 0x1da   : > { %2118 = vst [vmem:[%s4245_s4 + $0x100] sm:$0xff] %v2364_v11  ;;  %v1368_v4 = vmul.f32 %v2534_v23, %v3892_v24  ;;  %v1644_v37 = vadd.f32 %v4225_v41, %v1504_v28  ;;  %v1507_v57 = vmul.f32 %v4223_v17, %v1367_v45  ;;  %v1369_v15 = vmul.f32 %v2534_v23, %v3896_v58  ;;  %v1077_v35 = vpop.xlane.xlu1 %1076 }
 0x1db   : > { %2119 = vst [vmem:[%s4245_s4 + $0x108] sm:$0xff] %v2365_v16  ;;  %v1370_v34 = vmul.f32 %v2536_v18, %v5394_v47  ;;  %v2366_v32 = vpack.c.bf16 %v1643_v62, %v1642_v51  ;;  %v1645_v10 = vadd.f32 %v4227_v43, %v1505_v19  ;;  %v1646_v9 = vadd.f32 %v4225_v41, %v1506_v20 }
 0x1dc   : > { %v1508_v63 = vmul.f32 %v4221_v54, %v1368_v4  ;;  %v1080_v24 = vpop.xlane.xlu0 %1079  ;;  %v1647_v21 = vadd.f32 %v4227_v43, %v1507_v57  ;;  %v1509_v50 = vmul.f32 %v4223_v17, %v1369_v15  ;;  %v1371_v31 = vmul.f32 %v2536_v18, %v5395_v59 }
 0x1dd   : > { %v1510_v58 = vmul.f32 %v4221_v54, %v1370_v34  ;;  %2120 = vst [vmem:[%s4245_s4 + $0x110] sm:$0xff] %v2366_v32  ;;  %v2367_v23 = vpack.c.bf16 %v1645_v10, %v1644_v37  ;;  %v1372_v6 = vmul.f32 %v2538_v27, %v5396_v60  ;;  %v1373_v61 = vmul.f32 %v2538_v27, %v5397_v42 }
 0x1de   : > { %v1648_v40 = vadd.f32 %v4225_v41, %v1508_v63  ;;  %v2368_v48 = vpack.c.bf16 %v1647_v21, %v1646_v9  ;;  %v1649_v3 = vadd.f32 %v4227_v43, %v1509_v50  ;;  %v1511_v5 = vmul.f32 %v4223_v17, %v1371_v31  ;;  %v1083_v25 = vpop.xlane.xlu1 %1082  ;;  %v2540_v59 = vpop.eup %2539 }
 0x1df   : > { %v1650_v55 = vadd.f32 %v4225_v41, %v1510_v58  ;;  %2121 = vst [vmem:[%s4245_s4 + $0x118] sm:$0xff] %v2367_v23  ;;  %v1512_v18 = vmul.f32 %v4221_v54, %v1372_v6  ;;  %v1513_v2 = vmul.f32 %v4223_v17, %v1373_v61  ;;  %v1211_v11 = vadd.f32 1e-05, %v4454_v14  ;;  %v5398_v61 = vld [vmem:[#allocation72_spill] sm:$0xff] }
 0x1e0   : > { %v1086_v39 = vpop.xlane.xlu0 %1085  ;;  %2122 = vst [vmem:[%s4245_s4 + $0x120] sm:$0xff] %v2368_v48  ;;  %v2369_v27 = vpack.c.bf16 %v1649_v3, %v1648_v40  ;;  %v1651_v7 = vadd.f32 %v4227_v43, %v1511_v5  ;;  %2541 = vrsqrt.f32 %v4442_v44  ;;  %v1148_v0 = vmul.f32 0.00390625, %v4456_v52  ;;  %v5399_v3 = vld [vmem:[#allocation73_spill] sm:$0xff] }
 0x1e1   : > { %v1652_v12 = vadd.f32 %v4225_v41, %v1512_v18  ;;  %v1653_v16 = vadd.f32 %v4227_v43, %v1513_v2  ;;  %2543 = vrsqrt.f32 %v4444_v1  ;;  %v1149_v8 = vmul.f32 0.00390625, %v4468_v36 }
 0x1e2   : > { %2123 = vst [vmem:[%s4245_s4 + $0x128] sm:$0xff] %v2369_v27  ;;  %v2370_v14 = vpack.c.bf16 %v1651_v7, %v1650_v55  ;;  %2545 = vrsqrt.f32 %v4450_v53  ;;  %v1212_v51 = vadd.f32 1e-05, %v1148_v0  ;;  %v1150_v28 = vmul.f32 0.00390625, %v4474_v30  ;;  %v1089_v44 = vpop.xlane.xlu1 %1088 }
 0x1e3   : > { %v2371_v45 = vpack.c.bf16 %v1653_v16, %v1652_v12  ;;  %2547 = vrsqrt.f32 %v4452_v33  ;;  %v1213_v52 = vadd.f32 1e-05, %v1149_v8  ;;  %v1151_v62 = vmul.f32 0.00390625, %v4489_v26  ;;  %v5402_v12 = vld [vmem:[#allocation76_spill] sm:$0xff]  ;;  %v5403_v8 = vld [vmem:[#allocation77_spill] sm:$0xff] }
 0x1e4   : > { %2124 = vst [vmem:[%s4245_s4 + $0x130] sm:$0xff] %v2370_v14  ;;  %2549 = vrsqrt.f32 %v1211_v11  ;;  %v1214_v1 = vadd.f32 1e-05, %v1150_v28  ;;  %v1152_v36 = vmul.f32 0.00390625, %v4493_v22  ;;  %v1153_v19 = vmul.f32 0.00390625, %v4508_v13  ;;  %v1092_v20 = vpop.xlane.xlu0 %1091  ;;  %v5400_v11 = vld [vmem:[#allocation74_spill] sm:$0xff] }
 0x1e5   : > { %2125 = vst [vmem:[%s4245_s4 + $0x138] sm:$0xff] %v2371_v45  ;;  %2551 = vrsqrt.f32 %v1212_v51  ;;  %v1215_v53 = vadd.f32 1e-05, %v1151_v62  ;;  %v1154_v30 = vmul.f32 0.00390625, %v4514_v46  ;;  %v1155_v4 = vmul.f32 0.00390625, %v4528_v56 }
 0x1e6   : > { %2553 = vrsqrt.f32 %v1213_v52  ;;  %v1216_v33 = vadd.f32 1e-05, %v1152_v36  ;;  %v1217_v37 = vadd.f32 1e-05, %v1153_v19  ;;  %v1156_v26 = vmul.f32 0.00390625, %v4534_v38  ;;  %v1095_v57 = vpop.xlane.xlu1 %1094 }
 0x1e7   : > { %2555 = vrsqrt.f32 %v1214_v1  ;;  %v1218_v15 = vadd.f32 1e-05, %v1154_v30  ;;  %v1157_v47 = vmul.f32 0.00390625, %v1077_v35  ;;  %v1219_v22 = vadd.f32 1e-05, %v1155_v4 }
 0x1e8   : > { %2557 = vrsqrt.f32 %v1215_v53  ;;  %v1158_v13 = vmul.f32 0.00390625, %v1080_v24  ;;  %v1159_v34 = vmul.f32 0.00390625, %v1083_v25  ;;  %v1220_v32 = vadd.f32 1e-05, %v1156_v26  ;;  %v1098_v63 = vpop.xlane.xlu0 %1097 }
 0x1e9   : > { %2559 = vrsqrt.f32 %v1216_v33  ;;  %v1160_v10 = vmul.f32 0.00390625, %v1086_v39  ;;  %v1161_v9 = vmul.f32 0.00390625, %v1089_v44  ;;  %v1221_v46 = vadd.f32 1e-05, %v1157_v47  ;;  %v5401_v39 = vld [vmem:[#allocation75_spill] sm:$0xff] }
 0x1ea   : > { %2561 = vrsqrt.f32 %v1217_v37  ;;  %v1162_v56 = vmul.f32 0.00390625, %v1092_v20  ;;  %v4588_v21 = vadd.f32 1e-05, %v1158_v13  ;;  %v4590_v38 = vadd.f32 1e-05, %v1159_v34  ;;  %v1101_v35 = vpop.xlane.xlu1 %1100  ;;  %v5404_v37 = vld [vmem:[#allocation78_spill] sm:$0xff] }
 0x1eb   : > { %2563 = vrsqrt.f32 %v1218_v15  ;;  %v4592_v50 = vadd.f32 1e-05, %v1160_v10  ;;  %v4594_v24 = vadd.f32 1e-05, %v1161_v9  ;;  %v4598_v58 = vmul.f32 0.00390625, %v1095_v57  ;;  %v5405_v13 = vld [vmem:[#allocation79_spill] sm:$0xff] }
 0x1ec   : > { %2565 = vrsqrt.f32 %v1219_v22  ;;  %v4596_v31 = vadd.f32 1e-05, %v1162_v56  ;;  %v1374_v40 = vmul.f32 %v2540_v59, %v3932_v29  ;;  %v1375_v60 = vmul.f32 %v2540_v59, %v3936_v49 }
 0x1ed   : > { %v2542_v23 = vpop.eup %2541  ;;  %2567 = vrsqrt.f32 %v1220_v32  ;;  %v4602_v6 = vmul.f32 0.00390625, %v1098_v63  ;;  %v4606_v55 = vmul.f32 0.00390625, %v1101_v35  ;;  %v5407_v63 = vld [vmem:[#allocation81_spill] sm:$0xff] }
 0x1ee   : > { %v2544_v42 = vpop.eup %2543  ;;  %v1376_v48 = vmul.f32 %v2542_v23, %v5398_v61  ;;  %v1377_v5 = vmul.f32 %v2542_v23, %v5399_v3  ;;  %2569 = vrsqrt.f32 %v1221_v46  ;;  %v1514_v18 = vmul.f32 %v4221_v54, %v1374_v40  ;;  %v5406_v46 = vld [vmem:[#allocation80_spill] sm:$0xff]  ;;  %v5409_v61 = vld [vmem:[#allocation83_spill] sm:$0xff] }
 0x1ef   : > { %v2546_v25 = vpop.eup %2545  ;;  %v1515_v2 = vmul.f32 %v4223_v17, %v1375_v60  ;;  %v1378_v29 = vmul.f32 %v2544_v42, %v5400_v11  ;;  %v1379_v49 = vmul.f32 %v2544_v42, %v5401_v39  ;;  %v5408_v60 = vld [vmem:[#allocation82_spill] sm:$0xff]  ;;  %2571 = vrsqrt.f32 %v4588_v21 }
 0x1f0   : > { %v2548_v27 = vpop.eup %2547  ;;  %v1516_v7 = vmul.f32 %v4221_v54, %v1376_v48  ;;  %v1517_v0 = vmul.f32 %v4223_v17, %v1377_v5  ;;  %v1380_v16 = vmul.f32 %v2546_v25, %v5402_v12  ;;  %v1381_v14 = vmul.f32 %v2546_v25, %v5403_v8 }
 0x1f1   : > { %v2550_v51 = vpop.eup %2549  ;;  %v1654_v28 = vadd.f32 %v4225_v41, %v1514_v18  ;;  %v1655_v44 = vadd.f32 %v4227_v43, %v1515_v2  ;;  %v1518_v45 = vmul.f32 %v4221_v54, %v1378_v29  ;;  %v1519_v52 = vmul.f32 %v4223_v17, %v1379_v49  ;;  %v5410_v2 = vld [vmem:[#allocation11_spill] sm:$0xff] }
 0x1f2   : > { %v2552_v62 = vpop.eup %2551  ;;  %v1656_v1 = vadd.f32 %v4225_v41, %v1516_v7  ;;  %v1657_v36 = vadd.f32 %v4227_v43, %v1517_v0  ;;  %v1520_v19 = vmul.f32 %v4221_v54, %v1380_v16  ;;  %v1521_v20 = vmul.f32 %v4223_v17, %v1381_v14  ;;  %v5411_v7 = vld [vmem:[#allocation84_spill] sm:$0xff] }
 0x1f3   : > { %v2554_v53 = vpop.eup %2553  ;;  %v2372_v30 = vpack.c.bf16 %v1655_v44, %v1654_v28  ;;  %v1658_v4 = vadd.f32 %v4225_v41, %v1518_v45  ;;  %v1659_v33 = vadd.f32 %v4227_v43, %v1519_v52  ;;  %v1382_v26 = vmul.f32 %v2548_v27, %v5404_v37 }
 0x1f4   : > { %v2556_v57 = vpop.eup %2555  ;;  %v2373_v15 = vpack.c.bf16 %v1657_v36, %v1656_v1  ;;  %v1660_v47 = vadd.f32 %v4225_v41, %v1520_v19  ;;  %v1661_v22 = vadd.f32 %v4227_v43, %v1521_v20  ;;  %v1383_v34 = vmul.f32 %v2548_v27, %v5405_v13 }
 0x1f5   : > { %v2558_v32 = vpop.eup %2557  ;;  %2126 = vst [vmem:[%s4245_s4 + $0x140] sm:$0xff] %v2372_v30  ;;  %v2374_v10 = vpack.c.bf16 %v1659_v33, %v1658_v4  ;;  %v1522_v9 = vmul.f32 %v4221_v54, %v1382_v26  ;;  %v1384_v56 = vmul.f32 %v2550_v51, %v5406_v46  ;;  %v1385_v35 = vmul.f32 %v2550_v51, %v5407_v63  ;;  %v5412_v51 = vld [vmem:[#allocation12_spill] sm:$0xff]  ;;  %v5414_v26 = vld [vmem:[#allocation13_spill] sm:$0xff]  ;;  %v5417_v46 = vld [vmem:[#allocation87_spill] sm:$0xff] }
 0x1f6   : > { %v2560_v59 = vpop.eup %2559  ;;  %2127 = vst [vmem:[%s4245_s4 + $0x148] sm:$0xff] %v2373_v15  ;;  %v2375_v23 = vpack.c.bf16 %v1661_v22, %v1660_v47  ;;  %v1523_v40 = vmul.f32 %v4223_v17, %v1383_v34  ;;  %v1386_v42 = vmul.f32 %v2552_v62, %v5408_v60  ;;  %v1387_v48 = vmul.f32 %v2552_v62, %v5409_v61  ;;  %v5415_v47 = vld [vmem:[#allocation86_spill] sm:$0xff]  ;;  %v5419_v61 = vld [vmem:[#allocation88_spill] sm:$0xff] }
 0x1f7   : > { %v2562_v3 = vpop.eup %2561  ;;  %2128 = vst [vmem:[%s4245_s4 + $0x150] sm:$0xff] %v2374_v10  ;;  %v1662_v5 = vadd.f32 %v4225_v41, %v1522_v9  ;;  %v1524_v25 = vmul.f32 %v4221_v54, %v1384_v56  ;;  %v1525_v18 = vmul.f32 %v4223_v17, %v1385_v35  ;;  %v1388_v11 = vmul.f32 %v2554_v53, %v5410_v2  ;;  %v5416_v10 = vld [vmem:[#allocation14_spill] sm:$0xff] }
 0x1f8   : > { %v2564_v29 = vpop.eup %2563  ;;  %2129 = vst [vmem:[%s4245_s4 + $0x158] sm:$0xff] %v2375_v23  ;;  %v1663_v39 = vadd.f32 %v4227_v43, %v1523_v40  ;;  %v1526_v49 = vmul.f32 %v4221_v54, %v1386_v42  ;;  %v1527_v27 = vmul.f32 %v4223_v17, %v1387_v48  ;;  %v1389_v0 = vmul.f32 %v2554_v53, %v5411_v7  ;;  %v5413_v53 = vld [vmem:[#allocation85_spill] sm:$0xff]  ;;  %v5418_v23 = vld [vmem:[#allocation15_spill] sm:$0xff] }
 0x1f9   : > { %v2566_v12 = vpop.eup %2565  ;;  %v1664_v16 = vadd.f32 %v4225_v41, %v1524_v25  ;;  %v1665_v8 = vadd.f32 %v4227_v43, %v1525_v18  ;;  %v1528_v14 = vmul.f32 %v4221_v54, %v1388_v11  ;;  %v1390_v28 = vmul.f32 %v2556_v57, %v5412_v51  ;;  %v5420_v18 = vld [vmem:[#allocation16_spill] sm:$0xff] }
 0x1fa   : > { %v2568_v44 = vpop.eup %2567  ;;  %v2376_v45 = vpack.c.bf16 %v1663_v39, %v1662_v5  ;;  %v1666_v52 = vadd.f32 %v4225_v41, %v1526_v49  ;;  %v1667_v62 = vadd.f32 %v4227_v43, %v1527_v27  ;;  %v1529_v1 = vmul.f32 %v4223_v17, %v1389_v0  ;;  %v5421_v0 = vld [vmem:[#allocation89_spill] sm:$0xff] }
 0x1fb   : > { %v2570_v36 = vpop.eup %2569  ;;  %v2377_v19 = vpack.c.bf16 %v1665_v8, %v1664_v16  ;;  %v1668_v20 = vadd.f32 %v4225_v41, %v1528_v14  ;;  %v1391_v30 = vmul.f32 %v2556_v57, %v5413_v53  ;;  %v1530_v4 = vmul.f32 %v4221_v54, %v1390_v28  ;;  %v5422_v28 = vld [vmem:[#allocation17_spill] sm:$0xff] }
 0x1fc   : > { %2130 = vst [vmem:[%s4245_s4 + $0x160] sm:$0xff] %v2376_v45  ;;  %v2378_v33 = vpack.c.bf16 %v1667_v62, %v1666_v52  ;;  %v1669_v37 = vadd.f32 %v4227_v43, %v1529_v1  ;;  %v1392_v15 = vmul.f32 %v2558_v32, %v5414_v26  ;;  %v1393_v22 = vmul.f32 %v2558_v32, %v5415_v47  ;;  %v5423_v52 = vld [vmem:[#allocation90_spill] sm:$0xff]  ;;  %v5426_v26 = vld [vmem:[#allocation19_spill] sm:$0xff] }
 0x1fd   : > { %2131 = vst [vmem:[%s4245_s4 + $0x168] sm:$0xff] %v2377_v19  ;;  %v1531_v13 = vmul.f32 %v4223_v17, %v1391_v30  ;;  %v1670_v34 = vadd.f32 %v4225_v41, %v1530_v4  ;;  %v1394_v9 = vmul.f32 %v2560_v59, %v5416_v10  ;;  %v1395_v57 = vmul.f32 %v2560_v59, %v5417_v46  ;;  %v5425_v30 = vld [vmem:[#allocation91_spill] sm:$0xff] }
 0x1fe   : > { %2132 = vst [vmem:[%s4245_s4 + $0x170] sm:$0xff] %v2378_v33  ;;  %v2379_v56 = vpack.c.bf16 %v1669_v37, %v1668_v20  ;;  %v1532_v63 = vmul.f32 %v4221_v54, %v1392_v15  ;;  %v1533_v35 = vmul.f32 %v4223_v17, %v1393_v22  ;;  %v1396_v40 = vmul.f32 %v2562_v3, %v5418_v23  ;;  %v5424_v20 = vld [vmem:[#allocation18_spill] sm:$0xff] }
 0x1ff   : > { %v1671_v60 = vadd.f32 %v4227_v43, %v1531_v13  ;;  %v1534_v32 = vmul.f32 %v4221_v54, %v1394_v9  ;;  %v1535_v42 = vmul.f32 %v4223_v17, %v1395_v57  ;;  %v1397_v48 = vmul.f32 %v2562_v3, %v5419_v61  ;;  %v5427_v13 = vld [vmem:[#allocation92_spill] sm:$0xff] }
 0x200   : > { %2133 = vst [vmem:[%s4245_s4 + $0x178] sm:$0xff] %v2379_v56  ;;  %v1672_v59 = vadd.f32 %v4225_v41, %v1532_v63  ;;  %v1673_v5 = vadd.f32 %v4227_v43, %v1533_v35  ;;  %v1536_v25 = vmul.f32 %v4221_v54, %v1396_v40  ;;  %v1398_v2 = vmul.f32 %v2564_v29, %v5420_v18 }
 0x201   : > { %v2380_v11 = vpack.c.bf16 %v1671_v60, %v1670_v34  ;;  %v1674_v39 = vadd.f32 %v4225_v41, %v1534_v32  ;;  %v1675_v49 = vadd.f32 %v4227_v43, %v1535_v42  ;;  %v1537_v27 = vmul.f32 %v4223_v17, %v1397_v48  ;;  %v5429_v48 = vld [vmem:[#allocation93_spill] sm:$0xff] }
 0x202   : > { %v2381_v7 = vpack.c.bf16 %v1673_v5, %v1672_v59  ;;  %v1676_v3 = vadd.f32 %v4225_v41, %v1536_v25  ;;  %v1399_v16 = vmul.f32 %v2564_v29, %v5421_v0  ;;  %v1538_v8 = vmul.f32 %v4221_v54, %v1398_v2  ;;  %v5430_v25 = vld [vmem:[#allocation21_spill] sm:$0xff] }
 0x203   : > { %2134 = vst [vmem:[%s4245_s4 + $0x180] sm:$0xff] %v2380_v11  ;;  %v2382_v14 = vpack.c.bf16 %v1675_v49, %v1674_v39  ;;  %v1677_v51 = vadd.f32 %v4227_v43, %v1537_v27  ;;  %v1400_v45 = vmul.f32 %v2566_v12, %v5422_v28  ;;  %v1401_v62 = vmul.f32 %v2566_v12, %v5423_v52  ;;  %v5432_v11 = vld [vmem:[#allocation22_spill] sm:$0xff]  ;;  %v5433_v49 = vld [vmem:[#allocation95_spill] sm:$0xff] }
 0x204   : > { %2135 = vst [vmem:[%s4245_s4 + $0x188] sm:$0xff] %v2381_v7  ;;  %v1539_v1 = vmul.f32 %v4223_v17, %v1399_v16  ;;  %v1678_v19 = vadd.f32 %v4225_v41, %v1538_v8  ;;  %v1402_v53 = vmul.f32 %v2568_v44, %v5424_v20  ;;  %v1403_v29 = vmul.f32 %v2568_v44, %v5425_v30  ;;  %v5436_v30 = vld [vmem:[#allocation24_spill] sm:$0xff] }
 0x205   : > { %2136 = vst [vmem:[%s4245_s4 + $0x190] sm:$0xff] %v2382_v14  ;;  %v2383_v4 = vpack.c.bf16 %v1677_v51, %v1676_v3  ;;  %v1540_v33 = vmul.f32 %v4221_v54, %v1400_v45  ;;  %v1541_v37 = vmul.f32 %v4223_v17, %v1401_v62  ;;  %v1404_v15 = vmul.f32 %v2570_v36, %v5426_v26  ;;  %v5434_v45 = vld [vmem:[#allocation23_spill] sm:$0xff]  ;;  %v5435_v62 = vld [vmem:[#allocation96_spill] sm:$0xff] }
 0x206   : > { %v1679_v47 = vadd.f32 %v4227_v43, %v1539_v1  ;;  %v1542_v12 = vmul.f32 %v4221_v54, %v1402_v53  ;;  %v1543_v22 = vmul.f32 %v4223_v17, %v1403_v29  ;;  %v1405_v34 = vmul.f32 %v2570_v36, %v5427_v13 }
 0x207   : > { %2137 = vst [vmem:[%s4245_s4 + $0x198] sm:$0xff] %v2383_v4  ;;  %v1680_v44 = vadd.f32 %v4225_v41, %v1540_v33  ;;  %v1681_v10 = vadd.f32 %v4227_v43, %v1541_v37  ;;  %v1544_v9 = vmul.f32 %v4221_v54, %v1404_v15  ;;  %2573 = vrsqrt.f32 %v4590_v38  ;;  %v2572_v38 = vpop.eup %2571 }
 0x208   : > { %v2384_v46 = vpack.c.bf16 %v1679_v47, %v1678_v19  ;;  %v1682_v57 = vadd.f32 %v4225_v41, %v1542_v12  ;;  %v1683_v56 = vadd.f32 %v4227_v43, %v1543_v22  ;;  %v1545_v63 = vmul.f32 %v4223_v17, %v1405_v34  ;;  %v5437_v22 = vld [vmem:[#allocation97_spill] sm:$0xff] }
 0x209   : > { %v2385_v35 = vpack.c.bf16 %v1681_v10, %v1680_v44  ;;  %v1684_v36 = vadd.f32 %v4225_v41, %v1544_v9  ;;  %v1227_v23 = vadd.f32 1e-05, %v4598_v58  ;;  %2575 = vrsqrt.f32 %v4592_v50  ;;  %v5428_v58 = vld [vmem:[#allocation20_spill] sm:$0xff]  ;;  %v5438_v44 = vld [vmem:[#allocation25_spill] sm:$0xff] }
 0x20a   : > { %2138 = vst [vmem:[%s4245_s4 + $0x1a0] sm:$0xff] %v2384_v46  ;;  %v2386_v40 = vpack.c.bf16 %v1683_v56, %v1682_v57  ;;  %v1685_v21 = vadd.f32 %v4227_v43, %v1545_v63  ;;  %2577 = vrsqrt.f32 %v4594_v24  ;;  %v1228_v60 = vadd.f32 1e-05, %v4602_v6  ;;  %v5439_v56 = vld [vmem:[#allocation98_spill] sm:$0xff] }
 0x20b   : > { %2139 = vst [vmem:[%s4245_s4 + $0x1a8] sm:$0xff] %v2385_v35  ;;  %2579 = vrsqrt.f32 %v4596_v31  ;;  %v1229_v42 = vadd.f32 1e-05, %v4606_v55  ;;  %v1406_v61 = vmul.f32 %v2572_v38, %v5428_v58  ;;  %v1407_v50 = vmul.f32 %v2572_v38, %v5429_v48  ;;  %v5431_v31 = vld [vmem:[#allocation94_spill] sm:$0xff]  ;;  %v5442_v58 = vld [vmem:[#allocation27_spill] sm:$0xff] }
 0x20c   : > { %2140 = vst [vmem:[%s4245_s4 + $0x1b0] sm:$0xff] %v2386_v40  ;;  %v2387_v32 = vpack.c.bf16 %v1685_v21, %v1684_v36  ;;  %2581 = vrsqrt.f32 %v1227_v23  ;;  %v5440_v40 = vld [vmem:[#allocation26_spill] sm:$0xff] }
 0x20d   : > { %2583 = vrsqrt.f32 %v1228_v60  ;;  %v1546_v24 = vmul.f32 %v4221_v54, %v1406_v61  ;;  %v1547_v6 = vmul.f32 %v4223_v17, %v1407_v50 }
 0x20e   : > { %2141 = vst [vmem:[%s4245_s4 + $0x1b8] sm:$0xff] %v2387_v32  ;;  %2585 = vrsqrt.f32 %v1229_v42  ;;  %v5441_v42 = vld [vmem:[#allocation99_spill] sm:$0xff] }
 0x20f   : > { %v1686_v3 = vadd.f32 %v4225_v41, %v1546_v24  ;;  %v1687_v0 = vadd.f32 %v4227_v43, %v1547_v6 }
 0x211   : > { %v2388_v19 = vpack.c.bf16 %v1687_v0, %v1686_v3 }
 0x213   : > { %2142 = vst [vmem:[%s4245_s4 + $0x1c0] sm:$0xff] %v2388_v19 }
 0x214   : > { %v2574_v59 = vpop.eup %2573 }
 0x215   : > { %v1408_v18 = vmul.f32 %v2574_v59, %v5430_v25  ;;  %v1409_v2 = vmul.f32 %v2574_v59, %v5431_v31 }
 0x216   : > { %v2576_v5 = vpop.eup %2575 }
 0x217   : > { %v2578_v55 = vpop.eup %2577  ;;  %v1410_v39 = vmul.f32 %v2576_v5, %v5432_v11  ;;  %v1411_v27 = vmul.f32 %v2576_v5, %v5433_v49  ;;  %v1548_v16 = vmul.f32 %v4221_v54, %v1408_v18  ;;  %v1549_v8 = vmul.f32 %v4223_v17, %v1409_v2  ;;  %v5443_v5 = vld [vmem:[#allocation100_spill] sm:$0xff] }
 0x218   : > { %v2580_v7 = vpop.eup %2579  ;;  %v1412_v52 = vmul.f32 %v2578_v55, %v5434_v45  ;;  %v1413_v1 = vmul.f32 %v2578_v55, %v5435_v62 }
 0x219   : > { %v2582_v14 = vpop.eup %2581  ;;  %v1550_v51 = vmul.f32 %v4221_v54, %v1410_v39  ;;  %v1551_v28 = vmul.f32 %v4223_v17, %v1411_v27  ;;  %v1688_v20 = vadd.f32 %v4225_v41, %v1548_v16  ;;  %v1689_v53 = vadd.f32 %v4227_v43, %v1549_v8 }
 0x21a   : > { %v1414_v29 = vmul.f32 %v2580_v7, %v5436_v30  ;;  %v2584_v4 = vpop.eup %2583  ;;  %v1552_v26 = vmul.f32 %v4221_v54, %v1412_v52  ;;  %v1553_v15 = vmul.f32 %v4223_v17, %v1413_v1  ;;  %v1415_v13 = vmul.f32 %v2580_v7, %v5437_v22 }
 0x21b   : > { %v1690_v33 = vadd.f32 %v4225_v41, %v1550_v51  ;;  %v1691_v37 = vadd.f32 %v4227_v43, %v1551_v28  ;;  %v2586_v47 = vpop.eup %2585  ;;  %v2389_v12 = vpack.c.bf16 %v1689_v53, %v1688_v20  ;;  %v1416_v10 = vmul.f32 %v2582_v14, %v5438_v44 }
 0x21c   : > { %v1554_v34 = vmul.f32 %v4221_v54, %v1414_v29  ;;  %v1692_v46 = vadd.f32 %v4225_v41, %v1552_v26  ;;  %v1693_v57 = vadd.f32 %v4227_v43, %v1553_v15  ;;  %v1417_v63 = vmul.f32 %v2582_v14, %v5439_v56 }
 0x21d   : > { %v2390_v9 = vpack.c.bf16 %v1691_v37, %v1690_v33  ;;  %2143 = vst [vmem:[%s4245_s4 + $0x1c8] sm:$0xff] %v2389_v12  ;;  %v1555_v35 = vmul.f32 %v4223_v17, %v1415_v13  ;;  %v1556_v23 = vmul.f32 %v4221_v54, %v1416_v10  ;;  %v1418_v21 = vmul.f32 %v2584_v4, %v5440_v40 }
 0x21e   : > { %v1694_v36 = vadd.f32 %v4225_v41, %v1554_v34  ;;  %v2391_v60 = vpack.c.bf16 %v1693_v57, %v1692_v46  ;;  %v1557_v32 = vmul.f32 %v4223_v17, %v1417_v63  ;;  %v1419_v38 = vmul.f32 %v2584_v4, %v5441_v42 }
 0x21f   : > { %2144 = vst [vmem:[%s4245_s4 + $0x1d0] sm:$0xff] %v2390_v9  ;;  %v1420_v61 = vmul.f32 %v2586_v47, %v5442_v58  ;;  %v1695_v48 = vadd.f32 %v4227_v43, %v1555_v35  ;;  %v1696_v50 = vadd.f32 %v4225_v41, %v1556_v23  ;;  %v1558_v59 = vmul.f32 %v4221_v54, %v1418_v21 }
 0x220   : > { %v1421_v24 = vmul.f32 %v2586_v47, %v5443_v5  ;;  %2145 = vst [vmem:[%s4245_s4 + $0x1d8] sm:$0xff] %v2391_v60  ;;  %v1697_v6 = vadd.f32 %v4227_v43, %v1557_v32  ;;  %v1559_v25 = vmul.f32 %v4223_v17, %v1419_v38 }
 0x221   : > { %v1560_v18 = vmul.f32 %v4221_v54, %v1420_v61  ;;  %v2392_v31 = vpack.c.bf16 %v1695_v48, %v1694_v36  ;;  %v1698_v2 = vadd.f32 %v4225_v41, %v1558_v59 }
 0x222   : > { %v1561_v55 = vmul.f32 %v4223_v17, %v1421_v24  ;;  %v2393_v11 = vpack.c.bf16 %v1697_v6, %v1696_v50  ;;  %v1699_v39 = vadd.f32 %v4227_v43, %v1559_v25 }
 0x223   : > { %v1700_v49 = vadd.f32 %v4225_v41, %v1560_v18  ;;  %2146 = vst [vmem:[%s4245_s4 + $0x1e0] sm:$0xff] %v2392_v31 }
 0x224   : > { %v1701_v27 = vadd.f32 %v4227_v43, %v1561_v55  ;;  %2147 = vst [vmem:[%s4245_s4 + $0x1e8] sm:$0xff] %v2393_v11  ;;  %v2394_v54 = vpack.c.bf16 %v1699_v39, %v1698_v2 }
 0x226   : > { %v2395_v17 = vpack.c.bf16 %v1701_v27, %v1700_v49  ;;  %2148 = vst [vmem:[%s4245_s4 + $0x1f0] sm:$0xff] %v2394_v54 }
 0x228   : > { %2149 = vst [vmem:[%s4245_s4 + $0x1f8] sm:$0xff] %v2395_v17 }
 0x229   : > { %2654 = shalt.err (!%p2651_p0)
}
 0x22a   : > { %s2655_s17 = scalar_lea.hbm %s4783_s7, 8192  ;;  %s2659_s29 = scalar_lea.hbm %s4833_s3, 16384 }
 0x22b   : > { %p2656_p4 = scmp.ne.s32.totalorder %s4783_s7, %s2655_s17  ;;  %p2660_p6 = scmp.lt.s32.totalorder %s4783_s7, %s4833_s3 }
 0x22c   : > { %p2661_p13 = scmp.lt.s32.totalorder %s2659_s29, %s2655_s17 }
 0x22d   : > { %p2657_p11 = pnand %p2656_p4, %p5444_p1 }
 0x22e   : > { %p2662_p3 = por %p2661_p13, %p2660_p6 }
 0x22f   : > { %p2658_p5 = pneg %p2657_p11 }
 0x231   : > { %p2663_p12 = pnand %p2662_p3, %p2658_p5 }
 0x233   : > { %2666 = shalt.err (!%p2663_p12)
}
 0x234   : > { %s2716_s26 = smov 128   ;;  %s2717_s4 = smov 8  }
 0x235   : > { %2404 = dma.vmem_to_hbm [thread:$0]  (%p5444_p1), %s4785_s20, 8192, %s4783_s7, %s2151_s16, %s2716_s26, %s2716_s26, %s2717_s4  }
 0x236 PF: > { %s2180_s11 = sand.u32 1, %s2697_s12   ;;  %p5445_p7 = scmp.ne.s32.totalorder %s5090_s25, 0 }
 0x237   : > { %p5446_p8 = scmp.ge.s32.totalorder %s2709_s15, 2  ;;  %s2181_s22 = scalar_lea.sflag [#allocation4], %s2180_s11 }
 0x239   : > { %p2415_p9 = pnand %p5446_p8, %p5445_p7 }
 0x23b   : > { %p2416_p10 = pneg %p2415_p9 }
 0x23d   : > { %2692 = dma.done.wait (%p2416_p10), %s2181_s22, 8192  }
 0x23e   : > { %2694 = vsyncadd (%p2416_p10), %s2181_s22, 4294959104  ;;  %p17_p2 = scmp.ge.s32.totalorder %s2763_s18, 4   ;;  %s5447_s12 = smov %s2701_s13 }
 0x23f   : > { %s5448_s13 = smov %s2705_s14  ;;  %s5449_s14 = smov %s2775_s21 }
 0x240   : > { %s5450_s15 = smov %s2763_s18  ;;  %19 = sbr.rel (!%p17_p2) target bundleno = 6 (0x6), region = 81 }
 0x245   :  { %2186 = vsyncpa [#allocation3], 1 }
 0x246   :  { %2188 = vsyncpa [#allocation3 + $0x1], 1 }
 0x247   :  { %2189 = vsyncpa [#allocation6], 1 }
 0x248   :  { %2190 = vsyncpa [#allocation4], 1 }
 0x249   :  { %2192 = vsyncpa [#allocation4 + $0x1], 1 }

</bundles_post_ra>
